<compile_context>
chip_gen: v6e
topology: v6e:2x2x1
jax: 0.10.0
libtpu: 0.0.40
codegen_flags: <defaults>
</compile_context>

<pallas_src>
import numpy as np
import jax
import jax.numpy as jnp
from jax import lax
from jax.experimental import pallas as pl
from jax.experimental.pallas import tpu as pltpu

C = 4          # fixed by CNN_restriction.__init__ (in_channels = 4)
EPS = 1e-5     # torch.nn.BatchNorm2d default eps
LANE = 128


# ---------------------------------------------------------------------------
# In-kernel helpers
# ---------------------------------------------------------------------------
def _roll_to(y, d, axis):
    """Return z with z[i] = y[(i + d) mod n] along `axis`.

    pltpu.roll follows jnp.roll semantics (out[i] = in[(i - shift) mod n]), so the
    shift amount for a +d displacement is -d.
    """
    n = y.shape[axis]
    amt = (-d) % n
    if amt == 0:
        return y
    return pltpu.roll(y, amt, axis=axis)


def _make_kernel(H, hh):
    def dwconv(y, ksize, wtab_ref, w_row0, rmask_ref, rm_tap0, rows):
        """Depthwise conv via sublane/lane rolls + per-tap per-lane weights.

        Column (W) validity is folded into the weight table; row (H) validity is a
        pre-broadcast (rows, L) mask per vertical tap.  Partial sums go into 4
        rotating accumulators to break the serial VPU dependency chain (no f32 FMA).
        """
        pad = ksize // 2
        accs = [None, None, None, None]
        t = 0
        for kh in range(ksize):
            dh = kh - pad
            yr = _roll_to(y, dh, 0)
            if dh != 0:
                yr = yr * rmask_ref[pl.ds((rm_tap0 + kh) * rows, rows), :]
            for kw in range(ksize):
                dw = kw - pad
                yrc = _roll_to(yr, dw, 1)
                wt = wtab_ref[pl.ds(w_row0 + kh * ksize + kw, 1), :]      # (1, L)
                term = wt * yrc
                accs[t] = term if accs[t] is None else accs[t] + term
                t = (t + 1) & 3
        parts = [a for a in accs if a is not None]
        while len(parts) > 1:
            nxt = [parts[i] + parts[i + 1] for i in range(0, len(parts) - 1, 2)]
            if len(parts) & 1:
                nxt.append(parts[-1])
            parts = nxt
        return parts[0]

    def bn_relu(y, scat2, bcast2, grow, brow):
        """Training-mode BatchNorm (batch statistics) + ReLU in one data pass.

        s1/s2 are fused into a single (1, 2L) stats row (lane-aligned concat) and
        pushed through ONE factorized segment-sum chain:
            (1,2L) @ (2L,2C) @ (2C,2L) -> [mean | E[x^2]] broadcast to every lane.
        1/count is folded into the scatter matrix on the host.
        """
        L = y.shape[1]
        s1 = jnp.sum(y, axis=0, keepdims=True)                 # (1, L)
        s2 = jnp.sum(y * y, axis=0, keepdims=True)             # (1, L)
        s12 = jnp.concatenate([s1, s2], axis=1)                # (1, 2L), lane-aligned
        cs = jnp.dot(jnp.dot(s12, scat2, preferred_element_type=jnp.float32),
                     bcast2, preferred_element_type=jnp.float32)          # (1, 2L)
        mean = cs[:, :L]
        var = jnp.maximum(cs[:, L:] - mean * mean, 0.0)
        scale = lax.rsqrt(var + EPS) * grow
        return jnp.maximum(y * scale + (brow - mean * scale), 0.0)

    def kernel(x_ref, w7_ref, w3f_ref, w3h_ref, rmf_ref, rmh_ref,
               scf_ref, bcf_ref, sch_ref, bch_ref, pwc_ref, rp_ref,
               vf_ref, vh_ref, o_ref):
        scf = scf_ref[...]
        bcf = bcf_ref[...]
        sch = sch_ref[...]
        bch = bch_ref[...]

        y = x_ref[...]                                                     # (H, Lf)

        # block1: depthwise 7x7 (pad 3) + bias + BN + ReLU
        y = dwconv(y, 7, w7_ref, 0, rmf_ref, 0, H) + vf_ref[pl.ds(0, 1), :]
        y = bn_relu(y, scf, bcf, vf_ref[pl.ds(1, 1), :], vf_ref[pl.ds(2, 1), :])

        # block2: depthwise 3x3 (pad 1) + bias + BN + ReLU
        y = dwconv(y, 3, w3f_ref, 0, rmf_ref, 2, H) + vf_ref[pl.ds(3, 1), :]
        y = bn_relu(y, scf, bcf, vf_ref[pl.ds(4, 1), :], vf_ref[pl.ds(5, 1), :])

        # 2x2 AvgPool as two tiny MXU matmuls (no scratch round-trip):
        # W pooling first (halves lane width), then H pooling.
        y = jnp.dot(y, pwc_ref[...], preferred_element_type=jnp.float32)   # (H, Lh)
        y = jnp.dot(rp_ref[...], y, preferred_element_type=jnp.float32)    # (hh, Lh)

        # block3: depthwise 3x3 + bias + BN + ReLU (half resolution)
        y = dwconv(y, 3, w3h_ref, 0, rmh_ref, 0, hh) + vh_ref[pl.ds(0, 1), :]
        y = bn_relu(y, sch, bch, vh_ref[pl.ds(1, 1), :], vh_ref[pl.ds(2, 1), :])

        # block4: depthwise 3x3 + bias + BN + ReLU
        y = dwconv(y, 3, w3h_ref, 9, rmh_ref, 0, hh) + vh_ref[pl.ds(3, 1), :]
        y = bn_relu(y, sch, bch, vh_ref[pl.ds(4, 1), :], vh_ref[pl.ds(5, 1), :])

        # block5: depthwise 1x1 conv, no BN, no ReLU
        o_ref[...] = y * vh_ref[pl.ds(6, 1), :] + vh_ref[pl.ds(7, 1), :]

    return kernel


# ---------------------------------------------------------------------------
# Host-side constant-table construction (done once per (params, shape))
# ---------------------------------------------------------------------------
def _build_tables(params, x_shape):
    (w1, b1, g1, be1, w2, b2, g2, be2, w3w, b3, g3, be3,
     w4, b4, g4, be4, w5, b5) = [np.asarray(p, np.float32) for p in params]
    n, cc, h, w = x_shape
    hh, wh = h // 2, w // 2
    lf_real, lh_real = n * cc * w, n * cc * wh
    Lf = -(-lf_real // LANE) * LANE
    Lh = -(-lh_real // LANE) * LANE

    lf = np.arange(Lf)
    real_f = lf < lf_real
    c_f = np.where(real_f, (lf // w) % cc, 0)
    w_f = lf % w
    lh = np.arange(Lh)
    real_h = lh < lh_real
    c_h = np.where(real_h, (lh // wh) % cc, 0)
    w_h = lh % wh

    # per-tap per-lane conv weight tables with the column-validity mask folded in
    def conv_table(wc, ksz, w_lane, width, c_lane, real_lane):
        taps = np.arange(ksz * ksz)
        dw = (taps % ksz) - ksz // 2
        pos = w_lane[:, None] + dw[None, :]
        valid = ((pos >= 0) & (pos < width) & real_lane[:, None]).astype(np.float32)
        return np.ascontiguousarray((wc[c_lane] * valid).T)               # (ksz*ksz, L)

    w7tab = conv_table(w1.reshape(cc, 49), 7, w_f, w, c_f, real_f)
    w3f_tab = conv_table(w2.reshape(cc, 9), 3, w_f, w, c_f, real_f)
    w3h_tab = np.concatenate(
        [conv_table(w3w.reshape(cc, 9), 3, w_h, wh, c_h, real_h),
         conv_table(w4.reshape(cc, 9), 3, w_h, wh, c_h, real_h)], axis=0)  # (18, Lh)

    # per-lane bias / BN affine / 1x1 conv rows (padded lanes masked to 0)
    maskf = real_f.astype(np.float32)
    maskh = real_h.astype(np.float32)
    vec_f = np.stack([b1, g1, be1, b2, g2, be2], 0)[:, c_f] * maskf[None, :]
    vec_h = (np.stack([b3, g3, be3, b4, g4, be4, w5.reshape(cc), b5], 0)[:, c_h]
             * maskh[None, :])

    # row (height) validity masks per vertical tap, pre-broadcast over lanes
    def row_masks(rows, ksz, L):
        dh = np.arange(ksz) - ksz // 2
        m = (((np.arange(rows)[:, None] + dh[None, :]) >= 0)
             & ((np.arange(rows)[:, None] + dh[None, :]) < rows)).astype(np.float32)
        return np.repeat(m.T.reshape(ksz * rows, 1), L, axis=1)

    rmf_bb = row_masks(h, 7, Lf)            # (7*H, Lf) -- rows 2..4 reused by the 3x3
    rmh_bb = row_masks(hh, 3, Lh)           # (3*hh, Lh)

    # factorized per-channel segment-sum (scatter / broadcast), block-diagonal for the
    # fused [s1 | s2] statistics row; 1/count folded into the scatter half
    def seg_mats(c_lane, real_lane, inv_cnt, L):
        scat = (np.eye(cc, dtype=np.float32)[c_lane]
                * real_lane.astype(np.float32)[:, None] * inv_cnt)         # (L, C)
        bcast = np.eye(cc, dtype=np.float32)[:, c_lane]                     # (C, L)
        scat2 = np.zeros((2 * L, 2 * cc), np.float32)
        scat2[:L, :cc] = scat
        scat2[L:, cc:] = scat
        bcast2 = np.zeros((2 * cc, 2 * L), np.float32)
        bcast2[:cc, :L] = bcast
        bcast2[cc:, L:] = bcast
        return scat2, bcast2

    scat2_f, bcast2_f = seg_mats(c_f, real_f, 1.0 / (n * h * w), Lf)
    scat2_h, bcast2_h = seg_mats(c_h, real_h, 1.0 / (n * hh * wh), Lh)

    # 2x2 average pool factors: W half (Lf, Lh) with 0.25, H half (hh, H) with 1.0
    pwcol = np.zeros((Lf, Lh), np.float32)
    src = lf[real_f]
    dst = (src // w) * wh + (src % w) // 2
    pwcol[src, dst] = 0.25
    rpool = np.zeros((hh, h), np.float32)
    rpool[np.arange(hh), 2 * np.arange(hh)] = 1.0
    rpool[np.arange(hh), 2 * np.arange(hh) + 1] = 1.0

    consts = (w7tab, w3f_tab, w3h_tab, rmf_bb, rmh_bb,
              scat2_f, bcast2_f, scat2_h, bcast2_h, pwcol, rpool, vec_f, vec_h)
    return consts, Lf, Lh, lf_real, lh_real


# ---------------------------------------------------------------------------
# Forward factory (tables hoisted + jitted wrapper) and cached convenience API
# ---------------------------------------------------------------------------
def make_cnn_restriction_forward(params, x_shape):
    """Build a jitted forward for a fixed params tuple and input shape."""
    n, cc, h, w = x_shape
    assert cc == C and h % 2 == 0 and w % 2 == 0
    hh, wh = h // 2, w // 2

    consts_np, Lf, Lh, lf_real, lh_real = _build_tables(params, x_shape)
    consts = tuple(jnp.asarray(a) for a in consts_np)
    kernel = _make_kernel(h, hh)

    bytes_est = 4 * (h * Lf + hh * Lh + sum(int(a.size) for a in consts_np))
    vmem_limit = int(min(max(4 * bytes_est + (8 << 20), 32 << 20), 56 << 20))

    call = pl.pallas_call(
        kernel,
        out_shape=jax.ShapeDtypeStruct((hh, Lh), jnp.float32),
        compiler_params=pltpu.CompilerParams(vmem_limit_bytes=vmem_limit),
    )

    @jax.jit
    def forward(x):
        # (N, C, H, W) -> (H, N*C*W), zero-padded to a multiple of 128 lanes
        xk = jnp.transpose(x.astype(jnp.float32), (2, 0, 1, 3)).reshape(h, lf_real)
        if Lf > lf_real:
            xk = jnp.pad(xk, ((0, 0), (0, Lf - lf_real)))
        out = call(xk, *consts)
        y = out[:, :lh_real].reshape(hh, n, cc, wh)
        return jnp.transpose(y, (1, 2, 0, 3))

    return forward


_FWD_CACHE = {}


def cnn_restriction_forward(x, params):
    """Mirror of CNN_restriction.forward: returns (down-sampled activations, None)."""
    key = (id(params), x.shape, str(x.dtype))
    fwd = _FWD_CACHE.get(key)
    if fwd is None:
        fwd = make_cnn_restriction_forward(params, x.shape)
        _FWD_CACHE[key] = fwd
    return fwd(x), None


# ---------------------------------------------------------------------------
# Pure-JAX reference (mirrors the PyTorch forward) for validation
# ---------------------------------------------------------------------------
def _dwconv_ref(x, w, b, pad):
    y = lax.conv_general_dilated(
        x, w, window_strides=(1, 1), padding=[(pad, pad), (pad, pad)],
        dimension_numbers=('NCHW', 'OIHW', 'NCHW'),
        feature_group_count=C, precision=lax.Precision.HIGHEST)
    return y + b[None, :, None, None]


def _bn_relu_ref(y, g, be):
    mean = jnp.mean(y, axis=(0, 2, 3), keepdims=True)
    var = jnp.mean((y - mean) ** 2, axis=(0, 2, 3), keepdims=True)
    y = (y - mean) * lax.rsqrt(var + EPS) * g[None, :, None, None] + be[None, :, None, None]
    return jnp.maximum(y, 0.0)


def cnn_restriction_reference(x, params):
    (w1, b1, g1, be1, w2, b2, g2, be2, w3w, b3, g3, be3,
     w4, b4, g4, be4, w5, b5) = params
    y = _bn_relu_ref(_dwconv_ref(x, w1, b1, 3), g1, be1)
    y = _bn_relu_ref(_dwconv_ref(y, w2, b2, 1), g2, be2)
    n, cc, h, w = y.shape
    y = y.reshape(n, cc, h // 2, 2, w // 2, 2).mean(axis=(3, 5))
    y = _bn_relu_ref(_dwconv_ref(y, w3w, b3, 1), g3, be3)
    y = _bn_relu_ref(_dwconv_ref(y, w4, b4, 1), g4, be4)
    y = _dwconv_ref(y, w5, b5, 0)
    return y, None


# ---------------------------------------------------------------------------
# Deterministic synthetic parameters (shapes dictated by the module __init__)
# ---------------------------------------------------------------------------
def init_params(key):
    ks = jax.random.split(key, 18)

    def rnd(k_, shape, scale):
        return jax.random.normal(k_, shape, jnp.float32) * scale

    return (
        rnd(ks[0], (C, 1, 7, 7), 1.0 / 7.0),  rnd(ks[1], (C,), 0.1),   # block1 conv w, b
        1.0 + rnd(ks[2], (C,), 0.1),          rnd(ks[3], (C,), 0.1),   # BN1 gamma, beta
        rnd(ks[4], (C, 1, 3, 3), 1.0 / 3.0),  rnd(ks[5], (C,), 0.1),   # block2
        1.0 + rnd(ks[6], (C,), 0.1),          rnd(ks[7], (C,), 0.1),
        rnd(ks[8], (C, 1, 3, 3), 1.0 / 3.0),  rnd(ks[9], (C,), 0.1),   # block3
        1.0 + rnd(ks[10], (C,), 0.1),         rnd(ks[11], (C,), 0.1),
        rnd(ks[12], (C, 1, 3, 3), 1.0 / 3.0), rnd(ks[13], (C,), 0.1),  # block4
        1.0 + rnd(ks[14], (C,), 0.1),         rnd(ks[15], (C,), 0.1),
        rnd(ks[16], (C, 1, 1, 1), 1.0),       rnd(ks[17], (C,), 0.1),  # block5 (1x1)
    )


if __name__ == "__main__":
    key = jax.random.PRNGKey(0)
    kx, kp = jax.random.split(key)
    x = jax.random.normal(kx, (2, C, 16, 16), jnp.float32)
    params = init_params(kp)

    y, aux = cnn_restriction_forward(x, params)
    y = jax.block_until_ready(y)

    y_ref, _ = cnn_restriction_reference(x, params)
    y_ref = jax.block_until_ready(y_ref)

    assert y.shape == (2, C, 8, 8), y.shape
    assert aux is None
    if not np.allclose(np.asarray(y), np.asarray(y_ref), rtol=2e-2, atol=2e-2):
        max_err = float(np.max(np.abs(np.asarray(y) - np.asarray(y_ref))))
        raise AssertionError(f"Pallas kernel mismatch vs reference, max abs err = {max_err}")
    print("KERNEL_OK")
</pallas_src>

<mosaic_0001>
module attributes {stable_mosaic.version = 11 : i64} {
  func.func @kernel(%arg0: memref<16x128xf32, #tpu.memory_space<vmem>>, %arg1: memref<49x128xf32, #tpu.memory_space<vmem>>, %arg2: memref<9x128xf32, #tpu.memory_space<vmem>>, %arg3: memref<18x128xf32, #tpu.memory_space<vmem>>, %arg4: memref<112x128xf32, #tpu.memory_space<vmem>>, %arg5: memref<24x128xf32, #tpu.memory_space<vmem>>, %arg6: memref<256x8xf32, #tpu.memory_space<vmem>>, %arg7: memref<8x256xf32, #tpu.memory_space<vmem>>, %arg8: memref<256x8xf32, #tpu.memory_space<vmem>>, %arg9: memref<8x256xf32, #tpu.memory_space<vmem>>, %arg10: memref<128x128xf32, #tpu.memory_space<vmem>>, %arg11: memref<8x16xf32, #tpu.memory_space<vmem>>, %arg12: memref<6x128xf32, #tpu.memory_space<vmem>>, %arg13: memref<8x128xf32, #tpu.memory_space<vmem>>, %arg14: memref<8x128xf32, #tpu.memory_space<vmem>>) attributes {dimension_semantics = [], scalar_prefetch = 0 : i64, scratch_operands = 0 : i64, tpu.core_type = #tpu.core_type<tc>} {
    %c0 = arith.constant 0 : index
    %c0_0 = arith.constant 0 : index
    %0 = vector.load %arg6[%c0, %c0_0] : memref<256x8xf32, #tpu.memory_space<vmem>>, vector<256x8xf32>
    %c0_1 = arith.constant 0 : index
    %c0_2 = arith.constant 0 : index
    %1 = vector.load %arg7[%c0_1, %c0_2] : memref<8x256xf32, #tpu.memory_space<vmem>>, vector<8x256xf32>
    %c0_3 = arith.constant 0 : index
    %c0_4 = arith.constant 0 : index
    %2 = vector.load %arg8[%c0_3, %c0_4] : memref<256x8xf32, #tpu.memory_space<vmem>>, vector<256x8xf32>
    %c0_5 = arith.constant 0 : index
    %c0_6 = arith.constant 0 : index
    %3 = vector.load %arg9[%c0_5, %c0_6] : memref<8x256xf32, #tpu.memory_space<vmem>>, vector<8x256xf32>
    %c0_7 = arith.constant 0 : index
    %c0_8 = arith.constant 0 : index
    %4 = vector.load %arg0[%c0_7, %c0_8] : memref<16x128xf32, #tpu.memory_space<vmem>>, vector<16x128xf32>
    %c3_i32 = arith.constant 3 : i32
    %5 = tpu.dynamic_rotate %4 by %c3_i32 dim 0 : vector<16x128xf32>, i32 -> vector<16x128xf32>
    %c0_9 = arith.constant 0 : index
    %c0_10 = arith.constant 0 : index
    %6 = vector.load %arg4[%c0_9, %c0_10] : memref<112x128xf32, #tpu.memory_space<vmem>>, vector<16x128xf32>
    %7 = arith.mulf %5, %6 : vector<16x128xf32>
    %c3_i32_11 = arith.constant 3 : i32
    %8 = tpu.dynamic_rotate %7 by %c3_i32_11 dim 1 : vector<16x128xf32>, i32 -> vector<16x128xf32>
    %c0_12 = arith.constant 0 : index
    %c0_13 = arith.constant 0 : index
    %9 = vector.load %arg1[%c0_12, %c0_13] : memref<49x128xf32, #tpu.memory_space<vmem>>, vector<1x128xf32>
    %10 = vector.broadcast %9 : vector<1x128xf32> to vector<16x128xf32>
    %11 = arith.mulf %10, %8 : vector<16x128xf32>
    %c2_i32 = arith.constant 2 : i32
    %12 = tpu.dynamic_rotate %7 by %c2_i32 dim 1 : vector<16x128xf32>, i32 -> vector<16x128xf32>
    %c1 = arith.constant 1 : index
    %c0_14 = arith.constant 0 : index
    %13 = vector.load %arg1[%c1, %c0_14] : memref<49x128xf32, #tpu.memory_space<vmem>>, vector<1x128xf32>
    %14 = vector.broadcast %13 : vector<1x128xf32> to vector<16x128xf32>
    %15 = arith.mulf %14, %12 : vector<16x128xf32>
    %c1_i32 = arith.constant 1 : i32
    %16 = tpu.dynamic_rotate %7 by %c1_i32 dim 1 : vector<16x128xf32>, i32 -> vector<16x128xf32>
    %c2 = arith.constant 2 : index
    %c0_15 = arith.constant 0 : index
    %17 = vector.load %arg1[%c2, %c0_15] : memref<49x128xf32, #tpu.memory_space<vmem>>, vector<1x128xf32>
    %18 = vector.broadcast %17 : vector<1x128xf32> to vector<16x128xf32>
    %19 = arith.mulf %18, %16 : vector<16x128xf32>
    %c3 = arith.constant 3 : index
    %c0_16 = arith.constant 0 : index
    %20 = vector.load %arg1[%c3, %c0_16] : memref<49x128xf32, #tpu.memory_space<vmem>>, vector<1x128xf32>
    %21 = vector.broadcast %20 : vector<1x128xf32> to vector<16x128xf32>
    %22 = arith.mulf %21, %7 : vector<16x128xf32>
    %c127_i32 = arith.constant 127 : i32
    %23 = tpu.dynamic_rotate %7 by %c127_i32 dim 1 : vector<16x128xf32>, i32 -> vector<16x128xf32>
    %c4 = arith.constant 4 : index
    %c0_17 = arith.constant 0 : index
    %24 = vector.load %arg1[%c4, %c0_17] : memref<49x128xf32, #tpu.memory_space<vmem>>, vector<1x128xf32>
    %25 = vector.broadcast %24 : vector<1x128xf32> to vector<16x128xf32>
    %26 = arith.mulf %25, %23 : vector<16x128xf32>
    %27 = arith.addf %11, %26 : vector<16x128xf32>
    %c126_i32 = arith.constant 126 : i32
    %28 = tpu.dynamic_rotate %7 by %c126_i32 dim 1 : vector<16x128xf32>, i32 -> vector<16x128xf32>
    %c5 = arith.constant 5 : index
    %c0_18 = arith.constant 0 : index
    %29 = vector.load %arg1[%c5, %c0_18] : memref<49x128xf32, #tpu.memory_space<vmem>>, vector<1x128xf32>
    %30 = vector.broadcast %29 : vector<1x128xf32> to vector<16x128xf32>
    %31 = arith.mulf %30, %28 : vector<16x128xf32>
    %32 = arith.addf %15, %31 : vector<16x128xf32>
    %c125_i32 = arith.constant 125 : i32
    %33 = tpu.dynamic_rotate %7 by %c125_i32 dim 1 : vector<16x128xf32>, i32 -> vector<16x128xf32>
    %c6 = arith.constant 6 : index
    %c0_19 = arith.constant 0 : index
    %34 = vector.load %arg1[%c6, %c0_19] : memref<49x128xf32, #tpu.memory_space<vmem>>, vector<1x128xf32>
    %35 = vector.broadcast %34 : vector<1x128xf32> to vector<16x128xf32>
    %36 = arith.mulf %35, %33 : vector<16x128xf32>
    %37 = arith.addf %19, %36 : vector<16x128xf32>
    %c2_i32_20 = arith.constant 2 : i32
    %38 = tpu.dynamic_rotate %4 by %c2_i32_20 dim 0 : vector<16x128xf32>, i32 -> vector<16x128xf32>
    %c16 = arith.constant 16 : index
    %c0_21 = arith.constant 0 : index
    %39 = vector.load %arg4[%c16, %c0_21] : memref<112x128xf32, #tpu.memory_space<vmem>>, vector<16x128xf32>
    %40 = arith.mulf %38, %39 : vector<16x128xf32>
    %c3_i32_22 = arith.constant 3 : i32
    %41 = tpu.dynamic_rotate %40 by %c3_i32_22 dim 1 : vector<16x128xf32>, i32 -> vector<16x128xf32>
    %c7 = arith.constant 7 : index
    %c0_23 = arith.constant 0 : index
    %42 = vector.load %arg1[%c7, %c0_23] : memref<49x128xf32, #tpu.memory_space<vmem>>, vector<1x128xf32>
    %43 = vector.broadcast %42 : vector<1x128xf32> to vector<16x128xf32>
    %44 = arith.mulf %43, %41 : vector<16x128xf32>
    %45 = arith.addf %22, %44 : vector<16x128xf32>
    %c2_i32_24 = arith.constant 2 : i32
    %46 = tpu.dynamic_rotate %40 by %c2_i32_24 dim 1 : vector<16x128xf32>, i32 -> vector<16x128xf32>
    %c8 = arith.constant 8 : index
    %c0_25 = arith.constant 0 : index
    %47 = vector.load %arg1[%c8, %c0_25] : memref<49x128xf32, #tpu.memory_space<vmem>>, vector<1x128xf32>
    %48 = vector.broadcast %47 : vector<1x128xf32> to vector<16x128xf32>
    %49 = arith.mulf %48, %46 : vector<16x128xf32>
    %50 = arith.addf %27, %49 : vector<16x128xf32>
    %c1_i32_26 = arith.constant 1 : i32
    %51 = tpu.dynamic_rotate %40 by %c1_i32_26 dim 1 : vector<16x128xf32>, i32 -> vector<16x128xf32>
    %c9 = arith.constant 9 : index
    %c0_27 = arith.constant 0 : index
    %52 = vector.load %arg1[%c9, %c0_27] : memref<49x128xf32, #tpu.memory_space<vmem>>, vector<1x128xf32>
    %53 = vector.broadcast %52 : vector<1x128xf32> to vector<16x128xf32>
    %54 = arith.mulf %53, %51 : vector<16x128xf32>
    %55 = arith.addf %32, %54 : vector<16x128xf32>
    %c10 = arith.constant 10 : index
    %c0_28 = arith.constant 0 : index
    %56 = vector.load %arg1[%c10, %c0_28] : memref<49x128xf32, #tpu.memory_space<vmem>>, vector<1x128xf32>
    %57 = vector.broadcast %56 : vector<1x128xf32> to vector<16x128xf32>
    %58 = arith.mulf %57, %40 : vector<16x128xf32>
    %59 = arith.addf %37, %58 : vector<16x128xf32>
    %c127_i32_29 = arith.constant 127 : i32
    %60 = tpu.dynamic_rotate %40 by %c127_i32_29 dim 1 : vector<16x128xf32>, i32 -> vector<16x128xf32>
    %c11 = arith.constant 11 : index
    %c0_30 = arith.constant 0 : index
    %61 = vector.load %arg1[%c11, %c0_30] : memref<49x128xf32, #tpu.memory_space<vmem>>, vector<1x128xf32>
    %62 = vector.broadcast %61 : vector<1x128xf32> to vector<16x128xf32>
    %63 = arith.mulf %62, %60 : vector<16x128xf32>
    %64 = arith.addf %45, %63 : vector<16x128xf32>
    %c126_i32_31 = arith.constant 126 : i32
    %65 = tpu.dynamic_rotate %40 by %c126_i32_31 dim 1 : vector<16x128xf32>, i32 -> vector<16x128xf32>
    %c12 = arith.constant 12 : index
    %c0_32 = arith.constant 0 : index
    %66 = vector.load %arg1[%c12, %c0_32] : memref<49x128xf32, #tpu.memory_space<vmem>>, vector<1x128xf32>
    %67 = vector.broadcast %66 : vector<1x128xf32> to vector<16x128xf32>
    %68 = arith.mulf %67, %65 : vector<16x128xf32>
    %69 = arith.addf %50, %68 : vector<16x128xf32>
    %c125_i32_33 = arith.constant 125 : i32
    %70 = tpu.dynamic_rotate %40 by %c125_i32_33 dim 1 : vector<16x128xf32>, i32 -> vector<16x128xf32>
    %c13 = arith.constant 13 : index
    %c0_34 = arith.constant 0 : index
    %71 = vector.load %arg1[%c13, %c0_34] : memref<49x128xf32, #tpu.memory_space<vmem>>, vector<1x128xf32>
    %72 = vector.broadcast %71 : vector<1x128xf32> to vector<16x128xf32>
    %73 = arith.mulf %72, %70 : vector<16x128xf32>
    %74 = arith.addf %55, %73 : vector<16x128xf32>
    %c1_i32_35 = arith.constant 1 : i32
    %75 = tpu.dynamic_rotate %4 by %c1_i32_35 dim 0 : vector<16x128xf32>, i32 -> vector<16x128xf32>
    %c32 = arith.constant 32 : index
    %c0_36 = arith.constant 0 : index
    %76 = vector.load %arg4[%c32, %c0_36] : memref<112x128xf32, #tpu.memory_space<vmem>>, vector<16x128xf32>
    %77 = arith.mulf %75, %76 : vector<16x128xf32>
    %c3_i32_37 = arith.constant 3 : i32
    %78 = tpu.dynamic_rotate %77 by %c3_i32_37 dim 1 : vector<16x128xf32>, i32 -> vector<16x128xf32>
    %c14 = arith.constant 14 : index
    %c0_38 = arith.constant 0 : index
    %79 = vector.load %arg1[%c14, %c0_38] : memref<49x128xf32, #tpu.memory_space<vmem>>, vector<1x128xf32>
    %80 = vector.broadcast %79 : vector<1x128xf32> to vector<16x128xf32>
    %81 = arith.mulf %80, %78 : vector<16x128xf32>
    %82 = arith.addf %59, %81 : vector<16x128xf32>
    %c2_i32_39 = arith.constant 2 : i32
    %83 = tpu.dynamic_rotate %77 by %c2_i32_39 dim 1 : vector<16x128xf32>, i32 -> vector<16x128xf32>
    %c15 = arith.constant 15 : index
    %c0_40 = arith.constant 0 : index
    %84 = vector.load %arg1[%c15, %c0_40] : memref<49x128xf32, #tpu.memory_space<vmem>>, vector<1x128xf32>
    %85 = vector.broadcast %84 : vector<1x128xf32> to vector<16x128xf32>
    %86 = arith.mulf %85, %83 : vector<16x128xf32>
    %87 = arith.addf %64, %86 : vector<16x128xf32>
    %c1_i32_41 = arith.constant 1 : i32
    %88 = tpu.dynamic_rotate %77 by %c1_i32_41 dim 1 : vector<16x128xf32>, i32 -> vector<16x128xf32>
    %c16_42 = arith.constant 16 : index
    %c0_43 = arith.constant 0 : index
    %89 = vector.load %arg1[%c16_42, %c0_43] : memref<49x128xf32, #tpu.memory_space<vmem>>, vector<1x128xf32>
    %90 = vector.broadcast %89 : vector<1x128xf32> to vector<16x128xf32>
    %91 = arith.mulf %90, %88 : vector<16x128xf32>
    %92 = arith.addf %69, %91 : vector<16x128xf32>
    %c17 = arith.constant 17 : index
    %c0_44 = arith.constant 0 : index
    %93 = vector.load %arg1[%c17, %c0_44] : memref<49x128xf32, #tpu.memory_space<vmem>>, vector<1x128xf32>
    %94 = vector.broadcast %93 : vector<1x128xf32> to vector<16x128xf32>
    %95 = arith.mulf %94, %77 : vector<16x128xf32>
    %96 = arith.addf %74, %95 : vector<16x128xf32>
    %c127_i32_45 = arith.constant 127 : i32
    %97 = tpu.dynamic_rotate %77 by %c127_i32_45 dim 1 : vector<16x128xf32>, i32 -> vector<16x128xf32>
    %c18 = arith.constant 18 : index
    %c0_46 = arith.constant 0 : index
    %98 = vector.load %arg1[%c18, %c0_46] : memref<49x128xf32, #tpu.memory_space<vmem>>, vector<1x128xf32>
    %99 = vector.broadcast %98 : vector<1x128xf32> to vector<16x128xf32>
    %100 = arith.mulf %99, %97 : vector<16x128xf32>
    %101 = arith.addf %82, %100 : vector<16x128xf32>
    %c126_i32_47 = arith.constant 126 : i32
    %102 = tpu.dynamic_rotate %77 by %c126_i32_47 dim 1 : vector<16x128xf32>, i32 -> vector<16x128xf32>
    %c19 = arith.constant 19 : index
    %c0_48 = arith.constant 0 : index
    %103 = vector.load %arg1[%c19, %c0_48] : memref<49x128xf32, #tpu.memory_space<vmem>>, vector<1x128xf32>
    %104 = vector.broadcast %103 : vector<1x128xf32> to vector<16x128xf32>
    %105 = arith.mulf %104, %102 : vector<16x128xf32>
    %106 = arith.addf %87, %105 : vector<16x128xf32>
    %c125_i32_49 = arith.constant 125 : i32
    %107 = tpu.dynamic_rotate %77 by %c125_i32_49 dim 1 : vector<16x128xf32>, i32 -> vector<16x128xf32>
    %c20 = arith.constant 20 : index
    %c0_50 = arith.constant 0 : index
    %108 = vector.load %arg1[%c20, %c0_50] : memref<49x128xf32, #tpu.memory_space<vmem>>, vector<1x128xf32>
    %109 = vector.broadcast %108 : vector<1x128xf32> to vector<16x128xf32>
    %110 = arith.mulf %109, %107 : vector<16x128xf32>
    %111 = arith.addf %92, %110 : vector<16x128xf32>
    %c3_i32_51 = arith.constant 3 : i32
    %112 = tpu.dynamic_rotate %4 by %c3_i32_51 dim 1 : vector<16x128xf32>, i32 -> vector<16x128xf32>
    %c21 = arith.constant 21 : index
    %c0_52 = arith.constant 0 : index
    %113 = vector.load %arg1[%c21, %c0_52] : memref<49x128xf32, #tpu.memory_space<vmem>>, vector<1x128xf32>
    %114 = vector.broadcast %113 : vector<1x128xf32> to vector<16x128xf32>
    %115 = arith.mulf %114, %112 : vector<16x128xf32>
    %116 = arith.addf %96, %115 : vector<16x128xf32>
    %c2_i32_53 = arith.constant 2 : i32
    %117 = tpu.dynamic_rotate %4 by %c2_i32_53 dim 1 : vector<16x128xf32>, i32 -> vector<16x128xf32>
    %c22 = arith.constant 22 : index
    %c0_54 = arith.constant 0 : index
    %118 = vector.load %arg1[%c22, %c0_54] : memref<49x128xf32, #tpu.memory_space<vmem>>, vector<1x128xf32>
    %119 = vector.broadcast %118 : vector<1x128xf32> to vector<16x128xf32>
    %120 = arith.mulf %119, %117 : vector<16x128xf32>
    %121 = arith.addf %101, %120 : vector<16x128xf32>
    %c1_i32_55 = arith.constant 1 : i32
    %122 = tpu.dynamic_rotate %4 by %c1_i32_55 dim 1 : vector<16x128xf32>, i32 -> vector<16x128xf32>
    %c23 = arith.constant 23 : index
    %c0_56 = arith.constant 0 : index
    %123 = vector.load %arg1[%c23, %c0_56] : memref<49x128xf32, #tpu.memory_space<vmem>>, vector<1x128xf32>
    %124 = vector.broadcast %123 : vector<1x128xf32> to vector<16x128xf32>
    %125 = arith.mulf %124, %122 : vector<16x128xf32>
    %126 = arith.addf %106, %125 : vector<16x128xf32>
    %c24 = arith.constant 24 : index
    %c0_57 = arith.constant 0 : index
    %127 = vector.load %arg1[%c24, %c0_57] : memref<49x128xf32, #tpu.memory_space<vmem>>, vector<1x128xf32>
    %128 = vector.broadcast %127 : vector<1x128xf32> to vector<16x128xf32>
    %129 = arith.mulf %128, %4 : vector<16x128xf32>
    %130 = arith.addf %111, %129 : vector<16x128xf32>
    %c127_i32_58 = arith.constant 127 : i32
    %131 = tpu.dynamic_rotate %4 by %c127_i32_58 dim 1 : vector<16x128xf32>, i32 -> vector<16x128xf32>
    %c25 = arith.constant 25 : index
    %c0_59 = arith.constant 0 : index
    %132 = vector.load %arg1[%c25, %c0_59] : memref<49x128xf32, #tpu.memory_space<vmem>>, vector<1x128xf32>
    %133 = vector.broadcast %132 : vector<1x128xf32> to vector<16x128xf32>
    %134 = arith.mulf %133, %131 : vector<16x128xf32>
    %135 = arith.addf %116, %134 : vector<16x128xf32>
    %c126_i32_60 = arith.constant 126 : i32
    %136 = tpu.dynamic_rotate %4 by %c126_i32_60 dim 1 : vector<16x128xf32>, i32 -> vector<16x128xf32>
    %c26 = arith.constant 26 : index
    %c0_61 = arith.constant 0 : index
    %137 = vector.load %arg1[%c26, %c0_61] : memref<49x128xf32, #tpu.memory_space<vmem>>, vector<1x128xf32>
    %138 = vector.broadcast %137 : vector<1x128xf32> to vector<16x128xf32>
    %139 = arith.mulf %138, %136 : vector<16x128xf32>
    %140 = arith.addf %121, %139 : vector<16x128xf32>
    %c125_i32_62 = arith.constant 125 : i32
    %141 = tpu.dynamic_rotate %4 by %c125_i32_62 dim 1 : vector<16x128xf32>, i32 -> vector<16x128xf32>
    %c27 = arith.constant 27 : index
    %c0_63 = arith.constant 0 : index
    %142 = vector.load %arg1[%c27, %c0_63] : memref<49x128xf32, #tpu.memory_space<vmem>>, vector<1x128xf32>
    %143 = vector.broadcast %142 : vector<1x128xf32> to vector<16x128xf32>
    %144 = arith.mulf %143, %141 : vector<16x128xf32>
    %145 = arith.addf %126, %144 : vector<16x128xf32>
    %c15_i32 = arith.constant 15 : i32
    %146 = tpu.dynamic_rotate %4 by %c15_i32 dim 0 : vector<16x128xf32>, i32 -> vector<16x128xf32>
    %c64 = arith.constant 64 : index
    %c0_64 = arith.constant 0 : index
    %147 = vector.load %arg4[%c64, %c0_64] : memref<112x128xf32, #tpu.memory_space<vmem>>, vector<16x128xf32>
    %148 = arith.mulf %146, %147 : vector<16x128xf32>
    %c3_i32_65 = arith.constant 3 : i32
    %149 = tpu.dynamic_rotate %148 by %c3_i32_65 dim 1 : vector<16x128xf32>, i32 -> vector<16x128xf32>
    %c28 = arith.constant 28 : index
    %c0_66 = arith.constant 0 : index
    %150 = vector.load %arg1[%c28, %c0_66] : memref<49x128xf32, #tpu.memory_space<vmem>>, vector<1x128xf32>
    %151 = vector.broadcast %150 : vector<1x128xf32> to vector<16x128xf32>
    %152 = arith.mulf %151, %149 : vector<16x128xf32>
    %153 = arith.addf %130, %152 : vector<16x128xf32>
    %c2_i32_67 = arith.constant 2 : i32
    %154 = tpu.dynamic_rotate %148 by %c2_i32_67 dim 1 : vector<16x128xf32>, i32 -> vector<16x128xf32>
    %c29 = arith.constant 29 : index
    %c0_68 = arith.constant 0 : index
    %155 = vector.load %arg1[%c29, %c0_68] : memref<49x128xf32, #tpu.memory_space<vmem>>, vector<1x128xf32>
    %156 = vector.broadcast %155 : vector<1x128xf32> to vector<16x128xf32>
    %157 = arith.mulf %156, %154 : vector<16x128xf32>
    %158 = arith.addf %135, %157 : vector<16x128xf32>
    %c1_i32_69 = arith.constant 1 : i32
    %159 = tpu.dynamic_rotate %148 by %c1_i32_69 dim 1 : vector<16x128xf32>, i32 -> vector<16x128xf32>
    %c30 = arith.constant 30 : index
    %c0_70 = arith.constant 0 : index
    %160 = vector.load %arg1[%c30, %c0_70] : memref<49x128xf32, #tpu.memory_space<vmem>>, vector<1x128xf32>
    %161 = vector.broadcast %160 : vector<1x128xf32> to vector<16x128xf32>
    %162 = arith.mulf %161, %159 : vector<16x128xf32>
    %163 = arith.addf %140, %162 : vector<16x128xf32>
    %c31 = arith.constant 31 : index
    %c0_71 = arith.constant 0 : index
    %164 = vector.load %arg1[%c31, %c0_71] : memref<49x128xf32, #tpu.memory_space<vmem>>, vector<1x128xf32>
    %165 = vector.broadcast %164 : vector<1x128xf32> to vector<16x128xf32>
    %166 = arith.mulf %165, %148 : vector<16x128xf32>
    %167 = arith.addf %145, %166 : vector<16x128xf32>
    %c127_i32_72 = arith.constant 127 : i32
    %168 = tpu.dynamic_rotate %148 by %c127_i32_72 dim 1 : vector<16x128xf32>, i32 -> vector<16x128xf32>
    %c32_73 = arith.constant 32 : index
    %c0_74 = arith.constant 0 : index
    %169 = vector.load %arg1[%c32_73, %c0_74] : memref<49x128xf32, #tpu.memory_space<vmem>>, vector<1x128xf32>
    %170 = vector.broadcast %169 : vector<1x128xf32> to vector<16x128xf32>
    %171 = arith.mulf %170, %168 : vector<16x128xf32>
    %172 = arith.addf %153, %171 : vector<16x128xf32>
    %c126_i32_75 = arith.constant 126 : i32
    %173 = tpu.dynamic_rotate %148 by %c126_i32_75 dim 1 : vector<16x128xf32>, i32 -> vector<16x128xf32>
    %c33 = arith.constant 33 : index
    %c0_76 = arith.constant 0 : index
    %174 = vector.load %arg1[%c33, %c0_76] : memref<49x128xf32, #tpu.memory_space<vmem>>, vector<1x128xf32>
    %175 = vector.broadcast %174 : vector<1x128xf32> to vector<16x128xf32>
    %176 = arith.mulf %175, %173 : vector<16x128xf32>
    %177 = arith.addf %158, %176 : vector<16x128xf32>
    %c125_i32_77 = arith.constant 125 : i32
    %178 = tpu.dynamic_rotate %148 by %c125_i32_77 dim 1 : vector<16x128xf32>, i32 -> vector<16x128xf32>
    %c34 = arith.constant 34 : index
    %c0_78 = arith.constant 0 : index
    %179 = vector.load %arg1[%c34, %c0_78] : memref<49x128xf32, #tpu.memory_space<vmem>>, vector<1x128xf32>
    %180 = vector.broadcast %179 : vector<1x128xf32> to vector<16x128xf32>
    %181 = arith.mulf %180, %178 : vector<16x128xf32>
    %182 = arith.addf %163, %181 : vector<16x128xf32>
    %c14_i32 = arith.constant 14 : i32
    %183 = tpu.dynamic_rotate %4 by %c14_i32 dim 0 : vector<16x128xf32>, i32 -> vector<16x128xf32>
    %c80 = arith.constant 80 : index
    %c0_79 = arith.constant 0 : index
    %184 = vector.load %arg4[%c80, %c0_79] : memref<112x128xf32, #tpu.memory_space<vmem>>, vector<16x128xf32>
    %185 = arith.mulf %183, %184 : vector<16x128xf32>
    %c3_i32_80 = arith.constant 3 : i32
    %186 = tpu.dynamic_rotate %185 by %c3_i32_80 dim 1 : vector<16x128xf32>, i32 -> vector<16x128xf32>
    %c35 = arith.constant 35 : index
    %c0_81 = arith.constant 0 : index
    %187 = vector.load %arg1[%c35, %c0_81] : memref<49x128xf32, #tpu.memory_space<vmem>>, vector<1x128xf32>
    %188 = vector.broadcast %187 : vector<1x128xf32> to vector<16x128xf32>
    %189 = arith.mulf %188, %186 : vector<16x128xf32>
    %190 = arith.addf %167, %189 : vector<16x128xf32>
    %c2_i32_82 = arith.constant 2 : i32
    %191 = tpu.dynamic_rotate %185 by %c2_i32_82 dim 1 : vector<16x128xf32>, i32 -> vector<16x128xf32>
    %c36 = arith.constant 36 : index
    %c0_83 = arith.constant 0 : index
    %192 = vector.load %arg1[%c36, %c0_83] : memref<49x128xf32, #tpu.memory_space<vmem>>, vector<1x128xf32>
    %193 = vector.broadcast %192 : vector<1x128xf32> to vector<16x128xf32>
    %194 = arith.mulf %193, %191 : vector<16x128xf32>
    %195 = arith.addf %172, %194 : vector<16x128xf32>
    %c1_i32_84 = arith.constant 1 : i32
    %196 = tpu.dynamic_rotate %185 by %c1_i32_84 dim 1 : vector<16x128xf32>, i32 -> vector<16x128xf32>
    %c37 = arith.constant 37 : index
    %c0_85 = arith.constant 0 : index
    %197 = vector.load %arg1[%c37, %c0_85] : memref<49x128xf32, #tpu.memory_space<vmem>>, vector<1x128xf32>
    %198 = vector.broadcast %197 : vector<1x128xf32> to vector<16x128xf32>
    %199 = arith.mulf %198, %196 : vector<16x128xf32>
    %200 = arith.addf %177, %199 : vector<16x128xf32>
    %c38 = arith.constant 38 : index
    %c0_86 = arith.constant 0 : index
    %201 = vector.load %arg1[%c38, %c0_86] : memref<49x128xf32, #tpu.memory_space<vmem>>, vector<1x128xf32>
    %202 = vector.broadcast %201 : vector<1x128xf32> to vector<16x128xf32>
    %203 = arith.mulf %202, %185 : vector<16x128xf32>
    %204 = arith.addf %182, %203 : vector<16x128xf32>
    %c127_i32_87 = arith.constant 127 : i32
    %205 = tpu.dynamic_rotate %185 by %c127_i32_87 dim 1 : vector<16x128xf32>, i32 -> vector<16x128xf32>
    %c39 = arith.constant 39 : index
    %c0_88 = arith.constant 0 : index
    %206 = vector.load %arg1[%c39, %c0_88] : memref<49x128xf32, #tpu.memory_space<vmem>>, vector<1x128xf32>
    %207 = vector.broadcast %206 : vector<1x128xf32> to vector<16x128xf32>
    %208 = arith.mulf %207, %205 : vector<16x128xf32>
    %209 = arith.addf %190, %208 : vector<16x128xf32>
    %c126_i32_89 = arith.constant 126 : i32
    %210 = tpu.dynamic_rotate %185 by %c126_i32_89 dim 1 : vector<16x128xf32>, i32 -> vector<16x128xf32>
    %c40 = arith.constant 40 : index
    %c0_90 = arith.constant 0 : index
    %211 = vector.load %arg1[%c40, %c0_90] : memref<49x128xf32, #tpu.memory_space<vmem>>, vector<1x128xf32>
    %212 = vector.broadcast %211 : vector<1x128xf32> to vector<16x128xf32>
    %213 = arith.mulf %212, %210 : vector<16x128xf32>
    %214 = arith.addf %195, %213 : vector<16x128xf32>
    %c125_i32_91 = arith.constant 125 : i32
    %215 = tpu.dynamic_rotate %185 by %c125_i32_91 dim 1 : vector<16x128xf32>, i32 -> vector<16x128xf32>
    %c41 = arith.constant 41 : index
    %c0_92 = arith.constant 0 : index
    %216 = vector.load %arg1[%c41, %c0_92] : memref<49x128xf32, #tpu.memory_space<vmem>>, vector<1x128xf32>
    %217 = vector.broadcast %216 : vector<1x128xf32> to vector<16x128xf32>
    %218 = arith.mulf %217, %215 : vector<16x128xf32>
    %219 = arith.addf %200, %218 : vector<16x128xf32>
    %c13_i32 = arith.constant 13 : i32
    %220 = tpu.dynamic_rotate %4 by %c13_i32 dim 0 : vector<16x128xf32>, i32 -> vector<16x128xf32>
    %c96 = arith.constant 96 : index
    %c0_93 = arith.constant 0 : index
    %221 = vector.load %arg4[%c96, %c0_93] : memref<112x128xf32, #tpu.memory_space<vmem>>, vector<16x128xf32>
    %222 = arith.mulf %220, %221 : vector<16x128xf32>
    %c3_i32_94 = arith.constant 3 : i32
    %223 = tpu.dynamic_rotate %222 by %c3_i32_94 dim 1 : vector<16x128xf32>, i32 -> vector<16x128xf32>
    %c42 = arith.constant 42 : index
    %c0_95 = arith.constant 0 : index
    %224 = vector.load %arg1[%c42, %c0_95] : memref<49x128xf32, #tpu.memory_space<vmem>>, vector<1x128xf32>
    %225 = vector.broadcast %224 : vector<1x128xf32> to vector<16x128xf32>
    %226 = arith.mulf %225, %223 : vector<16x128xf32>
    %227 = arith.addf %204, %226 : vector<16x128xf32>
    %c2_i32_96 = arith.constant 2 : i32
    %228 = tpu.dynamic_rotate %222 by %c2_i32_96 dim 1 : vector<16x128xf32>, i32 -> vector<16x128xf32>
    %c43 = arith.constant 43 : index
    %c0_97 = arith.constant 0 : index
    %229 = vector.load %arg1[%c43, %c0_97] : memref<49x128xf32, #tpu.memory_space<vmem>>, vector<1x128xf32>
    %230 = vector.broadcast %229 : vector<1x128xf32> to vector<16x128xf32>
    %231 = arith.mulf %230, %228 : vector<16x128xf32>
    %232 = arith.addf %209, %231 : vector<16x128xf32>
    %c1_i32_98 = arith.constant 1 : i32
    %233 = tpu.dynamic_rotate %222 by %c1_i32_98 dim 1 : vector<16x128xf32>, i32 -> vector<16x128xf32>
    %c44 = arith.constant 44 : index
    %c0_99 = arith.constant 0 : index
    %234 = vector.load %arg1[%c44, %c0_99] : memref<49x128xf32, #tpu.memory_space<vmem>>, vector<1x128xf32>
    %235 = vector.broadcast %234 : vector<1x128xf32> to vector<16x128xf32>
    %236 = arith.mulf %235, %233 : vector<16x128xf32>
    %237 = arith.addf %214, %236 : vector<16x128xf32>
    %c45 = arith.constant 45 : index
    %c0_100 = arith.constant 0 : index
    %238 = vector.load %arg1[%c45, %c0_100] : memref<49x128xf32, #tpu.memory_space<vmem>>, vector<1x128xf32>
    %239 = vector.broadcast %238 : vector<1x128xf32> to vector<16x128xf32>
    %240 = arith.mulf %239, %222 : vector<16x128xf32>
    %241 = arith.addf %219, %240 : vector<16x128xf32>
    %c127_i32_101 = arith.constant 127 : i32
    %242 = tpu.dynamic_rotate %222 by %c127_i32_101 dim 1 : vector<16x128xf32>, i32 -> vector<16x128xf32>
    %c46 = arith.constant 46 : index
    %c0_102 = arith.constant 0 : index
    %243 = vector.load %arg1[%c46, %c0_102] : memref<49x128xf32, #tpu.memory_space<vmem>>, vector<1x128xf32>
    %244 = vector.broadcast %243 : vector<1x128xf32> to vector<16x128xf32>
    %245 = arith.mulf %244, %242 : vector<16x128xf32>
    %246 = arith.addf %227, %245 : vector<16x128xf32>
    %c126_i32_103 = arith.constant 126 : i32
    %247 = tpu.dynamic_rotate %222 by %c126_i32_103 dim 1 : vector<16x128xf32>, i32 -> vector<16x128xf32>
    %c47 = arith.constant 47 : index
    %c0_104 = arith.constant 0 : index
    %248 = vector.load %arg1[%c47, %c0_104] : memref<49x128xf32, #tpu.memory_space<vmem>>, vector<1x128xf32>
    %249 = vector.broadcast %248 : vector<1x128xf32> to vector<16x128xf32>
    %250 = arith.mulf %249, %247 : vector<16x128xf32>
    %251 = arith.addf %232, %250 : vector<16x128xf32>
    %c125_i32_105 = arith.constant 125 : i32
    %252 = tpu.dynamic_rotate %222 by %c125_i32_105 dim 1 : vector<16x128xf32>, i32 -> vector<16x128xf32>
    %c48 = arith.constant 48 : index
    %c0_106 = arith.constant 0 : index
    %253 = vector.load %arg1[%c48, %c0_106] : memref<49x128xf32, #tpu.memory_space<vmem>>, vector<1x128xf32>
    %254 = vector.broadcast %253 : vector<1x128xf32> to vector<16x128xf32>
    %255 = arith.mulf %254, %252 : vector<16x128xf32>
    %256 = arith.addf %237, %255 : vector<16x128xf32>
    %257 = arith.addf %256, %241 : vector<16x128xf32>
    %258 = arith.addf %246, %251 : vector<16x128xf32>
    %259 = arith.addf %257, %258 : vector<16x128xf32>
    %c0_107 = arith.constant 0 : index
    %c0_108 = arith.constant 0 : index
    %260 = vector.load %arg12[%c0_107, %c0_108] : memref<6x128xf32, #tpu.memory_space<vmem>>, vector<1x128xf32>
    %261 = vector.broadcast %260 : vector<1x128xf32> to vector<16x128xf32>
    %262 = arith.addf %259, %261 : vector<16x128xf32>
    %c1_109 = arith.constant 1 : index
    %c0_110 = arith.constant 0 : index
    %263 = vector.load %arg12[%c1_109, %c0_110] : memref<6x128xf32, #tpu.memory_space<vmem>>, vector<1x128xf32>
    %c2_111 = arith.constant 2 : index
    %c0_112 = arith.constant 0 : index
    %264 = vector.load %arg12[%c2_111, %c0_112] : memref<6x128xf32, #tpu.memory_space<vmem>>, vector<1x128xf32>
    %cst = arith.constant dense<0.000000e+00> : vector<128xf32>
    %265 = vector.multi_reduction <add>, %262, %cst [0] : vector<16x128xf32> to vector<128xf32>
    %266 = vector.shape_cast %265 : vector<128xf32> to vector<1x128xf32>
    %267 = arith.mulf %262, %262 : vector<16x128xf32>
    %cst_113 = arith.constant dense<0.000000e+00> : vector<128xf32>
    %268 = vector.multi_reduction <add>, %267, %cst_113 [0] : vector<16x128xf32> to vector<128xf32>
    %269 = vector.shape_cast %268 : vector<128xf32> to vector<1x128xf32>
    %270 = tpu.concatenate %266, %269 in 1 : vector<1x128xf32>, vector<1x128xf32> -> vector<1x256xf32>
    %cst_114 = arith.constant dense<0.000000e+00> : vector<1x8xf32>
    %271 = tpu.matmul %270, %0, %cst_114 {dimension_numbers = #tpu.dot_dimension_numbers<[1], [0], [0], [1], [0, 0, 1, 1], [], []>} : vector<1x256xf32>, vector<256x8xf32>, vector<1x8xf32> -> vector<1x8xf32>
    %cst_115 = arith.constant dense<0.000000e+00> : vector<1x256xf32>
    %272 = tpu.matmul %271, %1, %cst_115 {dimension_numbers = #tpu.dot_dimension_numbers<[1], [0], [0], [1], [0, 0, 1, 1], [], []>} : vector<1x8xf32>, vector<8x256xf32>, vector<1x256xf32> -> vector<1x256xf32>
    %273 = vector.extract_strided_slice %272 {offsets = [0, 0], sizes = [1, 128], strides = [1, 1]} : vector<1x256xf32> to vector<1x128xf32>
    %274 = vector.extract_strided_slice %272 {offsets = [0, 128], sizes = [1, 128], strides = [1, 1]} : vector<1x256xf32> to vector<1x128xf32>
    %275 = arith.mulf %273, %273 : vector<1x128xf32>
    %276 = arith.subf %274, %275 : vector<1x128xf32>
    %cst_116 = arith.constant 0.000000e+00 : f32
    %277 = vector.broadcast %cst_116 : f32 to vector<1x128xf32>
    %278 = arith.maximumf %276, %277 : vector<1x128xf32>
    %cst_117 = arith.constant 9.99999974E-6 : f32
    %279 = vector.broadcast %cst_117 : f32 to vector<1x128xf32>
    %280 = arith.addf %278, %279 : vector<1x128xf32>
    %281 = math.rsqrt %280 : vector<1x128xf32>
    %282 = arith.mulf %281, %263 : vector<1x128xf32>
    %283 = vector.broadcast %282 : vector<1x128xf32> to vector<16x128xf32>
    %284 = arith.mulf %262, %283 : vector<16x128xf32>
    %285 = arith.mulf %273, %282 : vector<1x128xf32>
    %286 = arith.subf %264, %285 : vector<1x128xf32>
    %287 = vector.broadcast %286 : vector<1x128xf32> to vector<16x128xf32>
    %288 = arith.addf %284, %287 : vector<16x128xf32>
    %cst_118 = arith.constant 0.000000e+00 : f32
    %289 = vector.broadcast %cst_118 : f32 to vector<16x128xf32>
    %290 = arith.maximumf %288, %289 : vector<16x128xf32>
    %c1_i32_119 = arith.constant 1 : i32
    %291 = tpu.dynamic_rotate %290 by %c1_i32_119 dim 0 : vector<16x128xf32>, i32 -> vector<16x128xf32>
    %c32_120 = arith.constant 32 : index
    %c0_121 = arith.constant 0 : index
    %292 = vector.load %arg4[%c32_120, %c0_121] : memref<112x128xf32, #tpu.memory_space<vmem>>, vector<16x128xf32>
    %293 = arith.mulf %291, %292 : vector<16x128xf32>
    %c1_i32_122 = arith.constant 1 : i32
    %294 = tpu.dynamic_rotate %293 by %c1_i32_122 dim 1 : vector<16x128xf32>, i32 -> vector<16x128xf32>
    %c0_123 = arith.constant 0 : index
    %c0_124 = arith.constant 0 : index
    %295 = vector.load %arg2[%c0_123, %c0_124] : memref<9x128xf32, #tpu.memory_space<vmem>>, vector<1x128xf32>
    %296 = vector.broadcast %295 : vector<1x128xf32> to vector<16x128xf32>
    %297 = arith.mulf %296, %294 : vector<16x128xf32>
    %c1_125 = arith.constant 1 : index
    %c0_126 = arith.constant 0 : index
    %298 = vector.load %arg2[%c1_125, %c0_126] : memref<9x128xf32, #tpu.memory_space<vmem>>, vector<1x128xf32>
    %299 = vector.broadcast %298 : vector<1x128xf32> to vector<16x128xf32>
    %300 = arith.mulf %299, %293 : vector<16x128xf32>
    %c127_i32_127 = arith.constant 127 : i32
    %301 = tpu.dynamic_rotate %293 by %c127_i32_127 dim 1 : vector<16x128xf32>, i32 -> vector<16x128xf32>
    %c2_128 = arith.constant 2 : index
    %c0_129 = arith.constant 0 : index
    %302 = vector.load %arg2[%c2_128, %c0_129] : memref<9x128xf32, #tpu.memory_space<vmem>>, vector<1x128xf32>
    %303 = vector.broadcast %302 : vector<1x128xf32> to vector<16x128xf32>
    %304 = arith.mulf %303, %301 : vector<16x128xf32>
    %c1_i32_130 = arith.constant 1 : i32
    %305 = tpu.dynamic_rotate %290 by %c1_i32_130 dim 1 : vector<16x128xf32>, i32 -> vector<16x128xf32>
    %c3_131 = arith.constant 3 : index
    %c0_132 = arith.constant 0 : index
    %306 = vector.load %arg2[%c3_131, %c0_132] : memref<9x128xf32, #tpu.memory_space<vmem>>, vector<1x128xf32>
    %307 = vector.broadcast %306 : vector<1x128xf32> to vector<16x128xf32>
    %308 = arith.mulf %307, %305 : vector<16x128xf32>
    %c4_133 = arith.constant 4 : index
    %c0_134 = arith.constant 0 : index
    %309 = vector.load %arg2[%c4_133, %c0_134] : memref<9x128xf32, #tpu.memory_space<vmem>>, vector<1x128xf32>
    %310 = vector.broadcast %309 : vector<1x128xf32> to vector<16x128xf32>
    %311 = arith.mulf %310, %290 : vector<16x128xf32>
    %312 = arith.addf %297, %311 : vector<16x128xf32>
    %c127_i32_135 = arith.constant 127 : i32
    %313 = tpu.dynamic_rotate %290 by %c127_i32_135 dim 1 : vector<16x128xf32>, i32 -> vector<16x128xf32>
    %c5_136 = arith.constant 5 : index
    %c0_137 = arith.constant 0 : index
    %314 = vector.load %arg2[%c5_136, %c0_137] : memref<9x128xf32, #tpu.memory_space<vmem>>, vector<1x128xf32>
    %315 = vector.broadcast %314 : vector<1x128xf32> to vector<16x128xf32>
    %316 = arith.mulf %315, %313 : vector<16x128xf32>
    %317 = arith.addf %300, %316 : vector<16x128xf32>
    %c15_i32_138 = arith.constant 15 : i32
    %318 = tpu.dynamic_rotate %290 by %c15_i32_138 dim 0 : vector<16x128xf32>, i32 -> vector<16x128xf32>
    %c64_139 = arith.constant 64 : index
    %c0_140 = arith.constant 0 : index
    %319 = vector.load %arg4[%c64_139, %c0_140] : memref<112x128xf32, #tpu.memory_space<vmem>>, vector<16x128xf32>
    %320 = arith.mulf %318, %319 : vector<16x128xf32>
    %c1_i32_141 = arith.constant 1 : i32
    %321 = tpu.dynamic_rotate %320 by %c1_i32_141 dim 1 : vector<16x128xf32>, i32 -> vector<16x128xf32>
    %c6_142 = arith.constant 6 : index
    %c0_143 = arith.constant 0 : index
    %322 = vector.load %arg2[%c6_142, %c0_143] : memref<9x128xf32, #tpu.memory_space<vmem>>, vector<1x128xf32>
    %323 = vector.broadcast %322 : vector<1x128xf32> to vector<16x128xf32>
    %324 = arith.mulf %323, %321 : vector<16x128xf32>
    %325 = arith.addf %304, %324 : vector<16x128xf32>
    %c7_144 = arith.constant 7 : index
    %c0_145 = arith.constant 0 : index
    %326 = vector.load %arg2[%c7_144, %c0_145] : memref<9x128xf32, #tpu.memory_space<vmem>>, vector<1x128xf32>
    %327 = vector.broadcast %326 : vector<1x128xf32> to vector<16x128xf32>
    %328 = arith.mulf %327, %320 : vector<16x128xf32>
    %329 = arith.addf %308, %328 : vector<16x128xf32>
    %c127_i32_146 = arith.constant 127 : i32
    %330 = tpu.dynamic_rotate %320 by %c127_i32_146 dim 1 : vector<16x128xf32>, i32 -> vector<16x128xf32>
    %c8_147 = arith.constant 8 : index
    %c0_148 = arith.constant 0 : index
    %331 = vector.load %arg2[%c8_147, %c0_148] : memref<9x128xf32, #tpu.memory_space<vmem>>, vector<1x128xf32>
    %332 = vector.broadcast %331 : vector<1x128xf32> to vector<16x128xf32>
    %333 = arith.mulf %332, %330 : vector<16x128xf32>
    %334 = arith.addf %312, %333 : vector<16x128xf32>
    %335 = arith.addf %334, %317 : vector<16x128xf32>
    %336 = arith.addf %325, %329 : vector<16x128xf32>
    %337 = arith.addf %335, %336 : vector<16x128xf32>
    %c3_149 = arith.constant 3 : index
    %c0_150 = arith.constant 0 : index
    %338 = vector.load %arg12[%c3_149, %c0_150] : memref<6x128xf32, #tpu.memory_space<vmem>>, vector<1x128xf32>
    %339 = vector.broadcast %338 : vector<1x128xf32> to vector<16x128xf32>
    %340 = arith.addf %337, %339 : vector<16x128xf32>
    %c4_151 = arith.constant 4 : index
    %c0_152 = arith.constant 0 : index
    %341 = vector.load %arg12[%c4_151, %c0_152] : memref<6x128xf32, #tpu.memory_space<vmem>>, vector<1x128xf32>
    %c5_153 = arith.constant 5 : index
    %c0_154 = arith.constant 0 : index
    %342 = vector.load %arg12[%c5_153, %c0_154] : memref<6x128xf32, #tpu.memory_space<vmem>>, vector<1x128xf32>
    %cst_155 = arith.constant dense<0.000000e+00> : vector<128xf32>
    %343 = vector.multi_reduction <add>, %340, %cst_155 [0] : vector<16x128xf32> to vector<128xf32>
    %344 = vector.shape_cast %343 : vector<128xf32> to vector<1x128xf32>
    %345 = arith.mulf %340, %340 : vector<16x128xf32>
    %cst_156 = arith.constant dense<0.000000e+00> : vector<128xf32>
    %346 = vector.multi_reduction <add>, %345, %cst_156 [0] : vector<16x128xf32> to vector<128xf32>
    %347 = vector.shape_cast %346 : vector<128xf32> to vector<1x128xf32>
    %348 = tpu.concatenate %344, %347 in 1 : vector<1x128xf32>, vector<1x128xf32> -> vector<1x256xf32>
    %cst_157 = arith.constant dense<0.000000e+00> : vector<1x8xf32>
    %349 = tpu.matmul %348, %0, %cst_157 {dimension_numbers = #tpu.dot_dimension_numbers<[1], [0], [0], [1], [0, 0, 1, 1], [], []>} : vector<1x256xf32>, vector<256x8xf32>, vector<1x8xf32> -> vector<1x8xf32>
    %cst_158 = arith.constant dense<0.000000e+00> : vector<1x256xf32>
    %350 = tpu.matmul %349, %1, %cst_158 {dimension_numbers = #tpu.dot_dimension_numbers<[1], [0], [0], [1], [0, 0, 1, 1], [], []>} : vector<1x8xf32>, vector<8x256xf32>, vector<1x256xf32> -> vector<1x256xf32>
    %351 = vector.extract_strided_slice %350 {offsets = [0, 0], sizes = [1, 128], strides = [1, 1]} : vector<1x256xf32> to vector<1x128xf32>
    %352 = vector.extract_strided_slice %350 {offsets = [0, 128], sizes = [1, 128], strides = [1, 1]} : vector<1x256xf32> to vector<1x128xf32>
    %353 = arith.mulf %351, %351 : vector<1x128xf32>
    %354 = arith.subf %352, %353 : vector<1x128xf32>
    %cst_159 = arith.constant 0.000000e+00 : f32
    %355 = vector.broadcast %cst_159 : f32 to vector<1x128xf32>
    %356 = arith.maximumf %354, %355 : vector<1x128xf32>
    %cst_160 = arith.constant 9.99999974E-6 : f32
    %357 = vector.broadcast %cst_160 : f32 to vector<1x128xf32>
    %358 = arith.addf %356, %357 : vector<1x128xf32>
    %359 = math.rsqrt %358 : vector<1x128xf32>
    %360 = arith.mulf %359, %341 : vector<1x128xf32>
    %361 = vector.broadcast %360 : vector<1x128xf32> to vector<16x128xf32>
    %362 = arith.mulf %340, %361 : vector<16x128xf32>
    %363 = arith.mulf %351, %360 : vector<1x128xf32>
    %364 = arith.subf %342, %363 : vector<1x128xf32>
    %365 = vector.broadcast %364 : vector<1x128xf32> to vector<16x128xf32>
    %366 = arith.addf %362, %365 : vector<16x128xf32>
    %cst_161 = arith.constant 0.000000e+00 : f32
    %367 = vector.broadcast %cst_161 : f32 to vector<16x128xf32>
    %368 = arith.maximumf %366, %367 : vector<16x128xf32>
    %c0_162 = arith.constant 0 : index
    %c0_163 = arith.constant 0 : index
    %369 = vector.load %arg10[%c0_162, %c0_163] : memref<128x128xf32, #tpu.memory_space<vmem>>, vector<128x128xf32>
    %cst_164 = arith.constant dense<0.000000e+00> : vector<16x128xf32>
    %370 = tpu.matmul %368, %369, %cst_164 {dimension_numbers = #tpu.dot_dimension_numbers<[1], [0], [0], [1], [0, 0, 1, 1], [], []>} : vector<16x128xf32>, vector<128x128xf32>, vector<16x128xf32> -> vector<16x128xf32>
    %c0_165 = arith.constant 0 : index
    %c0_166 = arith.constant 0 : index
    %371 = vector.load %arg11[%c0_165, %c0_166] : memref<8x16xf32, #tpu.memory_space<vmem>>, vector<8x16xf32>
    %cst_167 = arith.constant dense<0.000000e+00> : vector<8x128xf32>
    %372 = tpu.matmul %371, %370, %cst_167 {dimension_numbers = #tpu.dot_dimension_numbers<[1], [0], [0], [1], [0, 0, 1, 1], [], []>} : vector<8x16xf32>, vector<16x128xf32>, vector<8x128xf32> -> vector<8x128xf32>
    %c1_i32_168 = arith.constant 1 : i32
    %373 = tpu.dynamic_rotate %372 by %c1_i32_168 dim 0 : vector<8x128xf32>, i32 -> vector<8x128xf32>
    %c0_169 = arith.constant 0 : index
    %c0_170 = arith.constant 0 : index
    %374 = vector.load %arg5[%c0_169, %c0_170] : memref<24x128xf32, #tpu.memory_space<vmem>>, vector<8x128xf32>
    %375 = arith.mulf %373, %374 : vector<8x128xf32>
    %c1_i32_171 = arith.constant 1 : i32
    %376 = tpu.dynamic_rotate %375 by %c1_i32_171 dim 1 : vector<8x128xf32>, i32 -> vector<8x128xf32>
    %c0_172 = arith.constant 0 : index
    %c0_173 = arith.constant 0 : index
    %377 = vector.load %arg3[%c0_172, %c0_173] : memref<18x128xf32, #tpu.memory_space<vmem>>, vector<1x128xf32>
    %378 = vector.broadcast %377 : vector<1x128xf32> to vector<8x128xf32>
    %379 = arith.mulf %378, %376 : vector<8x128xf32>
    %c1_174 = arith.constant 1 : index
    %c0_175 = arith.constant 0 : index
    %380 = vector.load %arg3[%c1_174, %c0_175] : memref<18x128xf32, #tpu.memory_space<vmem>>, vector<1x128xf32>
    %381 = vector.broadcast %380 : vector<1x128xf32> to vector<8x128xf32>
    %382 = arith.mulf %381, %375 : vector<8x128xf32>
    %c127_i32_176 = arith.constant 127 : i32
    %383 = tpu.dynamic_rotate %375 by %c127_i32_176 dim 1 : vector<8x128xf32>, i32 -> vector<8x128xf32>
    %c2_177 = arith.constant 2 : index
    %c0_178 = arith.constant 0 : index
    %384 = vector.load %arg3[%c2_177, %c0_178] : memref<18x128xf32, #tpu.memory_space<vmem>>, vector<1x128xf32>
    %385 = vector.broadcast %384 : vector<1x128xf32> to vector<8x128xf32>
    %386 = arith.mulf %385, %383 : vector<8x128xf32>
    %c1_i32_179 = arith.constant 1 : i32
    %387 = tpu.dynamic_rotate %372 by %c1_i32_179 dim 1 : vector<8x128xf32>, i32 -> vector<8x128xf32>
    %c3_180 = arith.constant 3 : index
    %c0_181 = arith.constant 0 : index
    %388 = vector.load %arg3[%c3_180, %c0_181] : memref<18x128xf32, #tpu.memory_space<vmem>>, vector<1x128xf32>
    %389 = vector.broadcast %388 : vector<1x128xf32> to vector<8x128xf32>
    %390 = arith.mulf %389, %387 : vector<8x128xf32>
    %c4_182 = arith.constant 4 : index
    %c0_183 = arith.constant 0 : index
    %391 = vector.load %arg3[%c4_182, %c0_183] : memref<18x128xf32, #tpu.memory_space<vmem>>, vector<1x128xf32>
    %392 = vector.broadcast %391 : vector<1x128xf32> to vector<8x128xf32>
    %393 = arith.mulf %392, %372 : vector<8x128xf32>
    %394 = arith.addf %379, %393 : vector<8x128xf32>
    %c127_i32_184 = arith.constant 127 : i32
    %395 = tpu.dynamic_rotate %372 by %c127_i32_184 dim 1 : vector<8x128xf32>, i32 -> vector<8x128xf32>
    %c5_185 = arith.constant 5 : index
    %c0_186 = arith.constant 0 : index
    %396 = vector.load %arg3[%c5_185, %c0_186] : memref<18x128xf32, #tpu.memory_space<vmem>>, vector<1x128xf32>
    %397 = vector.broadcast %396 : vector<1x128xf32> to vector<8x128xf32>
    %398 = arith.mulf %397, %395 : vector<8x128xf32>
    %399 = arith.addf %382, %398 : vector<8x128xf32>
    %c7_i32 = arith.constant 7 : i32
    %400 = tpu.dynamic_rotate %372 by %c7_i32 dim 0 : vector<8x128xf32>, i32 -> vector<8x128xf32>
    %c16_187 = arith.constant 16 : index
    %c0_188 = arith.constant 0 : index
    %401 = vector.load %arg5[%c16_187, %c0_188] : memref<24x128xf32, #tpu.memory_space<vmem>>, vector<8x128xf32>
    %402 = arith.mulf %400, %401 : vector<8x128xf32>
    %c1_i32_189 = arith.constant 1 : i32
    %403 = tpu.dynamic_rotate %402 by %c1_i32_189 dim 1 : vector<8x128xf32>, i32 -> vector<8x128xf32>
    %c6_190 = arith.constant 6 : index
    %c0_191 = arith.constant 0 : index
    %404 = vector.load %arg3[%c6_190, %c0_191] : memref<18x128xf32, #tpu.memory_space<vmem>>, vector<1x128xf32>
    %405 = vector.broadcast %404 : vector<1x128xf32> to vector<8x128xf32>
    %406 = arith.mulf %405, %403 : vector<8x128xf32>
    %407 = arith.addf %386, %406 : vector<8x128xf32>
    %c7_192 = arith.constant 7 : index
    %c0_193 = arith.constant 0 : index
    %408 = vector.load %arg3[%c7_192, %c0_193] : memref<18x128xf32, #tpu.memory_space<vmem>>, vector<1x128xf32>
    %409 = vector.broadcast %408 : vector<1x128xf32> to vector<8x128xf32>
    %410 = arith.mulf %409, %402 : vector<8x128xf32>
    %411 = arith.addf %390, %410 : vector<8x128xf32>
    %c127_i32_194 = arith.constant 127 : i32
    %412 = tpu.dynamic_rotate %402 by %c127_i32_194 dim 1 : vector<8x128xf32>, i32 -> vector<8x128xf32>
    %c8_195 = arith.constant 8 : index
    %c0_196 = arith.constant 0 : index
    %413 = vector.load %arg3[%c8_195, %c0_196] : memref<18x128xf32, #tpu.memory_space<vmem>>, vector<1x128xf32>
    %414 = vector.broadcast %413 : vector<1x128xf32> to vector<8x128xf32>
    %415 = arith.mulf %414, %412 : vector<8x128xf32>
    %416 = arith.addf %394, %415 : vector<8x128xf32>
    %417 = arith.addf %416, %399 : vector<8x128xf32>
    %418 = arith.addf %407, %411 : vector<8x128xf32>
    %419 = arith.addf %417, %418 : vector<8x128xf32>
    %c0_197 = arith.constant 0 : index
    %c0_198 = arith.constant 0 : index
    %420 = vector.load %arg13[%c0_197, %c0_198] : memref<8x128xf32, #tpu.memory_space<vmem>>, vector<1x128xf32>
    %421 = vector.broadcast %420 : vector<1x128xf32> to vector<8x128xf32>
    %422 = arith.addf %419, %421 : vector<8x128xf32>
    %c1_199 = arith.constant 1 : index
    %c0_200 = arith.constant 0 : index
    %423 = vector.load %arg13[%c1_199, %c0_200] : memref<8x128xf32, #tpu.memory_space<vmem>>, vector<1x128xf32>
    %c2_201 = arith.constant 2 : index
    %c0_202 = arith.constant 0 : index
    %424 = vector.load %arg13[%c2_201, %c0_202] : memref<8x128xf32, #tpu.memory_space<vmem>>, vector<1x128xf32>
    %cst_203 = arith.constant dense<0.000000e+00> : vector<128xf32>
    %425 = vector.multi_reduction <add>, %422, %cst_203 [0] : vector<8x128xf32> to vector<128xf32>
    %426 = vector.shape_cast %425 : vector<128xf32> to vector<1x128xf32>
    %427 = arith.mulf %422, %422 : vector<8x128xf32>
    %cst_204 = arith.constant dense<0.000000e+00> : vector<128xf32>
    %428 = vector.multi_reduction <add>, %427, %cst_204 [0] : vector<8x128xf32> to vector<128xf32>
    %429 = vector.shape_cast %428 : vector<128xf32> to vector<1x128xf32>
    %430 = tpu.concatenate %426, %429 in 1 : vector<1x128xf32>, vector<1x128xf32> -> vector<1x256xf32>
    %cst_205 = arith.constant dense<0.000000e+00> : vector<1x8xf32>
    %431 = tpu.matmul %430, %2, %cst_205 {dimension_numbers = #tpu.dot_dimension_numbers<[1], [0], [0], [1], [0, 0, 1, 1], [], []>} : vector<1x256xf32>, vector<256x8xf32>, vector<1x8xf32> -> vector<1x8xf32>
    %cst_206 = arith.constant dense<0.000000e+00> : vector<1x256xf32>
    %432 = tpu.matmul %431, %3, %cst_206 {dimension_numbers = #tpu.dot_dimension_numbers<[1], [0], [0], [1], [0, 0, 1, 1], [], []>} : vector<1x8xf32>, vector<8x256xf32>, vector<1x256xf32> -> vector<1x256xf32>
    %433 = vector.extract_strided_slice %432 {offsets = [0, 0], sizes = [1, 128], strides = [1, 1]} : vector<1x256xf32> to vector<1x128xf32>
    %434 = vector.extract_strided_slice %432 {offsets = [0, 128], sizes = [1, 128], strides = [1, 1]} : vector<1x256xf32> to vector<1x128xf32>
    %435 = arith.mulf %433, %433 : vector<1x128xf32>
    %436 = arith.subf %434, %435 : vector<1x128xf32>
    %cst_207 = arith.constant 0.000000e+00 : f32
    %437 = vector.broadcast %cst_207 : f32 to vector<1x128xf32>
    %438 = arith.maximumf %436, %437 : vector<1x128xf32>
    %cst_208 = arith.constant 9.99999974E-6 : f32
    %439 = vector.broadcast %cst_208 : f32 to vector<1x128xf32>
    %440 = arith.addf %438, %439 : vector<1x128xf32>
    %441 = math.rsqrt %440 : vector<1x128xf32>
    %442 = arith.mulf %441, %423 : vector<1x128xf32>
    %443 = vector.broadcast %442 : vector<1x128xf32> to vector<8x128xf32>
    %444 = arith.mulf %422, %443 : vector<8x128xf32>
    %445 = arith.mulf %433, %442 : vector<1x128xf32>
    %446 = arith.subf %424, %445 : vector<1x128xf32>
    %447 = vector.broadcast %446 : vector<1x128xf32> to vector<8x128xf32>
    %448 = arith.addf %444, %447 : vector<8x128xf32>
    %cst_209 = arith.constant 0.000000e+00 : f32
    %449 = vector.broadcast %cst_209 : f32 to vector<8x128xf32>
    %450 = arith.maximumf %448, %449 : vector<8x128xf32>
    %c1_i32_210 = arith.constant 1 : i32
    %451 = tpu.dynamic_rotate %450 by %c1_i32_210 dim 0 : vector<8x128xf32>, i32 -> vector<8x128xf32>
    %c0_211 = arith.constant 0 : index
    %c0_212 = arith.constant 0 : index
    %452 = vector.load %arg5[%c0_211, %c0_212] : memref<24x128xf32, #tpu.memory_space<vmem>>, vector<8x128xf32>
    %453 = arith.mulf %451, %452 : vector<8x128xf32>
    %c1_i32_213 = arith.constant 1 : i32
    %454 = tpu.dynamic_rotate %453 by %c1_i32_213 dim 1 : vector<8x128xf32>, i32 -> vector<8x128xf32>
    %c9_214 = arith.constant 9 : index
    %c0_215 = arith.constant 0 : index
    %455 = vector.load %arg3[%c9_214, %c0_215] : memref<18x128xf32, #tpu.memory_space<vmem>>, vector<1x128xf32>
    %456 = vector.broadcast %455 : vector<1x128xf32> to vector<8x128xf32>
    %457 = arith.mulf %456, %454 : vector<8x128xf32>
    %c10_216 = arith.constant 10 : index
    %c0_217 = arith.constant 0 : index
    %458 = vector.load %arg3[%c10_216, %c0_217] : memref<18x128xf32, #tpu.memory_space<vmem>>, vector<1x128xf32>
    %459 = vector.broadcast %458 : vector<1x128xf32> to vector<8x128xf32>
    %460 = arith.mulf %459, %453 : vector<8x128xf32>
    %c127_i32_218 = arith.constant 127 : i32
    %461 = tpu.dynamic_rotate %453 by %c127_i32_218 dim 1 : vector<8x128xf32>, i32 -> vector<8x128xf32>
    %c11_219 = arith.constant 11 : index
    %c0_220 = arith.constant 0 : index
    %462 = vector.load %arg3[%c11_219, %c0_220] : memref<18x128xf32, #tpu.memory_space<vmem>>, vector<1x128xf32>
    %463 = vector.broadcast %462 : vector<1x128xf32> to vector<8x128xf32>
    %464 = arith.mulf %463, %461 : vector<8x128xf32>
    %c1_i32_221 = arith.constant 1 : i32
    %465 = tpu.dynamic_rotate %450 by %c1_i32_221 dim 1 : vector<8x128xf32>, i32 -> vector<8x128xf32>
    %c12_222 = arith.constant 12 : index
    %c0_223 = arith.constant 0 : index
    %466 = vector.load %arg3[%c12_222, %c0_223] : memref<18x128xf32, #tpu.memory_space<vmem>>, vector<1x128xf32>
    %467 = vector.broadcast %466 : vector<1x128xf32> to vector<8x128xf32>
    %468 = arith.mulf %467, %465 : vector<8x128xf32>
    %c13_224 = arith.constant 13 : index
    %c0_225 = arith.constant 0 : index
    %469 = vector.load %arg3[%c13_224, %c0_225] : memref<18x128xf32, #tpu.memory_space<vmem>>, vector<1x128xf32>
    %470 = vector.broadcast %469 : vector<1x128xf32> to vector<8x128xf32>
    %471 = arith.mulf %470, %450 : vector<8x128xf32>
    %472 = arith.addf %457, %471 : vector<8x128xf32>
    %c127_i32_226 = arith.constant 127 : i32
    %473 = tpu.dynamic_rotate %450 by %c127_i32_226 dim 1 : vector<8x128xf32>, i32 -> vector<8x128xf32>
    %c14_227 = arith.constant 14 : index
    %c0_228 = arith.constant 0 : index
    %474 = vector.load %arg3[%c14_227, %c0_228] : memref<18x128xf32, #tpu.memory_space<vmem>>, vector<1x128xf32>
    %475 = vector.broadcast %474 : vector<1x128xf32> to vector<8x128xf32>
    %476 = arith.mulf %475, %473 : vector<8x128xf32>
    %477 = arith.addf %460, %476 : vector<8x128xf32>
    %c7_i32_229 = arith.constant 7 : i32
    %478 = tpu.dynamic_rotate %450 by %c7_i32_229 dim 0 : vector<8x128xf32>, i32 -> vector<8x128xf32>
    %c16_230 = arith.constant 16 : index
    %c0_231 = arith.constant 0 : index
    %479 = vector.load %arg5[%c16_230, %c0_231] : memref<24x128xf32, #tpu.memory_space<vmem>>, vector<8x128xf32>
    %480 = arith.mulf %478, %479 : vector<8x128xf32>
    %c1_i32_232 = arith.constant 1 : i32
    %481 = tpu.dynamic_rotate %480 by %c1_i32_232 dim 1 : vector<8x128xf32>, i32 -> vector<8x128xf32>
    %c15_233 = arith.constant 15 : index
    %c0_234 = arith.constant 0 : index
    %482 = vector.load %arg3[%c15_233, %c0_234] : memref<18x128xf32, #tpu.memory_space<vmem>>, vector<1x128xf32>
    %483 = vector.broadcast %482 : vector<1x128xf32> to vector<8x128xf32>
    %484 = arith.mulf %483, %481 : vector<8x128xf32>
    %485 = arith.addf %464, %484 : vector<8x128xf32>
    %c16_235 = arith.constant 16 : index
    %c0_236 = arith.constant 0 : index
    %486 = vector.load %arg3[%c16_235, %c0_236] : memref<18x128xf32, #tpu.memory_space<vmem>>, vector<1x128xf32>
    %487 = vector.broadcast %486 : vector<1x128xf32> to vector<8x128xf32>
    %488 = arith.mulf %487, %480 : vector<8x128xf32>
    %489 = arith.addf %468, %488 : vector<8x128xf32>
    %c127_i32_237 = arith.constant 127 : i32
    %490 = tpu.dynamic_rotate %480 by %c127_i32_237 dim 1 : vector<8x128xf32>, i32 -> vector<8x128xf32>
    %c17_238 = arith.constant 17 : index
    %c0_239 = arith.constant 0 : index
    %491 = vector.load %arg3[%c17_238, %c0_239] : memref<18x128xf32, #tpu.memory_space<vmem>>, vector<1x128xf32>
    %492 = vector.broadcast %491 : vector<1x128xf32> to vector<8x128xf32>
    %493 = arith.mulf %492, %490 : vector<8x128xf32>
    %494 = arith.addf %472, %493 : vector<8x128xf32>
    %495 = arith.addf %494, %477 : vector<8x128xf32>
    %496 = arith.addf %485, %489 : vector<8x128xf32>
    %497 = arith.addf %495, %496 : vector<8x128xf32>
    %c3_240 = arith.constant 3 : index
    %c0_241 = arith.constant 0 : index
    %498 = vector.load %arg13[%c3_240, %c0_241] : memref<8x128xf32, #tpu.memory_space<vmem>>, vector<1x128xf32>
    %499 = vector.broadcast %498 : vector<1x128xf32> to vector<8x128xf32>
    %500 = arith.addf %497, %499 : vector<8x128xf32>
    %c4_242 = arith.constant 4 : index
    %c0_243 = arith.constant 0 : index
    %501 = vector.load %arg13[%c4_242, %c0_243] : memref<8x128xf32, #tpu.memory_space<vmem>>, vector<1x128xf32>
    %c5_244 = arith.constant 5 : index
    %c0_245 = arith.constant 0 : index
    %502 = vector.load %arg13[%c5_244, %c0_245] : memref<8x128xf32, #tpu.memory_space<vmem>>, vector<1x128xf32>
    %cst_246 = arith.constant dense<0.000000e+00> : vector<128xf32>
    %503 = vector.multi_reduction <add>, %500, %cst_246 [0] : vector<8x128xf32> to vector<128xf32>
    %504 = vector.shape_cast %503 : vector<128xf32> to vector<1x128xf32>
    %505 = arith.mulf %500, %500 : vector<8x128xf32>
    %cst_247 = arith.constant dense<0.000000e+00> : vector<128xf32>
    %506 = vector.multi_reduction <add>, %505, %cst_247 [0] : vector<8x128xf32> to vector<128xf32>
    %507 = vector.shape_cast %506 : vector<128xf32> to vector<1x128xf32>
    %508 = tpu.concatenate %504, %507 in 1 : vector<1x128xf32>, vector<1x128xf32> -> vector<1x256xf32>
    %cst_248 = arith.constant dense<0.000000e+00> : vector<1x8xf32>
    %509 = tpu.matmul %508, %2, %cst_248 {dimension_numbers = #tpu.dot_dimension_numbers<[1], [0], [0], [1], [0, 0, 1, 1], [], []>} : vector<1x256xf32>, vector<256x8xf32>, vector<1x8xf32> -> vector<1x8xf32>
    %cst_249 = arith.constant dense<0.000000e+00> : vector<1x256xf32>
    %510 = tpu.matmul %509, %3, %cst_249 {dimension_numbers = #tpu.dot_dimension_numbers<[1], [0], [0], [1], [0, 0, 1, 1], [], []>} : vector<1x8xf32>, vector<8x256xf32>, vector<1x256xf32> -> vector<1x256xf32>
    %511 = vector.extract_strided_slice %510 {offsets = [0, 0], sizes = [1, 128], strides = [1, 1]} : vector<1x256xf32> to vector<1x128xf32>
    %512 = vector.extract_strided_slice %510 {offsets = [0, 128], sizes = [1, 128], strides = [1, 1]} : vector<1x256xf32> to vector<1x128xf32>
    %513 = arith.mulf %511, %511 : vector<1x128xf32>
    %514 = arith.subf %512, %513 : vector<1x128xf32>
    %cst_250 = arith.constant 0.000000e+00 : f32
    %515 = vector.broadcast %cst_250 : f32 to vector<1x128xf32>
    %516 = arith.maximumf %514, %515 : vector<1x128xf32>
    %cst_251 = arith.constant 9.99999974E-6 : f32
    %517 = vector.broadcast %cst_251 : f32 to vector<1x128xf32>
    %518 = arith.addf %516, %517 : vector<1x128xf32>
    %519 = math.rsqrt %518 : vector<1x128xf32>
    %520 = arith.mulf %519, %501 : vector<1x128xf32>
    %521 = vector.broadcast %520 : vector<1x128xf32> to vector<8x128xf32>
    %522 = arith.mulf %500, %521 : vector<8x128xf32>
    %523 = arith.mulf %511, %520 : vector<1x128xf32>
    %524 = arith.subf %502, %523 : vector<1x128xf32>
    %525 = vector.broadcast %524 : vector<1x128xf32> to vector<8x128xf32>
    %526 = arith.addf %522, %525 : vector<8x128xf32>
    %cst_252 = arith.constant 0.000000e+00 : f32
    %527 = vector.broadcast %cst_252 : f32 to vector<8x128xf32>
    %528 = arith.maximumf %526, %527 : vector<8x128xf32>
    %c6_253 = arith.constant 6 : index
    %c0_254 = arith.constant 0 : index
    %529 = vector.load %arg13[%c6_253, %c0_254] : memref<8x128xf32, #tpu.memory_space<vmem>>, vector<1x128xf32>
    %530 = vector.broadcast %529 : vector<1x128xf32> to vector<8x128xf32>
    %531 = arith.mulf %528, %530 : vector<8x128xf32>
    %c7_255 = arith.constant 7 : index
    %c0_256 = arith.constant 0 : index
    %532 = vector.load %arg13[%c7_255, %c0_256] : memref<8x128xf32, #tpu.memory_space<vmem>>, vector<1x128xf32>
    %533 = vector.broadcast %532 : vector<1x128xf32> to vector<8x128xf32>
    %534 = arith.addf %531, %533 : vector<8x128xf32>
    %c0_257 = arith.constant 0 : index
    %c0_258 = arith.constant 0 : index
    %535 = vector.load %arg14[%c0_257, %c0_258] : memref<8x128xf32, #tpu.memory_space<vmem>>, vector<8x128xf32>
    tpu.vector_store %arg14[%c0_257, %c0_258], %534 {strides = array<i32>} : memref<8x128xf32, #tpu.memory_space<vmem>>, vector<8x128xf32>,
    return
  }
}

</mosaic_0001>

<bundles_post_ra>
// kernel: forward.1
= control target key start
LH: loop header
LB: loop body
LE: loop exit
PB: predicated region body
PF: predicated region fallthrough
CT: control target
= control target key end

     0   :  { %19 = vsyncpa [#allocation3], 0  ;;  %s3365_s0 = inlined_call_operand.vmem [shape: f32[16,128], index: 0, kind: input, shape index: {}]   ;;  %s3366_s1 = inlined_call_operand.hbm [shape: f32[49,128], index: 1, kind: input, shape index: {}]   ;;  %s3367_s2 = inlined_call_operand.hbm [shape: f32[9,128], index: 2, kind: input, shape index: {}]   ;;  %s3368_s3 = inlined_call_operand.hbm [shape: f32[18,128], index: 3, kind: input, shape index: {}]   ;;  %s3369_s4 = inlined_call_operand.hbm [shape: f32[112,128], index: 4, kind: input, shape index: {}]   ;;  %s3370_s5 = inlined_call_operand.vmem [shape: f32[24,128], index: 5, kind: input, shape index: {}]   ;;  %s3371_s6 = inlined_call_operand.hbm [shape: f32[256,8], index: 6, kind: input, shape index: {}]   ;;  %s3372_s7 = inlined_call_operand.hbm [shape: f32[8,256], index: 7, kind: input, shape index: {}]   ;;  %s3373_s8 = inlined_call_operand.vmem [shape: f32[256,8], index: 8, kind: input, shape index: {}]   ;;  %s3374_s9 = inlined_call_operand.hbm [shape: f32[8,256], index: 9, kind: input, shape index: {}]   ;;  %s3375_s10 = inlined_call_operand.vmem [shape: f32[128,128], index: 10, kind: input, shape index: {}]   ;;  %s3376_s11 = inlined_call_operand.hbm [shape: f32[8,16], index: 11, kind: input, shape index: {}]   ;;  %s3377_s12 = inlined_call_operand.hbm [shape: f32[6,128], index: 12, kind: input, shape index: {}]   ;;  %s3378_s13 = inlined_call_operand.vmem [shape: f32[8,128], index: 13, kind: input, shape index: {}]   ;;  %s3379_s14 = inlined_call_operand.vmem [shape: f32[8,128], index: 14, kind: output, shape index: {}]  }
   0x1   :  { %20 = vsyncpa [#allocation5], 0 }
   0x2   :  { %21 = vsyncpa [#allocation8], 0 }
   0x3   :  { %22 = vsyncpa [#allocation11], 0 }
   0x4   :  { %23 = vsyncpa [#allocation14], 0  ;;  %s2617_s29 = smov [#allocation4]   ;;  %s2618_s15 = smov [#allocation7]  }
   0x5   :  { %s43_s30 = sshll.u32 %s2617_s29, 4  ;;  %s67_s16 = sshll.u32 %s2618_s15, 4  ;;  %s44_s30 = int_to_ptr.vmem [resolvable:$true] %s43_s30  ;;  %s68_s16 = int_to_ptr.vmem [resolvable:$true] %s67_s16 }
   0x6   :  { %s2435_s17 = scalar_lea.vmem %s44_s30, 256  ;;  %p2440_p1 = scmp.lt.s32.totalorder %s44_s30, %s44_s30 }
   0x7   :  { %p2436_p0 = scmp.ne.s32.totalorder %s44_s30, %s2435_s17  ;;  %p2441_p2 = scmp.lt.s32.totalorder %s2435_s17, %s2435_s17 }
   0x9   :  { %p2442_p3 = por %p2441_p2, %p2440_p1 }
   0xb   :  { %p2443_p4 = pnand %p2442_p3, %p2436_p0 }
   0xd   :  { %2446 = shalt.err (!%p2443_p4)
}
   0xe   :  { %s2619_s18 = smov 128   ;;  %s2620_s19 = smov 8  }
   0xf   :  { %49 = dma.hbm_to_vmem [thread:$0]  %s3367_s2, 256, %s44_s30, [#allocation5], %s2619_s18, %s2619_s18, %s2620_s19  }
  0x10   :  { %s2455_s22 = scalar_lea.vmem %s68_s16, 1792  ;;  %p2460_p6 = scmp.lt.s32.totalorder %s68_s16, %s68_s16 }
  0x11   :  { %p2456_p5 = scmp.ne.s32.totalorder %s68_s16, %s2455_s22  ;;  %p2461_p7 = scmp.lt.s32.totalorder %s2455_s22, %s2455_s22 }
  0x13   :  { %p2462_p8 = por %p2461_p7, %p2460_p6 }
  0x15   :  { %p2463_p9 = pnand %p2462_p8, %p2456_p5 }
  0x17   :  { %2466 = shalt.err (!%p2463_p9)
}
  0x18   :  { %73 = dma.hbm_to_vmem [thread:$0]  %s3369_s4, 1792, %s68_s16, [#allocation8], %s2619_s18, %s2619_s18, %s2620_s19  }
  0x19   :  { %s2621_s25 = smov [#allocation10]   ;;  %s2622_s27 = smov [#allocation13]  }
  0x1a   :  { %s94_s26 = sshll.u32 %s2621_s25, 4  ;;  %s118_s28 = sshll.u32 %s2622_s27, 4  ;;  %s95_s26 = int_to_ptr.vmem [resolvable:$true] %s94_s26  ;;  %s119_s28 = int_to_ptr.vmem [resolvable:$true] %s118_s28 }
  0x1b   :  { %s2475_s2 = scalar_lea.vmem %s95_s26, 256  ;;  %p2480_p11 = scmp.lt.s32.totalorder %s95_s26, %s95_s26 }
  0x1c   :  { %p2476_p10 = scmp.ne.s32.totalorder %s95_s26, %s2475_s2  ;;  %p2481_p12 = scmp.lt.s32.totalorder %s2475_s2, %s2475_s2 }
  0x1e   :  { %p2482_p13 = por %p2481_p12, %p2480_p11 }
  0x20   :  { %p2483_p0 = pnand %p2482_p13, %p2476_p10 }
  0x22   :  { %2486 = shalt.err (!%p2483_p0)
}
  0x23   :  { %97 = dma.hbm_to_vmem [thread:$0]  %s3372_s7, 256, %s95_s26, [#allocation11]  }
  0x24   :  { %s2495_s15 = scalar_lea.vmem %s119_s28, 128  ;;  %p2500_p2 = scmp.lt.s32.totalorder %s119_s28, %s119_s28 }
  0x25   :  { %p2496_p1 = scmp.ne.s32.totalorder %s119_s28, %s2495_s15  ;;  %p2501_p3 = scmp.lt.s32.totalorder %s2495_s15, %s2495_s15 }
  0x27   :  { %p2502_p4 = por %p2501_p3, %p2500_p2 }
  0x29   :  { %p2503_p5 = pnand %p2502_p4, %p2496_p1 }
  0x2b   :  { %2506 = shalt.err (!%p2503_p5)
}
  0x2c   :  { %121 = dma.hbm_to_vmem [thread:$0]  %s3376_s11, 128, %s119_s28, [#allocation14]  }
  0x2d   :  { %s2623_s17 = smov [#allocation2]   ;;  %s2624_s21 = smov [#allocation6]  }
  0x2e   :  { %s31_s20 = sshll.u32 %s2623_s17, 4  ;;  %s55_s22 = sshll.u32 %s2624_s21, 4  ;;  %s32_s20 = int_to_ptr.vmem [resolvable:$true] %s31_s20  ;;  %s56_s22 = int_to_ptr.vmem [resolvable:$true] %s55_s22 }
  0x2f   :  { %s2515_s23 = scalar_lea.vmem %s32_s20, 896  ;;  %p2520_p7 = scmp.lt.s32.totalorder %s32_s20, %s32_s20 }
  0x30   :  { %p2516_p6 = scmp.ne.s32.totalorder %s32_s20, %s2515_s23  ;;  %p2521_p8 = scmp.lt.s32.totalorder %s2515_s23, %s2515_s23 }
  0x32   :  { %p2522_p9 = por %p2521_p8, %p2520_p7 }
  0x34   :  { %p2523_p10 = pnand %p2522_p9, %p2516_p6 }
  0x36   :  { %2526 = shalt.err (!%p2523_p10)
}
  0x37   :  { %37 = dma.hbm_to_vmem [thread:$0]  %s3366_s1, 896, %s32_s20, [#allocation3], %s2619_s18, %s2619_s18, %s2620_s19  }
  0x38   :  { %s2535_s11 = scalar_lea.vmem %s56_s22, 384  ;;  %p2540_p12 = scmp.lt.s32.totalorder %s56_s22, %s56_s22 }
  0x39   :  { %p2536_p11 = scmp.ne.s32.totalorder %s56_s22, %s2535_s11  ;;  %p2541_p13 = scmp.lt.s32.totalorder %s2535_s11, %s2535_s11 }
  0x3b   :  { %p2542_p0 = por %p2541_p13, %p2540_p12 }
  0x3d   :  { %p2543_p1 = pnand %p2542_p0, %p2536_p11 }
  0x3f   :  { %2546 = shalt.err (!%p2543_p1)
}
  0x40   :  { %61 = dma.hbm_to_vmem [thread:$0]  %s3368_s3, 384, %s56_s22, [#allocation5], %s2619_s18, %s2619_s18, %s2620_s19  }
  0x41   :  { %s2625_s27 = smov [#allocation9]   ;;  %s2626_s2 = smov [#allocation12]  }
  0x42   :  { %s81_s28 = sshll.u32 %s2625_s27, 4  ;;  %s106_s29 = sshll.u32 %s2626_s2, 4  ;;  %s82_s28 = int_to_ptr.vmem [resolvable:$true] %s81_s28  ;;  %s107_s29 = int_to_ptr.vmem [resolvable:$true] %s106_s29 }
  0x43   :  { %s2555_s1 = scalar_lea.vmem %s82_s28, 4096  ;;  %p2560_p3 = scmp.lt.s32.totalorder %s82_s28, %s82_s28 }
  0x44   :  { %p2556_p2 = scmp.ne.s32.totalorder %s82_s28, %s2555_s1  ;;  %p2561_p4 = scmp.lt.s32.totalorder %s2555_s1, %s2555_s1 }
  0x46   :  { %p2562_p5 = por %p2561_p4, %p2560_p3 }
  0x48   :  { %p2563_p6 = pnand %p2562_p5, %p2556_p2 }
  0x4a   :  { %2566 = shalt.err (!%p2563_p6)
}
  0x4b   :  { %87 = dma.hbm_to_vmem [thread:$0]  %s3371_s6, 4096, %s82_s28, [#allocation8], %s2619_s18, %s2619_s18, %s2620_s19  }
  0x4c   :  { %s2575_s3 = scalar_lea.vmem %s107_s29, 256  ;;  %p2580_p8 = scmp.lt.s32.totalorder %s107_s29, %s107_s29 }
  0x4d   :  { %p2576_p7 = scmp.ne.s32.totalorder %s107_s29, %s2575_s3  ;;  %p2581_p9 = scmp.lt.s32.totalorder %s2575_s3, %s2575_s3 }
  0x4f   :  { %p2582_p10 = por %p2581_p9, %p2580_p8 }
  0x51   :  { %p2583_p11 = pnand %p2582_p10, %p2576_p7 }
  0x53   :  { %2586 = shalt.err (!%p2583_p11)
}
  0x54   :  { %109 = dma.hbm_to_vmem [thread:$0]  %s3374_s9, 256, %s107_s29, [#allocation11]  }
  0x55   :  { %s2627_s17 = smov [#allocation15]  }
  0x56   :  { %s128_s20 = sshll.u32 %s2627_s17, 4  ;;  %s129_s20 = int_to_ptr.vmem [resolvable:$true] %s128_s20 }
  0x57   :  { %s2595_s21 = scalar_lea.vmem %s129_s20, 128  ;;  %p2600_p13 = scmp.lt.s32.totalorder %s129_s20, %s129_s20 }
  0x58   :  { %p2596_p12 = scmp.ne.s32.totalorder %s129_s20, %s2595_s21  ;;  %p2601_p0 = scmp.lt.s32.totalorder %s2595_s21, %s2595_s21 }
  0x5a   :  { %p2602_p1 = por %p2601_p0, %p2600_p13 }
  0x5c   :  { %p2603_p2 = pnand %p2602_p1, %p2596_p12 }
  0x5e   :  { %2606 = shalt.err (!%p2603_p2)
}
  0x5f   :  { %131 = dma.hbm_to_vmem [thread:$0]  %s3377_s12, 128, %s129_s20, [#allocation14]  }
  0x60   :  { %2607 = dma.done.wait [#allocation3], 896  }
  0x61   :  { %2608 = vsyncadd [#allocation3], 4294966400 }
  0x62   :  { %2609 = dma.done.wait [#allocation5], 640  }
  0x63   :  { %2610 = vsyncadd [#allocation5], 4294966656 }
  0x64   :  { %2611 = dma.done.wait [#allocation8], 5888  }
  0x65   :  { %2612 = vsyncadd [#allocation8], 4294961408 }
  0x66   :  { %2613 = dma.done.wait [#allocation11], 512  }
  0x67   :  { %2614 = vsyncadd [#allocation11], 4294966784 }
  0x68   :  { %2615 = dma.done.wait [#allocation14], 256  }
  0x69   :  { %2616 = vsyncadd [#allocation14], 4294967040  ;;  %v233_v0 = vlaneseq  ;;  %v2758_v2 = vld [vmem:[%s3365_s0] sm:$0xff]  ;;  %v2763_v3 = vld [vmem:[%s3365_s0 + $0x8] sm:$0xff]  ;;  %s2628_s23 = smov 127   ;;  %s2629_s7 = smov 3  }
  0x6a   :  { %v231_v4 = vrot.slane %v2758_v2, 5  ;;  %v232_v5 = vrot.slane %v2763_v3, 5  ;;  %v238_v6 = vld [vmem:[#allocation7] sm:$0xff]  ;;  %v239_v9 = vld [vmem:[#allocation7 + $0x8] sm:$0xff]  ;;  %s2630_s0 = smov 2   ;;  %s2631_s24 = smov 1  }
  0x6b   :  { %v2753_v1 = vshrl.u32 %v233_v0, 7  ;;  %v321_v12 = vrot.slane %v2758_v2, 6  ;;  %v322_v13 = vrot.slane %v2763_v3, 6  ;;  %s2632_s11 = smov 126   ;;  %v327_v15 = vld [vmem:[#allocation7 + $0x18] sm:$0xff]  ;;  %v326_v17 = vld [vmem:[#allocation7 + $0x10] sm:$0xff] }
  0x6c   :  { %s2633_s25 = smov 125   ;;  %v417_v20 = vrot.slane %v2758_v2, 7  ;;  %v418_v21 = vrot.slane %v2763_v3, 7  ;;  %v423_v23 = vld [vmem:[#allocation7 + $0x28] sm:$0xff]  ;;  %v422_v25 = vld [vmem:[#allocation7 + $0x20] sm:$0xff]  ;;  %v600_v28 = vrot.slane %v2758_v2, 1 }
  0x6d   :  { %vm235_vm0 = vcmp.lt.s32.totalorder %v2753_v1, 3  ;;  %vm323_vm1 = vcmp.lt.s32.totalorder %v2753_v1, 2  ;;  %vm419_vm2 = vcmp.lt.s32.totalorder %v2753_v1, 1  ;;  %v601_v29 = vrot.slane %v2763_v3, 1  ;;  %v606_v31 = vld [vmem:[#allocation7 + $0x48] sm:$0xff]  ;;  %v605_v33 = vld [vmem:[#allocation7 + $0x40] sm:$0xff] }
  0x6e   :  { %v237_v7 = vsel %vm235_vm0, %v232_v5, %v231_v4  ;;  %v236_v8 = vsel %vm235_vm0, %v231_v4, %v232_v5  ;;  %v324_v14 = vsel %vm323_vm1, %v321_v12, %v322_v13  ;;  %v325_v16 = vsel %vm323_vm1, %v322_v13, %v321_v12  ;;  %v702_v39 = vld [vmem:[#allocation7 + $0x58] sm:$0xff]  ;;  %v701_v41 = vld [vmem:[#allocation7 + $0x50] sm:$0xff]  ;;  %v2116_v54 = vld [vmem:[#allocation2 + $0xa] ss:$0 sm:$0xff] }
  0x6f   :  { %v2768_v10 = vmul.f32 %v238_v6, %v237_v7  ;;  %v2774_v11 = vmul.f32 %v239_v9, %v236_v8  ;;  %v2799_v18 = vmul.f32 %v327_v15, %v324_v14  ;;  %v2801_v19 = vmul.f32 %v326_v17, %v325_v16  ;;  %v2108_v55 = vld [vmem:[#allocation2 + $0x2] ss:$0 sm:$0xff]  ;;  %v2112_v56 = vld [vmem:[#allocation2 + $0x6] ss:$0 sm:$0xff]  ;;  %v2109_v57 = vld [vmem:[#allocation2 + $0x3] ss:$0 sm:$0xff] }
  0x70   :  { %v420_v22 = vsel %vm419_vm2, %v417_v20, %v418_v21  ;;  %v421_v24 = vsel %vm419_vm2, %v418_v21, %v417_v20  ;;  %vm602_vm3 = vcmp.lt.s32.totalorder %v2753_v1, 7  ;;  %v696_v36 = vrot.slane %v2758_v2, 2  ;;  %v2113_v7 = vld [vmem:[#allocation2 + $0x7] ss:$0 sm:$0xff]  ;;  %v798_v15 = vld [vmem:[#allocation7 + $0x68] sm:$0xff] }
  0x71   :  { %282 = vrot.lane.b32.xlu1 %v2768_v10, %s2628_s23  ;;  %242 = vrot.lane.b32.xlu0 %v2768_v10, %s2629_s7  ;;  %v2834_v26 = vmul.f32 %v423_v23, %v420_v22  ;;  %v2836_v27 = vmul.f32 %v422_v25, %v421_v24  ;;  %v604_v30 = vsel %vm602_vm3, %v601_v29, %v600_v28  ;;  %v697_v37 = vrot.slane %v2763_v3, 2  ;;  %v797_v17 = vld [vmem:[#allocation7 + $0x60] sm:$0xff] }
  0x72   :  { %v603_v32 = vsel %vm602_vm3, %v600_v28, %v601_v29  ;;  %v2893_v34 = vmul.f32 %v606_v31, %v604_v30  ;;  %vm698_vm4 = vcmp.lt.s32.totalorder %v2753_v1, 6  ;;  %v792_v58 = vrot.slane %v2758_v2, 3  ;;  %v2110_v30 = vld [vmem:[#allocation2 + $0x4] ss:$0 sm:$0xff]  ;;  %v2106_v31 = vld [vmem:[#allocation2] ss:$0 sm:$0xff] }
  0x73   :  { %v2895_v35 = vmul.f32 %v605_v33, %v603_v32  ;;  %v700_v38 = vsel %vm698_vm4, %v697_v37, %v696_v36  ;;  %v699_v40 = vsel %vm698_vm4, %v696_v36, %v697_v37  ;;  %v793_v59 = vrot.slane %v2763_v3, 3  ;;  %v192_v32 = vld [vmem:[#allocation9 + $0xf8] sm:$0xff] }
  0x74   :  { %v2928_v44 = vmul.f32 %v702_v39, %v700_v38  ;;  %v2930_v45 = vmul.f32 %v701_v41, %v699_v40  ;;  %vm794_vm5 = vcmp.lt.s32.totalorder %v2753_v1, 5  ;;  %v375_v62 = vmul.f32 %v2116_v54, %v2799_v18  ;;  %2193 = vmatprep.subr.mxu0 %v192_v32  ;;  %v176_v39 = vld [vmem:[#allocation9 + $0x78] sm:$0xff]  ;;  %2228 = vmatprep.subr.mxu1 %v192_v32 }
  0x75   :  { %284 = vrot.lane.b32.xlu1 %v2774_v11, %s2628_s23  ;;  %244 = vrot.lane.b32.xlu0 %v2774_v11, %s2629_s7  ;;  %v374_v63 = vmul.f32 %v2116_v54, %v2801_v19  ;;  %v281_v8 = vmul.f32 %v2109_v57, %v2774_v11  ;;  %v280_v9 = vmul.f32 %v2109_v57, %v2768_v10  ;;  %v2107_v54 = vld [vmem:[#allocation2 + $0x1] ss:$0 sm:$0xff]  ;;  %vm989_vm6 = vcmask 64512  }
  0x76   :  { %v796_v14 = vsel %vm794_vm5, %v793_v59, %v792_v58  ;;  %v795_v16 = vsel %vm794_vm5, %v792_v58, %v793_v59  ;;  %2194 = vmatpush3.msra.mxu0 %v176_v39  ;;  %2229 = vmatpush3.msra.mxu1 %v176_v39  ;;  %v171_v39 = vld [vmem:[#allocation9 + $0x50] sm:$0xff]  ;;  %vm2635_vm7 = vmmov 0   ;;  %vm1484_vm8 = vcmask 130048  }
  0x79   :  { %255 = vrot.lane.b32.xlu1 %v2774_v11, %s2630_s0  ;;  %253 = vrot.lane.b32.xlu0 %v2768_v10, %s2630_s0 }
  0x7d   :  { %266 = vrot.lane.b32.xlu1 %v2774_v11, %s2631_s24  ;;  %264 = vrot.lane.b32.xlu0 %v2768_v10, %s2631_s24 }
  0x81   :  { %297 = vrot.lane.b32.xlu1 %v2774_v11, %s2632_s11  ;;  %295 = vrot.lane.b32.xlu0 %v2768_v10, %s2632_s11 }
  0x85   :  { %310 = vrot.lane.b32.xlu1 %v2774_v11, %s2633_s25  ;;  %308 = vrot.lane.b32.xlu0 %v2768_v10, %s2633_s25  ;;  %v2983_v10 = vmul.f32 %v798_v15, %v796_v14  ;;  %v2985_v11 = vmul.f32 %v797_v17, %v795_v16  ;;  %v188_v17 = vld [vmem:[#allocation9 + $0xd8] sm:$0xff] }
  0x89   :  { %332 = vrot.lane.b32.xlu1 %v2799_v18, %s2629_s7  ;;  %330 = vrot.lane.b32.xlu0 %v2801_v19, %s2629_s7 }
  0x8d   :  { %345 = vrot.lane.b32.xlu1 %v2799_v18, %s2630_s0  ;;  %343 = vrot.lane.b32.xlu0 %v2801_v19, %s2630_s0 }
  0x91   :  { %358 = vrot.lane.b32.xlu1 %v2799_v18, %s2631_s24  ;;  %356 = vrot.lane.b32.xlu0 %v2801_v19, %s2631_s24 }
  0x95   :  { %380 = vrot.lane.b32.xlu1 %v2799_v18, %s2628_s23  ;;  %378 = vrot.lane.b32.xlu0 %v2801_v19, %s2628_s23 }
  0x99   :  { %393 = vrot.lane.b32.xlu1 %v2799_v18, %s2632_s11  ;;  %391 = vrot.lane.b32.xlu0 %v2801_v19, %s2632_s11 }
  0x9d   :  { %406 = vrot.lane.b32.xlu1 %v2799_v18, %s2633_s25  ;;  %404 = vrot.lane.b32.xlu0 %v2801_v19, %s2633_s25 }
  0xa1   :  { %428 = vrot.lane.b32.xlu1 %v2834_v26, %s2629_s7  ;;  %426 = vrot.lane.b32.xlu0 %v2836_v27, %s2629_s7 }
  0xa5   :  { %441 = vrot.lane.b32.xlu1 %v2834_v26, %s2630_s0  ;;  %439 = vrot.lane.b32.xlu0 %v2836_v27, %s2630_s0 }
  0xa9   :  { %454 = vrot.lane.b32.xlu1 %v2834_v26, %s2631_s24  ;;  %452 = vrot.lane.b32.xlu0 %v2836_v27, %s2631_s24 }
  0xad   :  { %476 = vrot.lane.b32.xlu1 %v2834_v26, %s2628_s23  ;;  %474 = vrot.lane.b32.xlu0 %v2836_v27, %s2628_s23 }
  0xb1   :  { %489 = vrot.lane.b32.xlu1 %v2834_v26, %s2632_s11  ;;  %487 = vrot.lane.b32.xlu0 %v2836_v27, %s2632_s11 }
  0xb5   :  { %502 = vrot.lane.b32.xlu1 %v2834_v26, %s2633_s25  ;;  %500 = vrot.lane.b32.xlu0 %v2836_v27, %s2633_s25 }
  0xb9   :  { %515 = vrot.lane.b32.xlu1 %v2763_v3, %s2629_s7  ;;  %513 = vrot.lane.b32.xlu0 %v2758_v2, %s2629_s7 }
  0xbd   :  { %528 = vrot.lane.b32.xlu1 %v2763_v3, %s2630_s0  ;;  %526 = vrot.lane.b32.xlu0 %v2758_v2, %s2630_s0 }
  0xc1   :  { %541 = vrot.lane.b32.xlu1 %v2763_v3, %s2631_s24  ;;  %539 = vrot.lane.b32.xlu0 %v2758_v2, %s2631_s24 }
  0xc5   :  { %563 = vrot.lane.b32.xlu1 %v2763_v3, %s2628_s23  ;;  %561 = vrot.lane.b32.xlu0 %v2758_v2, %s2628_s23 }
  0xc9   :  { %576 = vrot.lane.b32.xlu1 %v2763_v3, %s2632_s11  ;;  %574 = vrot.lane.b32.xlu0 %v2758_v2, %s2632_s11 }
  0xcd   :  { %589 = vrot.lane.b32.xlu1 %v2763_v3, %s2633_s25  ;;  %587 = vrot.lane.b32.xlu0 %v2758_v2, %s2633_s25 }
  0xd1   :  { %611 = vrot.lane.b32.xlu1 %v2893_v34, %s2629_s7  ;;  %609 = vrot.lane.b32.xlu0 %v2895_v35, %s2629_s7 }
  0xd5   :  { %624 = vrot.lane.b32.xlu1 %v2893_v34, %s2630_s0  ;;  %622 = vrot.lane.b32.xlu0 %v2895_v35, %s2630_s0 }
  0xd9   :  { %637 = vrot.lane.b32.xlu1 %v2893_v34, %s2631_s24  ;;  %635 = vrot.lane.b32.xlu0 %v2895_v35, %s2631_s24 }
  0xdd   :  { %659 = vrot.lane.b32.xlu1 %v2893_v34, %s2628_s23  ;;  %657 = vrot.lane.b32.xlu0 %v2895_v35, %s2628_s23 }
  0xe1   :  { %672 = vrot.lane.b32.xlu1 %v2893_v34, %s2632_s11  ;;  %670 = vrot.lane.b32.xlu0 %v2895_v35, %s2632_s11 }
  0xe3   :  { %v2920_v42 = vpop.permute.xlu1 %282  ;;  %v2922_v43 = vpop.permute.xlu0 %242 }
  0xe4   :  { %v291_v33 = vmul.f32 %v2110_v30, %v2920_v42  ;;  %v251_v36 = vmul.f32 %v2106_v31, %v2922_v43  ;;  %v2117_v42 = vld [vmem:[#allocation2 + $0xb] ss:$0 sm:$0xff]  ;;  %v175_v43 = vld [vmem:[#allocation9 + $0x70] sm:$0xff] }
  0xe5   :  { %685 = vrot.lane.b32.xlu1 %v2893_v34, %s2633_s25  ;;  %683 = vrot.lane.b32.xlu0 %v2895_v35, %s2633_s25 }
  0xe7   :  { %v2932_v46 = vpop.permute.xlu1 %284  ;;  %v2934_v47 = vpop.permute.xlu0 %244 }
  0xe8   :  { %v292_v40 = vmul.f32 %v2110_v30, %v2932_v46  ;;  %v252_v41 = vmul.f32 %v2106_v31, %v2934_v47  ;;  %v293_v46 = vadd.f32 %v291_v33, %v251_v36 }
  0xe9   :  { %707 = vrot.lane.b32.xlu1 %v2928_v44, %s2629_s7  ;;  %705 = vrot.lane.b32.xlu0 %v2930_v45, %s2629_s7 }
  0xeb   :  { %v2940_v48 = vpop.permute.xlu1 %255  ;;  %v2942_v49 = vpop.permute.xlu0 %253 }
  0xed   :  { %720 = vrot.lane.b32.xlu1 %v2928_v44, %s2630_s0  ;;  %718 = vrot.lane.b32.xlu0 %v2930_v45, %s2630_s0 }
  0xef   :  { %v267_v50 = vpop.permute.xlu1 %266  ;;  %v265_v51 = vpop.permute.xlu0 %264 }
  0xf0   :  { %v274_v0 = vmul.f32 %v2108_v55, %v267_v50  ;;  %v273_v4 = vmul.f32 %v2108_v55, %v265_v51  ;;  %v2114_v50 = vld [vmem:[#allocation2 + $0x8] ss:$0 sm:$0xff]  ;;  %v191_v51 = vld [vmem:[#allocation9 + $0xf0] sm:$0xff] }
  0xf1   :  { %733 = vrot.lane.b32.xlu1 %v2928_v44, %s2631_s24  ;;  %731 = vrot.lane.b32.xlu0 %v2930_v45, %s2631_s24  ;;  %v2111_v55 = vld [vmem:[#allocation2 + $0x5] ss:$0 sm:$0xff] }
  0xf2   :  { %2195 = vmatprep.subr.mxu0 %v191_v51  ;;  %2230 = vmatprep.subr.mxu1 %v191_v51  ;;  %v186_v51 = vld [vmem:[#allocation9 + $0xc8] sm:$0xff] }
  0xf3   :  { %v2952_v52 = vpop.permute.xlu1 %297  ;;  %v2954_v53 = vpop.permute.xlu0 %295  ;;  %2196 = vmatpush3.msra.mxu0 %v175_v43  ;;  %2231 = vmatpush3.msra.mxu1 %v175_v43  ;;  %v170_v43 = vld [vmem:[#allocation9 + $0x48] sm:$0xff] }
  0xf5   :  { %755 = vrot.lane.b32.xlu1 %v2928_v44, %s2628_s23  ;;  %753 = vrot.lane.b32.xlu0 %v2930_v45, %s2628_s23 }
  0xf7   :  { %v311_v60 = vpop.permute.xlu1 %310  ;;  %v309_v61 = vpop.permute.xlu0 %308 }
  0xf8   :  { %v318_v5 = vmul.f32 %v2112_v56, %v311_v60  ;;  %v317_v6 = vmul.f32 %v2112_v56, %v309_v61  ;;  %v190_v56 = vld [vmem:[#allocation9 + $0xe8] sm:$0xff]  ;;  %v294_v61 = vadd.f32 %v292_v40, %v252_v41 }
  0xf9   :  { %768 = vrot.lane.b32.xlu1 %v2928_v44, %s2632_s11  ;;  %766 = vrot.lane.b32.xlu0 %v2930_v45, %s2632_s11  ;;  %v174_v60 = vld [vmem:[#allocation9 + $0x68] sm:$0xff] }
  0xfa   :  { %v320_v12 = vadd.f32 %v318_v5, %v274_v0  ;;  %v319_v13 = vadd.f32 %v317_v6, %v273_v4  ;;  %2197 = vmatprep.subr.mxu0 %v190_v56  ;;  %v189_v4 = vld [vmem:[#allocation9 + $0xe0] sm:$0xff]  ;;  %2232 = vmatprep.subr.mxu1 %v190_v56  ;;  %v263_v5 = vmul.f32 %v2107_v54, %v2940_v48 }
  0xfb   :  { %v333_v18 = vpop.permute.xlu1 %332  ;;  %v331_v19 = vpop.permute.xlu0 %330  ;;  %v262_v6 = vmul.f32 %v2107_v54, %v2942_v49  ;;  %2198 = vmatpush3.msra.mxu0 %v174_v60  ;;  %2233 = vmatpush3.msra.mxu1 %v174_v60  ;;  %v185_v56 = vld [vmem:[#allocation9 + $0xc0] sm:$0xff]  ;;  %v2121_v60 = vld [vmem:[#allocation2 + $0xf] ss:$0 sm:$0xff] }
  0xfc   :  { %v340_v20 = vmul.f32 %v2113_v7, %v333_v18  ;;  %v339_v21 = vmul.f32 %v2113_v7, %v331_v19  ;;  %v2975_v22 = vadd.f32 %v375_v62, %v320_v12  ;;  %v2977_v23 = vadd.f32 %v374_v63, %v319_v13  ;;  %v2115_v62 = vld [vmem:[#allocation2 + $0x9] ss:$0 sm:$0xff]  ;;  %2199 = vmatprep.subr.mxu0 %v189_v4 }
  0xfd   :  { %781 = vrot.lane.b32.xlu1 %v2928_v44, %s2633_s25  ;;  %779 = vrot.lane.b32.xlu0 %v2930_v45, %s2633_s25  ;;  %v305_v7 = vmul.f32 %v2111_v55, %v2952_v52  ;;  %v304_v12 = vmul.f32 %v2111_v55, %v2954_v53  ;;  %v172_v53 = vld [vmem:[#allocation9 + $0x58] sm:$0xff] }
  0xfe   :  { %v342_v24 = vadd.f32 %v340_v20, %v281_v8  ;;  %v341_v25 = vadd.f32 %v339_v21, %v280_v9  ;;  %v2118_v8 = vld [vmem:[#allocation2 + $0xc] ss:$0 sm:$0xff]  ;;  %v173_v9 = vld [vmem:[#allocation9 + $0x60] sm:$0xff]  ;;  %2234 = vmatprep.subr.mxu1 %v189_v4 }
  0xff   :  { %v346_v28 = vpop.permute.xlu1 %345  ;;  %v344_v29 = vpop.permute.xlu0 %343  ;;  %v2123_v21 = vld [vmem:[#allocation2 + $0x11] ss:$0 sm:$0xff]  ;;  %2200 = vmatpush3.msra.mxu0 %v173_v9  ;;  %2235 = vmatpush3.msra.mxu1 %v173_v9  ;;  %v167_v9 = vld [vmem:[#allocation9 + $0x30] sm:$0xff] }
 0x100   :  { %v353_v57 = vmul.f32 %v2114_v50, %v346_v28  ;;  %v352_v47 = vmul.f32 %v2114_v50, %v344_v29  ;;  %v187_v28 = vld [vmem:[#allocation9 + $0xd0] sm:$0xff]  ;;  %v306_v29 = vadd.f32 %v304_v12, %v262_v6  ;;  %2201 = vmatprep.subr.mxu0 %v188_v17  ;;  %2236 = vmatprep.subr.mxu1 %v188_v17  ;;  %v2122_v12 = vld [vmem:[#allocation2 + $0x10] ss:$0 sm:$0xff] }
 0x101   :  { %803 = vrot.lane.b32.xlu1 %v2983_v10, %s2629_s7  ;;  %801 = vrot.lane.b32.xlu0 %v2985_v11, %s2629_s7  ;;  %v183_v6 = vld [vmem:[#allocation9 + $0xb0] sm:$0xff] }
 0x102   :  { %v355_v48 = vadd.f32 %v353_v57, %v294_v61  ;;  %v354_v49 = vadd.f32 %v352_v47, %v293_v46  ;;  %2202 = vmatpush3.msra.mxu0 %v172_v53  ;;  %2237 = vmatpush3.msra.mxu1 %v172_v53  ;;  %v184_v61 = vld [vmem:[#allocation9 + $0xb8] sm:$0xff] }
 0x103   :  { %v359_v37 = vpop.permute.xlu1 %358  ;;  %v357_v38 = vpop.permute.xlu0 %356  ;;  %2203 = vmatprep.subr.mxu0 %v187_v28  ;;  %2238 = vmatprep.subr.mxu1 %v187_v28  ;;  %v164_v53 = vld [vmem:[#allocation9 + $0x18] sm:$0xff]  ;;  %v179_v28 = vld [vmem:[#allocation9 + $0x90] sm:$0xff] }
 0x104   :  { %v366_v15 = vmul.f32 %v2115_v62, %v359_v37  ;;  %v365_v18 = vmul.f32 %v2115_v62, %v357_v38  ;;  %v471_v37 = vmul.f32 %v2123_v21, %v2834_v26  ;;  %v470_v38 = vmul.f32 %v2123_v21, %v2836_v27  ;;  %2204 = vmatpush3.msra.mxu0 %v171_v39  ;;  %v180_v21 = vld [vmem:[#allocation9 + $0x98] sm:$0xff] }
 0x105   :  { %816 = vrot.lane.b32.xlu1 %v2983_v10, %s2630_s0  ;;  %814 = vrot.lane.b32.xlu0 %v2985_v11, %s2630_s0 }
 0x106   :  { %v367_v40 = vadd.f32 %v365_v18, %v306_v29  ;;  %2239 = vmatpush3.msra.mxu1 %v171_v39  ;;  %2205 = vmatprep.subr.mxu0 %v186_v51 }
 0x107   :  { %v381_v58 = vpop.permute.xlu1 %380  ;;  %v379_v59 = vpop.permute.xlu0 %378  ;;  %2240 = vmatprep.subr.mxu1 %v186_v51  ;;  %2206 = vmatpush3.msra.mxu0 %v170_v43 }
 0x108   :  { %v388_v63 = vmul.f32 %v2117_v42, %v381_v58  ;;  %v387_v0 = vmul.f32 %v2117_v42, %v379_v59  ;;  %v2120_v42 = vld [vmem:[#allocation2 + $0xe] ss:$0 sm:$0xff]  ;;  %v169_v59 = vld [vmem:[#allocation9 + $0x40] sm:$0xff]  ;;  %2207 = vmatprep.subr.mxu0 %v185_v56  ;;  %2241 = vmatpush3.msra.mxu1 %v170_v43 }
 0x109   :  { %829 = vrot.lane.b32.xlu1 %v2983_v10, %s2631_s24  ;;  %827 = vrot.lane.b32.xlu0 %v2985_v11, %s2631_s24  ;;  %v2126_v43 = vld [vmem:[#allocation2 + $0x14] ss:$0 sm:$0xff] }
 0x10a   :  { %v3007_v13 = vadd.f32 %v388_v63, %v342_v24  ;;  %v3009_v14 = vadd.f32 %v387_v0, %v341_v25  ;;  %v307_v24 = vadd.f32 %v305_v7, %v263_v5  ;;  %v2119_v25 = vld [vmem:[#allocation2 + $0xd] ss:$0 sm:$0xff]  ;;  %2208 = vmatpush3.msra.mxu0 %v169_v59  ;;  %2242 = vmatprep.subr.mxu1 %v185_v56 }
 0x10b   :  { %v394_v52 = vpop.permute.xlu1 %393  ;;  %v392_v16 = vpop.permute.xlu0 %391  ;;  %v168_v0 = vld [vmem:[#allocation9 + $0x38] sm:$0xff]  ;;  %2209 = vmatprep.subr.mxu0 %v184_v61  ;;  %2243 = vmatpush3.msra.mxu1 %v169_v59 }
 0x10c   :  { %v401_v19 = vmul.f32 %v2118_v8, %v394_v52  ;;  %v400_v20 = vmul.f32 %v2118_v8, %v392_v16  ;;  %v368_v32 = vadd.f32 %v366_v15, %v307_v24  ;;  %2210 = vmatpush3.msra.mxu0 %v168_v0  ;;  %2244 = vmatprep.subr.mxu1 %v184_v61  ;;  %v181_v16 = vld [vmem:[#allocation9 + $0xa0] sm:$0xff] }
 0x10d   :  { %851 = vrot.lane.b32.xlu1 %v2983_v10, %s2628_s23  ;;  %849 = vrot.lane.b32.xlu0 %v2985_v11, %s2628_s23 }
 0x10e   :  { %v3015_v30 = vadd.f32 %v401_v19, %v355_v48  ;;  %v3017_v31 = vadd.f32 %v400_v20, %v354_v49  ;;  %v182_v48 = vld [vmem:[#allocation9 + $0xa8] sm:$0xff]  ;;  %2211 = vmatprep.subr.mxu0 %v183_v6  ;;  %2245 = vmatpush3.msra.mxu1 %v168_v0  ;;  %v165_v19 = vld [vmem:[#allocation9 + $0x20] sm:$0xff] }
 0x10f   :  { %v407_v33 = vpop.permute.xlu1 %406  ;;  %v405_v36 = vpop.permute.xlu0 %404  ;;  %v166_v49 = vld [vmem:[#allocation9 + $0x28] sm:$0xff]  ;;  %2212 = vmatpush3.msra.mxu0 %v167_v9  ;;  %2246 = vmatprep.subr.mxu1 %v183_v6  ;;  %v2124_v20 = vld [vmem:[#allocation2 + $0x12] ss:$0 sm:$0xff] }
 0x110   :  { %v414_v41 = vmul.f32 %v2119_v25, %v407_v33  ;;  %v413_v50 = vmul.f32 %v2119_v25, %v405_v36  ;;  %2213 = vmatprep.subr.mxu0 %v182_v48  ;;  %2247 = vmatpush3.msra.mxu1 %v167_v9  ;;  %v163_v33 = vld [vmem:[#allocation9 + $0x10] sm:$0xff]  ;;  %v2125_v36 = vld [vmem:[#allocation2 + $0x13] ss:$0 sm:$0xff] }
 0x111   :  { %864 = vrot.lane.b32.xlu1 %v2983_v10, %s2632_s11  ;;  %862 = vrot.lane.b32.xlu0 %v2985_v11, %s2632_s11 }
 0x112   :  { %v416_v26 = vadd.f32 %v414_v41, %v368_v32  ;;  %v415_v54 = vadd.f32 %v413_v50, %v367_v40  ;;  %2214 = vmatpush3.msra.mxu0 %v166_v49  ;;  %2248 = vmatprep.subr.mxu1 %v182_v48  ;;  %v177_v41 = vld [vmem:[#allocation9 + $0x80] sm:$0xff] }
 0x113   :  { %v429_v27 = vpop.permute.xlu1 %428  ;;  %v427_v55 = vpop.permute.xlu0 %426  ;;  %2215 = vmatprep.subr.mxu0 %v181_v16  ;;  %2249 = vmatpush3.msra.mxu1 %v166_v49  ;;  %v2129_v48 = vld [vmem:[#allocation2 + $0x17] ss:$0 sm:$0xff] }
 0x114   :  { %v436_v46 = vmul.f32 %v2120_v42, %v429_v27  ;;  %v435_v57 = vmul.f32 %v2120_v42, %v427_v55  ;;  %v3025_v47 = vadd.f32 %v471_v37, %v416_v26  ;;  %v3027_v58 = vadd.f32 %v470_v38, %v415_v54  ;;  %2216 = vmatpush3.msra.mxu0 %v165_v19  ;;  %v178_v37 = vld [vmem:[#allocation9 + $0x88] sm:$0xff]  ;;  %v161_v42 = vld [vmem:[#allocation9] sm:$0xff] }
 0x115   :  { %877 = vrot.lane.b32.xlu1 %v2983_v10, %s2633_s25  ;;  %875 = vrot.lane.b32.xlu0 %v2985_v11, %s2633_s25 }
 0x116   :  { %v438_v62 = vadd.f32 %v436_v46, %v2975_v22  ;;  %v437_v63 = vadd.f32 %v435_v57, %v2977_v23  ;;  %2250 = vmatprep.subr.mxu1 %v181_v16  ;;  %2217 = vmatprep.subr.mxu0 %v180_v21  ;;  %v2127_v57 = vld [vmem:[#allocation2 + $0x15] ss:$0 sm:$0xff] }
 0x117   :  { %v442_v4 = vpop.permute.xlu1 %441  ;;  %v440_v5 = vpop.permute.xlu0 %439  ;;  %2251 = vmatpush3.msra.mxu1 %v165_v19  ;;  %2218 = vmatpush3.msra.mxu0 %v164_v53 }
 0x118   :  { %v449_v7 = vmul.f32 %v2121_v60, %v442_v4  ;;  %v448_v8 = vmul.f32 %v2121_v60, %v440_v5  ;;  %2252 = vmatprep.subr.mxu1 %v180_v21  ;;  %2219 = vmatprep.subr.mxu0 %v179_v28  ;;  %v2128_v4 = vld [vmem:[#allocation2 + $0x16] ss:$0 sm:$0xff] }
 0x119   :  { %2253 = vmatpush3.msra.mxu1 %v164_v53  ;;  %2220 = vmatpush3.msra.mxu0 %v163_v33 }
 0x11a   :  { %v451_v22 = vadd.f32 %v449_v7, %v3007_v13  ;;  %v450_v23 = vadd.f32 %v448_v8, %v3009_v14  ;;  %2254 = vmatprep.subr.mxu1 %v179_v28  ;;  %2221 = vmatprep.subr.mxu0 %v178_v37 }
 0x11b   :  { %v455_v15 = vpop.permute.xlu1 %454  ;;  %v453_v52 = vpop.permute.xlu0 %452  ;;  %2255 = vmatpush3.msra.mxu1 %v163_v33  ;;  %v2137_v33 = vld [vmem:[#allocation2 + $0x1f] ss:$0 sm:$0xff] }
 0x11c   :  { %v462_v17 = vmul.f32 %v2122_v12, %v455_v15  ;;  %v461_v18 = vmul.f32 %v2122_v12, %v453_v52  ;;  %2256 = vmatprep.subr.mxu1 %v178_v37 }
 0x11e   :  { %v464_v13 = vadd.f32 %v462_v17, %v3015_v30  ;;  %v463_v14 = vadd.f32 %v461_v18, %v3017_v31  ;;  %v162_v31 = vld [vmem:[#allocation9 + $0x8] sm:$0xff] }
 0x11f   :  { %v477_v24 = vpop.permute.xlu1 %476  ;;  %v475_v25 = vpop.permute.xlu0 %474  ;;  %2222 = vmatpush3.msra.mxu0 %v162_v31  ;;  %2257 = vmatpush3.msra.mxu1 %v162_v31  ;;  %v2131_v17 = vld [vmem:[#allocation2 + $0x19] ss:$0 sm:$0xff] }
 0x120   :  { %v484_v29 = vmul.f32 %v2124_v20, %v477_v24  ;;  %v483_v32 = vmul.f32 %v2124_v20, %v475_v25  ;;  %2223 = vmatprep.subr.mxu0 %v177_v41  ;;  %2258 = vmatprep.subr.mxu1 %v177_v41  ;;  %v653_v41 = vmul.f32 %v2137_v33, %v2895_v35 }
 0x121   :  { %2224 = vmatpush3.msra.mxu0 %v161_v42  ;;  %2259 = vmatpush3.msra.mxu1 %v161_v42 }
 0x122   :  { %v486_v30 = vadd.f32 %v484_v29, %v438_v62  ;;  %v485_v38 = vadd.f32 %v483_v32, %v437_v63  ;;  %v2133_v32 = vld [vmem:[#allocation2 + $0x1b] ss:$0 sm:$0xff] }
 0x123   :  { %v490_v39 = vpop.permute.xlu1 %489  ;;  %v488_v40 = vpop.permute.xlu0 %487 }
 0x124   :  { %v497_v50 = vmul.f32 %v2125_v36, %v490_v39  ;;  %v496_v51 = vmul.f32 %v2125_v36, %v488_v40  ;;  %v654_v40 = vmul.f32 %v2137_v33, %v2893_v34  ;;  %v2136_v34 = vld [vmem:[#allocation2 + $0x1e] ss:$0 sm:$0xff] }
 0x126   :  { %v499_v26 = vadd.f32 %v497_v50, %v451_v22  ;;  %v498_v54 = vadd.f32 %v496_v51, %v450_v23 }
 0x127   :  { %v503_v27 = vpop.permute.xlu1 %502  ;;  %v501_v55 = vpop.permute.xlu0 %500 }
 0x128   :  { %v510_v56 = vmul.f32 %v2126_v43, %v503_v27  ;;  %v509_v46 = vmul.f32 %v2126_v43, %v501_v55 }
 0x12a   :  { %v3039_v59 = vadd.f32 %v510_v56, %v464_v13  ;;  %v3041_v60 = vadd.f32 %v509_v46, %v463_v14  ;;  %v2132_v14 = vld [vmem:[#allocation2 + $0x1a] ss:$0 sm:$0xff] }
 0x12b   :  { %v516_v61 = vpop.permute.xlu1 %515  ;;  %v514_v62 = vpop.permute.xlu0 %513 }
 0x12c   :  { %v523_v63 = vmul.f32 %v2127_v57, %v516_v61  ;;  %v522_v0 = vmul.f32 %v2127_v57, %v514_v62 }
 0x12e   :  { %v525_v5 = vadd.f32 %v523_v63, %v3025_v47  ;;  %v524_v6 = vadd.f32 %v522_v0, %v3027_v58 }
 0x12f   :  { %v529_v7 = vpop.permute.xlu1 %528  ;;  %v527_v8 = vpop.permute.xlu0 %526 }
 0x130   :  { %v536_v9 = vmul.f32 %v2128_v4, %v529_v7  ;;  %v535_v12 = vmul.f32 %v2128_v4, %v527_v8  ;;  %v2144_v4 = vld [vmem:[#allocation2 + $0x26] ss:$0 sm:$0xff] }
 0x131   :  { %v750_v8 = vmul.f32 %v2144_v4, %v2928_v44  ;;  %v2139_v44 = vld [vmem:[#allocation2 + $0x21] ss:$0 sm:$0xff] }
 0x132   :  { %v538_v22 = vadd.f32 %v536_v9, %v486_v30  ;;  %v537_v23 = vadd.f32 %v535_v12, %v485_v38  ;;  %v749_v9 = vmul.f32 %v2144_v4, %v2930_v45  ;;  %v2130_v4 = vld [vmem:[#allocation2 + $0x18] ss:$0 sm:$0xff] }
 0x133   :  { %v542_v49 = vpop.permute.xlu1 %541  ;;  %v540_v15 = vpop.permute.xlu0 %539 }
 0x134   :  { %v549_v52 = vmul.f32 %v2129_v48, %v542_v49  ;;  %v548_v16 = vmul.f32 %v2129_v48, %v540_v15 }
 0x136   :  { %v551_v18 = vadd.f32 %v549_v52, %v499_v26  ;;  %v550_v19 = vadd.f32 %v548_v16, %v498_v54 }
 0x137   :  { %v564_v20 = vpop.permute.xlu1 %563  ;;  %v562_v21 = vpop.permute.xlu0 %561 }
 0x138   :  { %v571_v13 = vmul.f32 %v2131_v17, %v564_v20  ;;  %v570_v47 = vmul.f32 %v2131_v17, %v562_v21 }
 0x13a   :  { %v3045_v58 = vadd.f32 %v571_v13, %v525_v5  ;;  %v3047_v53 = vadd.f32 %v570_v47, %v524_v6  ;;  %v2140_v5 = vld [vmem:[#allocation2 + $0x22] ss:$0 sm:$0xff]  ;;  %v2135_v47 = vld [vmem:[#allocation2 + $0x1d] ss:$0 sm:$0xff] }
 0x13b   :  { %v577_v24 = vpop.permute.xlu1 %576  ;;  %v575_v25 = vpop.permute.xlu0 %574 }
 0x13c   :  { %v584_v28 = vmul.f32 %v2132_v14, %v577_v24  ;;  %v583_v29 = vmul.f32 %v2132_v14, %v575_v25 }
 0x13e   :  { %v586_v36 = vadd.f32 %v584_v28, %v538_v22  ;;  %v585_v37 = vadd.f32 %v583_v29, %v537_v23  ;;  %v2143_v28 = vld [vmem:[#allocation2 + $0x25] ss:$0 sm:$0xff] }
 0x13f   :  { %v590_v30 = vpop.permute.xlu1 %589  ;;  %v588_v38 = vpop.permute.xlu0 %587 }
 0x140   :  { %v597_v31 = vmul.f32 %v2133_v32, %v590_v30  ;;  %v596_v39 = vmul.f32 %v2133_v32, %v588_v38 }
 0x142   :  { %v599_v50 = vadd.f32 %v597_v31, %v551_v18  ;;  %v598_v51 = vadd.f32 %v596_v39, %v550_v19  ;;  %v2151_v39 = vld [vmem:[#allocation2 + $0x2d] ss:$0 sm:$0xff] }
 0x143   :  { %v3051_v42 = vpop.permute.xlu1 %611  ;;  %v3053_v43 = vpop.permute.xlu0 %609 }
 0x144   :  { %v3055_v26 = vadd.f32 %v654_v40, %v599_v50  ;;  %v3057_v54 = vadd.f32 %v653_v41, %v598_v51  ;;  %v2147_v40 = vld [vmem:[#allocation2 + $0x29] ss:$0 sm:$0xff]  ;;  %v846_v51 = vmul.f32 %v2151_v39, %v2983_v10  ;;  %v558_v10 = vmul.f32 %v2130_v4, %v2763_v3  ;;  %v2145_v3 = vld [vmem:[#allocation2 + $0x27] ss:$0 sm:$0xff] }
 0x147   :  { %v625_v27 = vpop.permute.xlu1 %624  ;;  %v623_v55 = vpop.permute.xlu0 %622 }
 0x148   :  { %v632_v24 = vmul.f32 %v2135_v47, %v625_v27  ;;  %v631_v25 = vmul.f32 %v2135_v47, %v623_v55  ;;  %v845_v55 = vmul.f32 %v2151_v39, %v2985_v11 }
 0x14a   :  { %v633_v30 = vadd.f32 %v631_v25, %v3047_v53 }
 0x14b   :  { %v638_v56 = vpop.permute.xlu1 %637  ;;  %v636_v46 = vpop.permute.xlu0 %635 }
 0x14c   :  { %v645_v63 = vmul.f32 %v2136_v34, %v638_v56  ;;  %v644_v0 = vmul.f32 %v2136_v34, %v636_v46 }
 0x14e   :  { %v647_v12 = vadd.f32 %v645_v63, %v586_v36  ;;  %v646_v48 = vadd.f32 %v644_v0, %v585_v37  ;;  %v634_v37 = vadd.f32 %v632_v24, %v3045_v58 }
 0x14f   :  { %v3059_v57 = vpop.permute.xlu1 %659  ;;  %v3061_v61 = vpop.permute.xlu0 %657 }
 0x153   :  { %v673_v35 = vpop.permute.xlu1 %672  ;;  %v671_v62 = vpop.permute.xlu0 %670 }
 0x154   :  { %v680_v29 = vmul.f32 %v2139_v44, %v673_v35  ;;  %v679_v32 = vmul.f32 %v2139_v44, %v671_v62 }
 0x156   :  { %v682_v41 = vadd.f32 %v680_v29, %v634_v37  ;;  %v681_v50 = vadd.f32 %v679_v32, %v633_v30  ;;  %v2149_v37 = vld [vmem:[#allocation2 + $0x2b] ss:$0 sm:$0xff] }
 0x157   :  { %v686_v6 = vpop.permute.xlu1 %685  ;;  %v684_v7 = vpop.permute.xlu0 %683 }
 0x158   :  { %v693_v22 = vmul.f32 %v2140_v5, %v686_v6  ;;  %v692_v23 = vmul.f32 %v2140_v5, %v684_v7  ;;  %v2134_v7 = vld [vmem:[#allocation2 + $0x1c] ss:$0 sm:$0xff] }
 0x15a   :  { %v695_v49 = vadd.f32 %v693_v22, %v647_v12  ;;  %v694_v15 = vadd.f32 %v692_v23, %v646_v48  ;;  %v2138_v12 = vld [vmem:[#allocation2 + $0x20] ss:$0 sm:$0xff]  ;;  %v619_v48 = vmul.f32 %v2134_v7, %v3051_v42  ;;  %v618_v22 = vmul.f32 %v2134_v7, %v3053_v43  ;;  %v2141_v23 = vld [vmem:[#allocation2 + $0x23] ss:$0 sm:$0xff] }
 0x15b   :  { %v708_v52 = vpop.permute.xlu1 %707  ;;  %v706_v16 = vpop.permute.xlu0 %705  ;;  %v666_v47 = vmul.f32 %v2138_v12, %v3061_v61 }
 0x15c   :  { %v3065_v17 = vadd.f32 %v750_v8, %v695_v49  ;;  %v3067_v18 = vadd.f32 %v749_v9, %v694_v15  ;;  %v557_v8 = vmul.f32 %v2130_v4, %v2758_v2  ;;  %v2142_v49 = vld [vmem:[#allocation2 + $0x24] ss:$0 sm:$0xff]  ;;  %v560_v15 = vadd.f32 %v558_v10, %v3039_v59  ;;  %v2146_v59 = vld [vmem:[#allocation2 + $0x28] ss:$0 sm:$0xff] }
 0x15d   :  { %v715_v24 = vmul.f32 %v2141_v23, %v708_v52  ;;  %v714_v25 = vmul.f32 %v2141_v23, %v706_v16 }
 0x15e   :  { %v621_v29 = vadd.f32 %v619_v48, %v560_v15 }
 0x15f   :  { %v721_v19 = vpop.permute.xlu1 %720  ;;  %v719_v20 = vpop.permute.xlu0 %718  ;;  %v716_v52 = vadd.f32 %v714_v25, %v3057_v54 }
 0x160   :  { %v728_v32 = vmul.f32 %v2142_v49, %v721_v19  ;;  %v727_v43 = vmul.f32 %v2142_v49, %v719_v20 }
 0x163   :  { %v734_v21 = vpop.permute.xlu1 %733  ;;  %v732_v13 = vpop.permute.xlu0 %731 }
 0x164   :  { %v741_v38 = vmul.f32 %v2143_v28, %v734_v21  ;;  %v740_v31 = vmul.f32 %v2143_v28, %v732_v13  ;;  %v559_v21 = vadd.f32 %v557_v8, %v3041_v60  ;;  %v667_v13 = vmul.f32 %v2138_v12, %v3059_v57  ;;  %v2148_v28 = vld [vmem:[#allocation2 + $0x2a] ss:$0 sm:$0xff] }
 0x166   :  { %v743_v46 = vadd.f32 %v741_v38, %v682_v41  ;;  %v742_v34 = vadd.f32 %v740_v31, %v681_v50  ;;  %v620_v42 = vadd.f32 %v618_v22, %v559_v21  ;;  %v669_v31 = vadd.f32 %v667_v13, %v621_v29 }
 0x167   :  { %v756_v14 = vpop.permute.xlu1 %755  ;;  %v754_v45 = vpop.permute.xlu0 %753  ;;  %v717_v50 = vadd.f32 %v715_v24, %v3055_v26  ;;  %v2155_v24 = vld [vmem:[#allocation15] ss:$0 sm:$0xff] }
 0x168   :  { %v763_v30 = vmul.f32 %v2145_v3, %v756_v14  ;;  %v762_v38 = vmul.f32 %v2145_v3, %v754_v45  ;;  %v668_v60 = vadd.f32 %v666_v47, %v620_v42  ;;  %v730_v19 = vadd.f32 %v728_v32, %v669_v31 }
 0x16a   :  { %v729_v20 = vadd.f32 %v727_v43, %v668_v60 }
 0x16b   :  { %v3069_v33 = vpop.permute.xlu1 %768  ;;  %v3071_v36 = vpop.permute.xlu0 %766 }
 0x16c   :  { %v776_v14 = vmul.f32 %v2146_v59, %v3069_v33  ;;  %v775_v45 = vmul.f32 %v2146_v59, %v3071_v36  ;;  %v2154_v36 = vld [vmem:[#allocation2 + $0x30] ss:$0 sm:$0xff] }
 0x16e   :  { %v778_v33 = vadd.f32 %v776_v14, %v730_v19  ;;  %v777_v8 = vadd.f32 %v775_v45, %v729_v20 }
 0x16f   :  { %v782_v27 = vpop.permute.xlu1 %781  ;;  %v780_v56 = vpop.permute.xlu0 %779 }
 0x170   :  { %v789_v35 = vmul.f32 %v2147_v40, %v782_v27  ;;  %v788_v62 = vmul.f32 %v2147_v40, %v780_v56  ;;  %v2152_v40 = vld [vmem:[#allocation2 + $0x2e] ss:$0 sm:$0xff]  ;;  %v2150_v27 = vld [vmem:[#allocation2 + $0x2c] ss:$0 sm:$0xff]  ;;  %v765_v56 = vadd.f32 %v763_v30, %v717_v50 }
 0x172   :  { %v791_v63 = vadd.f32 %v789_v35, %v743_v46  ;;  %v790_v58 = vadd.f32 %v788_v62, %v742_v34  ;;  %v764_v46 = vadd.f32 %v762_v38, %v716_v52  ;;  %v194_v52 = vld [vmem:[#allocation10 + $0x8] sm:$0xff] }
 0x173   :  { %v804_v0 = vpop.permute.xlu1 %803  ;;  %v802_v53 = vpop.permute.xlu0 %801  ;;  %1023 = vmatprep.subr.mxu0 %v194_v52 }
 0x174   :  { %v3077_v5 = vadd.f32 %v846_v51, %v791_v63  ;;  %v3079_v6 = vadd.f32 %v845_v55, %v790_v58  ;;  %v811_v39 = vmul.f32 %v2148_v28, %v804_v0  ;;  %v810_v57 = vmul.f32 %v2148_v28, %v802_v53  ;;  %v2153_v55 = vld [vmem:[#allocation2 + $0x2f] ss:$0 sm:$0xff] }
 0x176   :  { %v813_v62 = vadd.f32 %v811_v39, %v3065_v17  ;;  %v812_v26 = vadd.f32 %v810_v57, %v3067_v18 }
 0x177   :  { %v817_v11 = vpop.permute.xlu1 %816  ;;  %v815_v9 = vpop.permute.xlu0 %814 }
 0x178   :  { %v824_v16 = vmul.f32 %v2149_v37, %v817_v11  ;;  %v823_v51 = vmul.f32 %v2149_v37, %v815_v9 }
 0x17a   :  { %v826_v53 = vadd.f32 %v824_v16, %v765_v56  ;;  %v825_v4 = vadd.f32 %v823_v51, %v764_v46  ;;  %v193_v16 = vld [vmem:[#allocation10] sm:$0xff]  ;;  %v2634_v51 = vmov 0.0  }
 0x17b   :  { %v830_v44 = vpop.permute.xlu1 %829  ;;  %v828_v2 = vpop.permute.xlu0 %827 }
 0x17c   :  { %v837_v63 = vmul.f32 %v2150_v27, %v830_v44  ;;  %v836_v54 = vmul.f32 %v2150_v27, %v828_v2 }
 0x17e   :  { %v839_v22 = vadd.f32 %v837_v63, %v778_v33  ;;  %v838_v23 = vadd.f32 %v836_v54, %v777_v8  ;;  %v902_v54 = vld [vmem:[#allocation15 + $0x2] sm:$0x1] }
 0x17f   :  { %v852_v61 = vpop.permute.xlu1 %851  ;;  %v850_v41 = vpop.permute.xlu0 %849 }
 0x180   :  { %v859_v34 = vmul.f32 %v2152_v40, %v852_v61  ;;  %v858_v35 = vmul.f32 %v2152_v40, %v850_v41 }
 0x182   :  { %v861_v11 = vadd.f32 %v859_v34, %v813_v62  ;;  %v860_v9 = vadd.f32 %v858_v35, %v812_v26  ;;  %v901_v35 = vld [vmem:[#allocation15 + $0x1] sm:$0x1]  ;;  %v3102_v62 = vsub.s32 0, %v2753_v1 }
 0x183   :  { %v865_v58 = vpop.permute.xlu1 %864  ;;  %v863_v0 = vpop.permute.xlu0 %862 }
 0x184   :  { %v872_v7 = vmul.f32 %v2153_v55, %v865_v58  ;;  %v871_v10 = vmul.f32 %v2153_v55, %v863_v0 }
 0x186   :  { %v874_v12 = vadd.f32 %v872_v7, %v826_v53  ;;  %v873_v48 = vadd.f32 %v871_v10, %v825_v4 }
 0x187   :  { %v878_v17 = vpop.permute.xlu1 %877  ;;  %v876_v49 = vpop.permute.xlu0 %875 }
 0x188   :  { %v891_v18 = vadd.f32 %v874_v12, %v861_v11  ;;  %v890_v15 = vadd.f32 %v873_v48, %v860_v9  ;;  %v885_v21 = vmul.f32 %v2154_v36, %v878_v17  ;;  %v884_v13 = vmul.f32 %v2154_v36, %v876_v49  ;;  %v2424_v49 = vld [vmem:[#allocation7 + $0x28] sm:$0xff] }
 0x18a   :  { %v887_v47 = vadd.f32 %v885_v21, %v839_v22  ;;  %v886_v3 = vadd.f32 %v884_v13, %v838_v23  ;;  %v2423_v23 = vld [vmem:[#allocation7 + $0x20] sm:$0xff] }
 0x18c   :  { %v889_v44 = vadd.f32 %v887_v47, %v3077_v5  ;;  %v888_v2 = vadd.f32 %v886_v3, %v3079_v6  ;;  %v2425_v3 = vld [vmem:[#allocation7 + $0x40] sm:$0xff] }
 0x18e   :  { %v893_v25 = vadd.f32 %v891_v18, %v889_v44  ;;  %v892_v28 = vadd.f32 %v890_v15, %v888_v2  ;;  %v2426_v2 = vld [vmem:[#allocation7 + $0x48] sm:$0xff] }
 0x190   :  { %v900_v29 = vadd.f32 %v2155_v24, %v893_v25  ;;  %v899_v42 = vadd.f32 %v2155_v24, %v892_v28 }
 0x192   :  { %v910_v32 = vmul.f32 %v899_v42, %v899_v42  ;;  %v911_v43 = vmul.f32 %v900_v29, %v900_v29  ;;  %v903_v37 = vadd.f32 %v900_v29, %v899_v42 }
 0x194   :  { %v912_v30 = vadd.f32 %v911_v43, %v910_v32  ;;  %v904_v38 = vrot.slane %v903_v37, 4 }
 0x196   :  { %v913_v59 = vrot.slane %v912_v30, 4  ;;  %v905_v31 = vadd.f32 %v904_v38, %v903_v37  ;;  %v2161_v38 = vld [vmem:[#allocation4 + $0x4] ss:$0 sm:$0xff] }
 0x198   :  { %v914_v60 = vadd.f32 %v913_v59, %v912_v30  ;;  %v906_v39 = vrot.slane %v905_v31, 2  ;;  %v2157_v30 = vld [vmem:[#allocation4] ss:$0 sm:$0xff]  ;;  %v2163_v59 = vld [vmem:[#allocation4 + $0x6] ss:$0 sm:$0xff] }
 0x19a   :  { %v915_v57 = vrot.slane %v914_v60, 2  ;;  %v907_v40 = vadd.f32 %v906_v39, %v905_v31  ;;  %v2160_v31 = vld [vmem:[#allocation4 + $0x3] ss:$0 sm:$0xff]  ;;  %v2162_v39 = vld [vmem:[#allocation4 + $0x5] ss:$0 sm:$0xff] }
 0x19c   :  { %v916_v61 = vadd.f32 %v915_v57, %v914_v60  ;;  %v908_v5 = vrot.slane %v907_v40, 1  ;;  %v2164_v60 = vld [vmem:[#allocation4 + $0x7] ss:$0 sm:$0xff] }
 0x19e   :  { %v917_v41 = vrot.slane %v916_v61, 1  ;;  %v909_v50 = vadd.f32 %v908_v5, %v907_v40 }
 0x1a0   :  { %v918_v6 = vadd.f32 %v917_v41, %v916_v61  ;;  %v2159_v61 = vld [vmem:[#allocation4 + $0x2] ss:$0 sm:$0xff] }
 0x1a2   :  { %983 = vmatprep.mubr.f32.mxu0 %v918_v6  ;;  %v2158_v6 = vld [vmem:[#allocation4 + $0x1] ss:$0 sm:$0xff] }
 0x1a3   :  { %984 = vmatmul.mubr.f32.vlgmr.msra.gmra.mxu0 %v909_v50 }
 0x1a4   :  { %1024 = vmatpush1.msra.mxu0 %v193_v16  ;;  %1057 = vmatprep.mubr.f32.mxu0 %v2634_v51 }
 0x1a5   :  { %1329 = vmatprep.subr.mxu0 %v194_v52 }
 0x263   :  { %v2225_v27 = vpop.f32.mrf.mxu0 }
 0x265   :  { %v2226_v19 = vpop.f32.mrf.mxu0 }
 0x266   :  { %v2227_v20 = vadd.f32 %v2226_v19, %v2225_v27 }
 0x268   :  { %2156 = vmatmul.mubr.msk.f32.vlgmr.msra.gmra.mxu0 %vm989_vm6, %v2227_v20 }
 0x269   :  { %1330 = vmatpush1.msra.mxu0 %v193_v16  ;;  %1363 = vmatprep.mubr.f32.mxu0 %v2634_v51 }
 0x26a   :  { %2389 = vmatprep.subr.mxu0 %v2634_v51 }
 0x328   :  { %v1059_v14 = vpop.f32.mrf.mxu0 }
 0x329   :  { %v1064_v45 = vmul.f32 %v1059_v14, %v1059_v14 }
 0x32a   :  { %v1061_v55 = vpop.f32.mrf.mxu0 }
 0x32b   :  { %v1065_v56 = vsub.f32 %v1061_v55, %v1064_v45  ;;  %v2165_v55 = vld [vmem:[#allocation4 + $0x8] ss:$0 sm:$0xff] }
 0x32d   :  { %v1066_v46 = vmax.f32 %v1065_v56, 0.0 }
 0x32f   :  { %v1067_v34 = vadd.f32 1e-05, %v1066_v46 }
 0x331   :  { %2415 = vrsqrt.f32 %v1067_v34 }
 0x33e   :  { %v2416_v26 = vpop.eup %2415 }
 0x33f   :  { %v1069_v63 = vmul.f32 %v2416_v26, %v901_v35 }
 0x341   :  { %v1076_v58 = vmul.f32 %v1069_v63, %v1059_v14  ;;  %v1073_v0 = vrot.slane %v1069_v63, %v3102_v62 }
 0x343   :  { %v1077_v53 = vsub.f32 %v902_v54, %v1076_v58  ;;  %v1075_v4 = vmul.f32 %v1073_v0, %v900_v29  ;;  %v1074_v10 = vmul.f32 %v1073_v0, %v899_v42 }
 0x345   :  { %v1081_v7 = vrot.slane %v1077_v53, %v3102_v62 }
 0x347   :  { %v1083_v33 = vadd.f32 %v1081_v7, %v1075_v4  ;;  %v1082_v8 = vadd.f32 %v1081_v7, %v1074_v10 }
 0x349   :  { %v1085_v36 = vmax.f32 %v1083_v33, 0.0  ;;  %v1084_v11 = vmax.f32 %v1082_v8, 0.0 }
 0x34b   :  { %1123 = vrot.lane.b32.xlu1 %v1085_v36, %s2631_s24  ;;  %1121 = vrot.lane.b32.xlu0 %v1084_v11, %s2631_s24  ;;  %v1086_v9 = vrot.slane %v1084_v11, 7  ;;  %v1087_v12 = vrot.slane %v1085_v36, 7  ;;  %v1154_v15 = vrot.slane %v1084_v11, 1  ;;  %v1155_v21 = vrot.slane %v1085_v36, 1 }
 0x34c   :  { %v1137_v50 = vmul.f32 %v2161_v38, %v1084_v11  ;;  %v1138_v52 = vmul.f32 %v2161_v38, %v1085_v36 }
 0x34d   :  { %v1089_v48 = vsel %vm419_vm2, %v1087_v12, %v1086_v9  ;;  %v1088_v22 = vsel %vm419_vm2, %v1086_v9, %v1087_v12  ;;  %v1156_v13 = vsel %vm602_vm3, %v1154_v15, %v1155_v21  ;;  %v1157_v47 = vsel %vm602_vm3, %v1155_v21, %v1154_v15 }
 0x34e   :  { %v1090_v17 = vmul.f32 %v2423_v23, %v1089_v48  ;;  %v1091_v18 = vmul.f32 %v2424_v49, %v1088_v22  ;;  %v1158_v44 = vmul.f32 %v2425_v3, %v1156_v13  ;;  %v1159_v24 = vmul.f32 %v2426_v2, %v1157_v47 }
 0x34f   :  { %1143 = vrot.lane.b32.xlu1 %v1085_v36, %s2628_s23  ;;  %1141 = vrot.lane.b32.xlu0 %v1084_v11, %s2628_s23 }
 0x350   :  { %v1179_v20 = vmul.f32 %v2164_v60, %v1159_v24  ;;  %v1178_v45 = vmul.f32 %v2164_v60, %v1158_v44  ;;  %v1109_v26 = vmul.f32 %v2158_v6, %v1091_v18  ;;  %v1108_v63 = vmul.f32 %v2158_v6, %v1090_v17  ;;  %v1403_v6 = vld [vmem:[%s3375_s10 + $0x58] sm:$0xff] }
 0x353   :  { %1092 = vrot.lane.b32.xlu0 %v1090_v17, %s2631_s24  ;;  %1094 = vrot.lane.b32.xlu1 %v1091_v18, %s2631_s24 }
 0x357   :  { %1110 = vrot.lane.b32.xlu0 %v1090_v17, %s2628_s23  ;;  %1112 = vrot.lane.b32.xlu1 %v1091_v18, %s2628_s23  ;;  %v2166_v18 = vld [vmem:[#allocation15 + $0x3] ss:$0 sm:$0xff] }
 0x35b   :  { %1160 = vrot.lane.b32.xlu0 %v1158_v44, %s2631_s24  ;;  %1162 = vrot.lane.b32.xlu1 %v1159_v24, %s2631_s24 }
 0x35f   :  { %1182 = vrot.lane.b32.xlu0 %v1158_v44, %s2628_s23  ;;  %1184 = vrot.lane.b32.xlu1 %v1159_v24, %s2628_s23 }
 0x3bd   :  { %v1124_v25 = vpop.permute.xlu1 %1123  ;;  %v1122_v28 = vpop.permute.xlu0 %1121 }
 0x3be   :  { %v1131_v19 = vmul.f32 %v2160_v31, %v1124_v25  ;;  %v1130_v14 = vmul.f32 %v2160_v31, %v1122_v28 }
 0x3c0   :  { %v1181_v8 = vadd.f32 %v1179_v20, %v1131_v19  ;;  %v1180_v36 = vadd.f32 %v1178_v45, %v1130_v14  ;;  %v1398_v19 = vld [vmem:[%s3375_s10 + $0x30] sm:$0xff]  ;;  %v1397_v20 = vld [vmem:[%s3375_s10 + $0x28] sm:$0xff]  ;;  %v1396_v14 = vld [vmem:[%s3375_s10 + $0x20] sm:$0xff] }
 0x3c1   :  { %v1144_v1 = vpop.permute.xlu1 %1143  ;;  %v1142_v29 = vpop.permute.xlu0 %1141  ;;  %v1395_v45 = vld [vmem:[%s3375_s10 + $0x18] sm:$0xff] }
 0x3c2   :  { %v1151_v56 = vmul.f32 %v2162_v39, %v1144_v1  ;;  %v1150_v46 = vmul.f32 %v2162_v39, %v1142_v29 }
 0x3c4   :  { %v1153_v11 = vadd.f32 %v1151_v56, %v1109_v26  ;;  %v1152_v9 = vadd.f32 %v1150_v46, %v1108_v63  ;;  %v1393_v56 = vld [vmem:[%s3375_s10 + $0x8] sm:$0xff]  ;;  %v1392_v46 = vld [vmem:[%s3375_s10] sm:$0xff] }
 0x3c5   :  { %v1093_v42 = vpop.permute.xlu0 %1092  ;;  %v1095_v32 = vpop.permute.xlu1 %1094 }
 0x3c6   :  { %v1101_v57 = vmul.f32 %v2157_v30, %v1093_v42  ;;  %v1102_v40 = vmul.f32 %v2157_v30, %v1095_v32 }
 0x3c8   :  { %v1139_v54 = vadd.f32 %v1137_v50, %v1101_v57  ;;  %v1140_v58 = vadd.f32 %v1138_v52, %v1102_v40  ;;  %v1407_v40 = vld [vmem:[%s3375_s10 + $0x78] sm:$0xff]  ;;  %v1402_v50 = vld [vmem:[%s3375_s10 + $0x50] sm:$0xff]  ;;  %v1401_v52 = vld [vmem:[%s3375_s10 + $0x48] sm:$0xff] }
 0x3c9   :  { %v1111_v43 = vpop.permute.xlu0 %1110  ;;  %v1113_v37 = vpop.permute.xlu1 %1112  ;;  %2354 = vmatprep.subr.mxu1 %v1407_v40 }
 0x3ca   :  { %v1119_v34 = vmul.f32 %v2159_v61, %v1111_v43  ;;  %v1120_v35 = vmul.f32 %v2159_v61, %v1113_v37  ;;  %v1406_v61 = vld [vmem:[%s3375_s10 + $0x70] sm:$0xff] }
 0x3cd   :  { %v1161_v5 = vpop.permute.xlu0 %1160  ;;  %v1163_v41 = vpop.permute.xlu1 %1162 }
 0x3ce   :  { %v1169_v16 = vmul.f32 %v2163_v59, %v1161_v5  ;;  %v1170_v27 = vmul.f32 %v2163_v59, %v1163_v41  ;;  %v1405_v5 = vld [vmem:[%s3375_s10 + $0x68] sm:$0xff]  ;;  %v1404_v41 = vld [vmem:[%s3375_s10 + $0x60] sm:$0xff] }
 0x3d0   :  { %v1171_v4 = vadd.f32 %v1169_v16, %v1119_v34  ;;  %v1172_v7 = vadd.f32 %v1170_v27, %v1120_v35  ;;  %v1400_v16 = vld [vmem:[%s3375_s10 + $0x40] sm:$0xff]  ;;  %v1399_v27 = vld [vmem:[%s3375_s10 + $0x38] sm:$0xff] }
 0x3d1   :  { %v1183_v0 = vpop.permute.xlu0 %1182  ;;  %v1185_v53 = vpop.permute.xlu1 %1184 }
 0x3d2   :  { %v1191_v10 = vmul.f32 %v2165_v55, %v1183_v0  ;;  %v1192_v33 = vmul.f32 %v2165_v55, %v1185_v53  ;;  %v1197_v22 = vadd.f32 %v1180_v36, %v1171_v4  ;;  %v1198_v23 = vadd.f32 %v1181_v8, %v1172_v7  ;;  %v1394_v55 = vld [vmem:[%s3375_s10 + $0x10] sm:$0xff]  ;;  %v1208_v0 = vld [vmem:[#allocation15 + $0x4] sm:$0x1]  ;;  %v1209_v7 = vld [vmem:[#allocation15 + $0x5] sm:$0x1] }
 0x3d4   :  { %v1193_v12 = vadd.f32 %v1191_v10, %v1139_v54  ;;  %v1194_v48 = vadd.f32 %v1192_v33, %v1140_v58 }
 0x3d6   :  { %v1195_v49 = vadd.f32 %v1193_v12, %v1152_v9  ;;  %v1196_v15 = vadd.f32 %v1194_v48, %v1153_v11 }
 0x3d8   :  { %v1199_v17 = vadd.f32 %v1197_v22, %v1195_v49  ;;  %v1200_v21 = vadd.f32 %v1198_v23, %v1196_v15  ;;  %v1483_v15 = vld [vmem:[#allocation13] sm:$0xff] }
 0x3da   :  { %v3126_v13 = vadd.f32 %v2166_v18, %v1199_v17  ;;  %v3128_v47 = vadd.f32 %v2166_v18, %v1200_v21  ;;  %v226_v17 = vld [vmem:[%s3373_s8 + $0xf8] sm:$0xff] }
 0x3db   :  { %v210_v21 = vld [vmem:[%s3373_s8 + $0x78] sm:$0xff] }
 0x3dc   :  { %v1217_v3 = vmul.f32 %v3126_v13, %v3126_v13  ;;  %v1218_v44 = vmul.f32 %v3128_v47, %v3128_v47  ;;  %v1210_v2 = vadd.f32 %v3128_v47, %v3126_v13 }
 0x3de   :  { %v1219_v24 = vadd.f32 %v1218_v44, %v1217_v3  ;;  %v1211_v25 = vrot.slane %v1210_v2, 4  ;;  %v224_v3 = vld [vmem:[%s3373_s8 + $0xe8] sm:$0xff] }
 0x3df   :  { %v208_v44 = vld [vmem:[%s3373_s8 + $0x68] sm:$0xff] }
 0x3e0   :  { %v1220_v28 = vrot.slane %v1219_v24, 4  ;;  %v1212_v1 = vadd.f32 %v1211_v25, %v1210_v2  ;;  %v223_v2 = vld [vmem:[%s3373_s8 + $0xe0] sm:$0xff]  ;;  %v222_v25 = vld [vmem:[%s3373_s8 + $0xd8] sm:$0xff] }
 0x3e2   :  { %v1221_v29 = vadd.f32 %v1220_v28, %v1219_v24  ;;  %v1213_v42 = vrot.slane %v1212_v1, 2  ;;  %v207_v24 = vld [vmem:[%s3373_s8 + $0x60] sm:$0xff]  ;;  %v206_v28 = vld [vmem:[%s3373_s8 + $0x58] sm:$0xff] }
 0x3e4   :  { %v1222_v32 = vrot.slane %v1221_v29, 2  ;;  %v1214_v43 = vadd.f32 %v1213_v42, %v1212_v1  ;;  %v221_v1 = vld [vmem:[%s3373_s8 + $0xd0] sm:$0xff]  ;;  %v3229_v42 = vld [vmem:[%s3370_s5] sm:$0xff] }
 0x3e6   :  { %v1223_v37 = vadd.f32 %v1222_v32, %v1221_v29  ;;  %v1215_v30 = vrot.slane %v1214_v43, 1  ;;  %v205_v32 = vld [vmem:[%s3373_s8 + $0x50] sm:$0xff] }
 0x3e8   :  { %v1224_v38 = vrot.slane %v1223_v37, 1  ;;  %v1216_v31 = vadd.f32 %v1215_v30, %v1214_v43 }
 0x3ea   :  { %v1225_v59 = vadd.f32 %v1224_v38, %v1223_v37  ;;  %v220_v37 = vld [vmem:[%s3373_s8 + $0xc8] sm:$0xff] }
 0x3eb   :  { %v204_v38 = vld [vmem:[%s3373_s8 + $0x48] sm:$0xff] }
 0x3ec   :  { %1290 = vmatprep.mubr.f32.mxu1 %v1225_v59 }
 0x3ed   :  { %1291 = vmatmul.mubr.f32.vlgmr.msra.gmra.mxu1 %v1216_v31 }
 0x3ee   :  { %2355 = vmatpush3.msra.mxu1 %v1407_v40  ;;  %v218_v40 = vld [vmem:[%s3373_s8 + $0xb8] sm:$0xff] }
 0x3ef   :  { %2356 = vmatprep.subr.mxu1 %v1406_v61 }
 0x3f0   :  { %2357 = vmatpush3.msra.mxu1 %v1406_v61 }
 0x3f1   :  { %2358 = vmatprep.subr.mxu1 %v1405_v5 }
 0x3f2   :  { %2359 = vmatpush3.msra.mxu1 %v1405_v5  ;;  %v202_v5 = vld [vmem:[%s3373_s8 + $0x38] sm:$0xff] }
 0x3f3   :  { %2360 = vmatprep.subr.mxu1 %v1404_v41 }
 0x3f4   :  { %2361 = vmatpush3.msra.mxu1 %v1404_v41  ;;  %v217_v41 = vld [vmem:[%s3373_s8 + $0xb0] sm:$0xff] }
 0x3f5   :  { %2362 = vmatprep.subr.mxu1 %v1403_v6 }
 0x3f6   :  { %2363 = vmatpush3.msra.mxu1 %v1403_v6  ;;  %v201_v6 = vld [vmem:[%s3373_s8 + $0x30] sm:$0xff] }
 0x3f7   :  { %2364 = vmatprep.subr.mxu1 %v1402_v50 }
 0x3f8   :  { %2365 = vmatpush3.msra.mxu1 %v1402_v50  ;;  %v216_v50 = vld [vmem:[%s3373_s8 + $0xa8] sm:$0xff] }
 0x3f9   :  { %2366 = vmatprep.subr.mxu1 %v1401_v52 }
 0x3fa   :  { %2367 = vmatpush3.msra.mxu1 %v1401_v52  ;;  %v200_v52 = vld [vmem:[%s3373_s8 + $0x28] sm:$0xff] }
 0x3fb   :  { %2368 = vmatprep.subr.mxu1 %v1400_v16 }
 0x3fc   :  { %2369 = vmatpush3.msra.mxu1 %v1400_v16  ;;  %v215_v16 = vld [vmem:[%s3373_s8 + $0xa0] sm:$0xff] }
 0x3fd   :  { %2370 = vmatprep.subr.mxu1 %v1399_v27 }
 0x3fe   :  { %2371 = vmatpush3.msra.mxu1 %v1399_v27  ;;  %v199_v27 = vld [vmem:[%s3373_s8 + $0x20] sm:$0xff] }
 0x3ff   :  { %2372 = vmatprep.subr.mxu1 %v1398_v19 }
 0x400   :  { %2373 = vmatpush3.msra.mxu1 %v1398_v19  ;;  %v214_v19 = vld [vmem:[%s3373_s8 + $0x98] sm:$0xff] }
 0x401   :  { %2374 = vmatprep.subr.mxu1 %v1397_v20 }
 0x402   :  { %2375 = vmatpush3.msra.mxu1 %v1397_v20  ;;  %v198_v20 = vld [vmem:[%s3373_s8 + $0x18] sm:$0xff] }
 0x403   :  { %2376 = vmatprep.subr.mxu1 %v1396_v14 }
 0x404   :  { %2377 = vmatpush3.msra.mxu1 %v1396_v14  ;;  %v213_v14 = vld [vmem:[%s3373_s8 + $0x90] sm:$0xff] }
 0x405   :  { %2378 = vmatprep.subr.mxu1 %v1395_v45 }
 0x406   :  { %2379 = vmatpush3.msra.mxu1 %v1395_v45  ;;  %v197_v45 = vld [vmem:[%s3373_s8 + $0x10] sm:$0xff] }
 0x407   :  { %2380 = vmatprep.subr.mxu1 %v1394_v55 }
 0x408   :  { %2381 = vmatpush3.msra.mxu1 %v1394_v55  ;;  %v212_v55 = vld [vmem:[%s3373_s8 + $0x88] sm:$0xff] }
 0x409   :  { %2382 = vmatprep.subr.mxu1 %v1393_v56 }
 0x40a   :  { %2383 = vmatpush3.msra.mxu1 %v1393_v56  ;;  %v196_v56 = vld [vmem:[%s3373_s8 + $0x8] sm:$0xff] }
 0x40b   :  { %2384 = vmatprep.subr.mxu1 %v1392_v46 }
 0x40c   :  { %2385 = vmatpush3.msra.mxu1 %v1392_v46  ;;  %v211_v46 = vld [vmem:[%s3373_s8 + $0x80] sm:$0xff] }
 0x40d   :  { %2319 = vmatprep.subr.mxu1 %v226_v17 }
 0x4ad   :  { %v2260_v60 = vpop.f32.mrf.mxu1 }
 0x4af   :  { %v2261_v39 = vpop.f32.mrf.mxu1 }
 0x4b0   :  { %v2262_v57 = vadd.f32 %v2261_v39, %v2260_v60  ;;  %v219_v60 = vld [vmem:[%s3373_s8 + $0xc0] sm:$0xff]  ;;  %v3255_v39 = vld [vmem:[%s3370_s5 + $0x10] sm:$0xff] }
 0x4b2   :  { %2167 = vmatmul.mubr.msk.f32.vlgmr.msra.gmra.mxu0 %vm989_vm6, %v2262_v57  ;;  %v203_v57 = vld [vmem:[%s3373_s8 + $0x40] sm:$0xff] }
 0x4b3   :  { %2393 = vmatprep.mubr.msk.f32.mxu0 %vm2635_vm7, %v2634_v51 }
 0x572   :  { %v1365_v34 = vpop.f32.mrf.mxu0 }
 0x573   :  { %v1370_v35 = vmul.f32 %v1365_v34, %v1365_v34 }
 0x574   :  { %v1367_v26 = vpop.f32.mrf.mxu0 }
 0x575   :  { %v1371_v63 = vsub.f32 %v1367_v26, %v1370_v35 }
 0x577   :  { %v1372_v54 = vmax.f32 %v1371_v63, 0.0  ;;  %v2169_v63 = vld [vmem:[#allocation6] ss:$0 sm:$0xff] }
 0x579   :  { %v1373_v58 = vadd.f32 1e-05, %v1372_v54  ;;  %v2174_v54 = vld [vmem:[#allocation6 + $0x5] ss:$0 sm:$0xff] }
 0x57b   :  { %2417 = vrsqrt.f32 %v1373_v58  ;;  %v2172_v58 = vld [vmem:[#allocation6 + $0x3] ss:$0 sm:$0xff] }
 0x588   :  { %v2418_v53 = vpop.eup %2417 }
 0x589   :  { %v1375_v4 = vmul.f32 %v2418_v53, %v1208_v0  ;;  %v2173_v53 = vld [vmem:[#allocation6 + $0x4] ss:$0 sm:$0xff] }
 0x58b   :  { %v1379_v10 = vrot.slane %v1375_v4, %v3102_v62  ;;  %v1382_v33 = vmul.f32 %v1375_v4, %v1365_v34  ;;  %v195_v34 = vld [vmem:[%s3373_s8] sm:$0xff] }
 0x58d   :  { %v1383_v8 = vsub.f32 %v1209_v7, %v1382_v33  ;;  %v1380_v36 = vmul.f32 %v1379_v10, %v3126_v13  ;;  %v1381_v9 = vmul.f32 %v1379_v10, %v3128_v47  ;;  %v225_v13 = vld [vmem:[%s3373_s8 + $0xf0] sm:$0xff]  ;;  %v2170_v7 = vld [vmem:[#allocation6 + $0x1] ss:$0 sm:$0xff]  ;;  %v2176_v10 = vld [vmem:[#allocation6 + $0x7] ss:$0 sm:$0xff] }
 0x58e   :  { %v209_v47 = vld [vmem:[%s3373_s8 + $0x70] sm:$0xff] }
 0x58f   :  { %v1387_v11 = vrot.slane %v1383_v8, %v3102_v62  ;;  %v2171_v8 = vld [vmem:[#allocation6 + $0x2] ss:$0 sm:$0xff] }
 0x591   :  { %v1388_v12 = vadd.f32 %v1387_v11, %v1380_v36  ;;  %v1389_v48 = vadd.f32 %v1387_v11, %v1381_v9  ;;  %v2177_v36 = vld [vmem:[#allocation6 + $0x8] ss:$0 sm:$0xff]  ;;  %v2175_v11 = vld [vmem:[#allocation6 + $0x6] ss:$0 sm:$0xff] }
 0x593   :  { %v1390_v22 = vmax.f32 %v1388_v12, 0.0  ;;  %v1391_v23 = vmax.f32 %v1389_v48, 0.0 }
 0x595   :  { %2386 = vmatprep.mubr.f32.mxu1 %v1390_v22 }
 0x596   :  { %2387 = vmatmul.mubr.f32.vlgmr.msra.gmra.mxu1 %v1391_v23 }
 0x597   :  { %2320 = vmatpush3.msra.mxu1 %v210_v21 }
 0x598   :  { %2321 = vmatprep.subr.mxu1 %v225_v13 }
 0x599   :  { %2322 = vmatpush3.msra.mxu1 %v209_v47 }
 0x59a   :  { %2323 = vmatprep.subr.mxu1 %v224_v3 }
 0x59b   :  { %2324 = vmatpush3.msra.mxu1 %v208_v44 }
 0x59c   :  { %2325 = vmatprep.subr.mxu1 %v223_v2 }
 0x59d   :  { %2326 = vmatpush3.msra.mxu1 %v207_v24 }
 0x59e   :  { %2327 = vmatprep.subr.mxu1 %v222_v25 }
 0x59f   :  { %2328 = vmatpush3.msra.mxu1 %v206_v28 }
 0x5a0   :  { %2329 = vmatprep.subr.mxu1 %v221_v1 }
 0x5a1   :  { %2330 = vmatpush3.msra.mxu1 %v205_v32 }
 0x5a2   :  { %2331 = vmatprep.subr.mxu1 %v220_v37 }
 0x5a3   :  { %2332 = vmatpush3.msra.mxu1 %v204_v38 }
 0x5a4   :  { %2333 = vmatprep.subr.mxu1 %v219_v60 }
 0x5a5   :  { %2334 = vmatpush3.msra.mxu1 %v203_v57 }
 0x5a6   :  { %2335 = vmatprep.subr.mxu1 %v218_v40 }
 0x5a7   :  { %2336 = vmatpush3.msra.mxu1 %v202_v5 }
 0x5a8   :  { %2337 = vmatprep.subr.mxu1 %v217_v41 }
 0x5a9   :  { %2338 = vmatpush3.msra.mxu1 %v201_v6 }
 0x5aa   :  { %2339 = vmatprep.subr.mxu1 %v216_v50 }
 0x5ab   :  { %2340 = vmatpush3.msra.mxu1 %v200_v52 }
 0x5ac   :  { %2341 = vmatprep.subr.mxu1 %v215_v16 }
 0x5ad   :  { %2342 = vmatpush3.msra.mxu1 %v199_v27 }
 0x5ae   :  { %2343 = vmatprep.subr.mxu1 %v214_v19 }
 0x5af   :  { %2344 = vmatpush3.msra.mxu1 %v198_v20 }
 0x5b0   :  { %2345 = vmatprep.subr.mxu1 %v213_v14 }
 0x5b1   :  { %2346 = vmatpush3.msra.mxu1 %v197_v45 }
 0x5b2   :  { %2347 = vmatprep.subr.mxu1 %v212_v55 }
 0x5b3   :  { %2348 = vmatpush3.msra.mxu1 %v196_v56 }
 0x5b4   :  { %2349 = vmatprep.subr.mxu1 %v211_v46 }
 0x5b5   :  { %2350 = vmatpush3.msra.mxu1 %v195_v34 }
 0x656   :  { %v2388_v49 = vpop.f32.mrf.mxu1 }
 0x657   :  { %2390 = vmatpush3.msra.mxu0 %v2388_v49 }
 0x658   :  { %v1474_v18 = vpop.f32.mrf.mxu1  ;;  %2391 = vmatprep.subr.mxu0 %v2634_v51 }
 0x659   :  { %2392 = vmatpush3.msra.mxu0 %v1474_v18 }
 0x65a   :  { %2394 = vmatmul.mubr.msk.f32.vlgmr.msra.gmra.mxu0 %vm1484_vm8, %v1483_v15  ;;  %2284 = vmatprep.subr.mxu0 %v226_v17 }
 0x65b   :  { %2285 = vmatpush3.msra.mxu0 %v210_v21 }
 0x65c   :  { %2286 = vmatprep.subr.mxu0 %v225_v13 }
 0x65d   :  { %2287 = vmatpush3.msra.mxu0 %v209_v47 }
 0x65e   :  { %2288 = vmatprep.subr.mxu0 %v224_v3 }
 0x65f   :  { %2289 = vmatpush3.msra.mxu0 %v208_v44 }
 0x660   :  { %2290 = vmatprep.subr.mxu0 %v223_v2 }
 0x661   :  { %2291 = vmatpush3.msra.mxu0 %v207_v24 }
 0x662   :  { %2292 = vmatprep.subr.mxu0 %v222_v25 }
 0x663   :  { %2293 = vmatpush3.msra.mxu0 %v206_v28  ;;  %v2178_v28 = vld [vmem:[%s3378_s13] ss:$0 sm:$0xff] }
 0x664   :  { %2294 = vmatprep.subr.mxu0 %v221_v1 }
 0x665   :  { %2295 = vmatpush3.msra.mxu0 %v205_v32 }
 0x666   :  { %2296 = vmatprep.subr.mxu0 %v220_v37 }
 0x667   :  { %2297 = vmatpush3.msra.mxu0 %v204_v38 }
 0x668   :  { %2298 = vmatprep.subr.mxu0 %v219_v60 }
 0x669   :  { %2299 = vmatpush3.msra.mxu0 %v203_v57 }
 0x66a   :  { %2300 = vmatprep.subr.mxu0 %v218_v40 }
 0x66b   :  { %2301 = vmatpush3.msra.mxu0 %v202_v5 }
 0x66c   :  { %2302 = vmatprep.subr.mxu0 %v217_v41 }
 0x66d   :  { %2303 = vmatpush3.msra.mxu0 %v201_v6  ;;  %v228_v6 = vld [vmem:[#allocation12 + $0x8] sm:$0xff] }
 0x66e   :  { %2304 = vmatprep.subr.mxu0 %v216_v50  ;;  %v227_v50 = vld [vmem:[#allocation12] sm:$0xff] }
 0x66f   :  { %2305 = vmatpush3.msra.mxu0 %v200_v52 }
 0x670   :  { %2306 = vmatprep.subr.mxu0 %v215_v16 }
 0x671   :  { %2307 = vmatpush3.msra.mxu0 %v199_v27 }
 0x672   :  { %2308 = vmatprep.subr.mxu0 %v214_v19 }
 0x673   :  { %2309 = vmatpush3.msra.mxu0 %v198_v20 }
 0x674   :  { %2310 = vmatprep.subr.mxu0 %v213_v14 }
 0x675   :  { %2311 = vmatpush3.msra.mxu0 %v197_v45 }
 0x676   :  { %2312 = vmatprep.subr.mxu0 %v212_v55 }
 0x677   :  { %2313 = vmatpush3.msra.mxu0 %v196_v56 }
 0x678   :  { %2314 = vmatprep.subr.mxu0 %v211_v46  ;;  %v1644_v46 = vld [vmem:[%s3378_s13 + $0x1] sm:$0x1] }
 0x679   :  { %2315 = vmatpush3.msra.mxu0 %v195_v34 }
 0x67a   :  { %1762 = vmatprep.subr.mxu0 %v228_v6 }
 0x71a   :  { %v3224_v29 = vpop.f32.mrf.mxu0 }
 0x71b   :  { %v1558_v43 = vrot.slane %v3224_v29, 7  ;;  %1598 = vrot.lane.b32.xlu1 %v3224_v29, %s2628_s23  ;;  %1583 = vrot.lane.b32.xlu0 %v3224_v29, %s2631_s24  ;;  %v1607_v59 = vrot.slane %v3224_v29, 1  ;;  %v1596_v48 = vmul.f32 %v2173_v53, %v3224_v29 }
 0x71c   :  { %v2395_v30 = vpop.f32.mrf.mxu0 }
 0x71d   :  { %v3247_v31 = vmul.f32 %v3229_v42, %v1558_v43  ;;  %v3268_v61 = vmul.f32 %v3255_v39, %v1607_v59 }
 0x71f   :  { %1575 = vrot.lane.b32.xlu1 %v3247_v31, %s2628_s23  ;;  %1561 = vrot.lane.b32.xlu0 %v3247_v31, %s2631_s24  ;;  %v1574_v22 = vmul.f32 %v2170_v7, %v3247_v31  ;;  %v1624_v23 = vmul.f32 %v2176_v10, %v3268_v61 }
 0x723   :  { %1626 = vrot.lane.b32.xlu1 %v3268_v61, %s2628_s23  ;;  %1610 = vrot.lane.b32.xlu0 %v3268_v61, %s2631_s24 }
 0x78d   :  { %v1599_v35 = vpop.permute.xlu1 %1598  ;;  %v1584_v26 = vpop.permute.xlu0 %1583 }
 0x78e   :  { %v1605_v9 = vmul.f32 %v2174_v54, %v1599_v35  ;;  %v1590_v12 = vmul.f32 %v2172_v58, %v1584_v26  ;;  %v1645_v26 = vld [vmem:[%s3378_s13 + $0x2] sm:$0x1] }
 0x790   :  { %v1606_v47 = vadd.f32 %v1605_v9, %v1574_v22  ;;  %v1625_v3 = vadd.f32 %v1624_v23, %v1590_v12  ;;  %v2180_v9 = vld [vmem:[#allocation6 + $0x9] ss:$0 sm:$0xff]  ;;  %v2185_v12 = vld [vmem:[#allocation6 + $0xe] ss:$0 sm:$0xff]  ;;  %v2184_v23 = vld [vmem:[#allocation6 + $0xd] ss:$0 sm:$0xff] }
 0x791   :  { %v1576_v0 = vpop.permute.xlu1 %1575  ;;  %v1562_v4 = vpop.permute.xlu0 %1561 }
 0x792   :  { %v1568_v33 = vmul.f32 %v2169_v63, %v1562_v4  ;;  %v1582_v18 = vmul.f32 %v2171_v8, %v1576_v0 }
 0x794   :  { %v1597_v17 = vadd.f32 %v1596_v48, %v1568_v33  ;;  %v2183_v48 = vld [vmem:[#allocation6 + $0xc] ss:$0 sm:$0xff] }
 0x795   :  { %v1627_v49 = vpop.permute.xlu1 %1626  ;;  %v1611_v15 = vpop.permute.xlu0 %1610 }
 0x796   :  { %v1633_v21 = vmul.f32 %v2177_v36, %v1627_v49  ;;  %v1617_v13 = vmul.f32 %v2175_v11, %v1611_v15  ;;  %v2187_v15 = vld [vmem:[#allocation6 + $0x10] ss:$0 sm:$0xff] }
 0x798   :  { %v1634_v44 = vadd.f32 %v1633_v21, %v1597_v17  ;;  %v1618_v2 = vadd.f32 %v1617_v13, %v1582_v18  ;;  %v2182_v17 = vld [vmem:[#allocation6 + $0xb] ss:$0 sm:$0xff]  ;;  %v2188_v21 = vld [vmem:[#allocation6 + $0x11] ss:$0 sm:$0xff]  ;;  %v2186_v13 = vld [vmem:[#allocation6 + $0xf] ss:$0 sm:$0xff] }
 0x79a   :  { %v1635_v24 = vadd.f32 %v1634_v44, %v1606_v47  ;;  %v1636_v25 = vadd.f32 %v1625_v3, %v1618_v2 }
 0x79c   :  { %v1637_v1 = vadd.f32 %v1636_v25, %v1635_v24 }
 0x79e   :  { %v1643_v29 = vadd.f32 %v2178_v28, %v1637_v1 }
 0x7a0   :  { %v1652_v32 = vmul.f32 %v1643_v29, %v1643_v29  ;;  %v1646_v43 = vrot.slane %v1643_v29, 4 }
 0x7a2   :  { %v1653_v37 = vrot.slane %v1652_v32, 4  ;;  %v1647_v30 = vadd.f32 %v1646_v43, %v1643_v29 }
 0x7a4   :  { %v1654_v38 = vadd.f32 %v1653_v37, %v1652_v32  ;;  %v1648_v59 = vrot.slane %v1647_v30, 2 }
 0x7a6   :  { %v1655_v31 = vrot.slane %v1654_v38, 2  ;;  %v1649_v60 = vadd.f32 %v1648_v59, %v1647_v30 }
 0x7a8   :  { %v1656_v57 = vadd.f32 %v1655_v31, %v1654_v38  ;;  %v1650_v40 = vrot.slane %v1649_v60, 1 }
 0x7aa   :  { %v1657_v61 = vrot.slane %v1656_v57, 1  ;;  %v1651_v41 = vadd.f32 %v1650_v40, %v1649_v60  ;;  %v2189_v60 = vld [vmem:[%s3378_s13 + $0x3] ss:$0 sm:$0xff] }
 0x7ac   :  { %v1658_v5 = vadd.f32 %v1657_v61, %v1656_v57 }
 0x7ae   :  { %1723 = vmatprep.mubr.f32.mxu0 %v1658_v5 }
 0x7af   :  { %1724 = vmatmul.mubr.f32.vlgmr.msra.gmra.mxu0 %v1651_v41 }
 0x7b0   :  { %1796 = vmatprep.mubr.f32.mxu0 %v2634_v51  ;;  %1763 = vmatpush1.msra.mxu0 %v227_v50 }
 0x7b1   :  { %2024 = vmatprep.subr.mxu0 %v228_v6 }
 0x86f   :  { %v2316_v52 = vpop.f32.mrf.mxu0 }
 0x871   :  { %v2317_v16 = vpop.f32.mrf.mxu0 }
 0x872   :  { %v2318_v27 = vadd.f32 %v2317_v16, %v2316_v52 }
 0x874   :  { %2179 = vmatmul.mubr.msk.f32.vlgmr.msra.gmra.mxu0 %vm989_vm6, %v2318_v27 }
 0x875   :  { %2025 = vmatpush1.msra.mxu0 %v227_v50  ;;  %2058 = vmatprep.mubr.f32.mxu0 %v2634_v51 }
 0x934   :  { %v1798_v19 = vpop.f32.mrf.mxu0 }
 0x935   :  { %v1803_v20 = vmul.f32 %v1798_v19, %v1798_v19 }
 0x936   :  { %v1800_v14 = vpop.f32.mrf.mxu0 }
 0x937   :  { %v1804_v45 = vsub.f32 %v1800_v14, %v1803_v20 }
 0x939   :  { %v1805_v55 = vmax.f32 %v1804_v45, 0.0 }
 0x93b   :  { %v1806_v56 = vadd.f32 1e-05, %v1805_v55 }
 0x93d   :  { %2419 = vrsqrt.f32 %v1806_v56 }
 0x94a   :  { %v2420_v34 = vpop.eup %2419 }
 0x94b   :  { %v1808_v35 = vmul.f32 %v2420_v34, %v1644_v46 }
 0x94d   :  { %v1814_v63 = vmul.f32 %v1808_v35, %v1798_v19  ;;  %v1812_v51 = vrot.slane %v1808_v35, %v3102_v62 }
 0x94f   :  { %v1815_v54 = vsub.f32 %v1645_v26, %v1814_v63  ;;  %v1813_v58 = vmul.f32 %v1812_v51, %v1643_v29 }
 0x951   :  { %v1819_v0 = vrot.slane %v1815_v54, %v3102_v62 }
 0x953   :  { %v1820_v53 = vadd.f32 %v1819_v0, %v1813_v58  ;;  %v1906_v0 = vld [vmem:[%s3378_s13 + $0x4] sm:$0x1] }
 0x955   :  { %v1821_v4 = vmax.f32 %v1820_v53, 0.0 }
 0x957   :  { %1861 = vrot.lane.b32.xlu1 %v1821_v4, %s2628_s23  ;;  %1846 = vrot.lane.b32.xlu0 %v1821_v4, %s2631_s24  ;;  %v1822_v7 = vrot.slane %v1821_v4, 7  ;;  %v1870_v33 = vrot.slane %v1821_v4, 1  ;;  %v1859_v3 = vmul.f32 %v2184_v23, %v1821_v4 }
 0x959   :  { %v1823_v10 = vmul.f32 %v1822_v7, %v3229_v42  ;;  %v1871_v8 = vmul.f32 %v1870_v33, %v3255_v39  ;;  %v2181_v42 = vld [vmem:[#allocation6 + $0xa] ss:$0 sm:$0xff]  ;;  %v1907_v7 = vld [vmem:[%s3378_s13 + $0x5] sm:$0x1] }
 0x95b   :  { %1838 = vrot.lane.b32.xlu1 %v1823_v10, %s2628_s23  ;;  %1824 = vrot.lane.b32.xlu0 %v1823_v10, %s2631_s24  ;;  %v1837_v44 = vmul.f32 %v2181_v42, %v1823_v10  ;;  %v1886_v2 = vmul.f32 %v2187_v15, %v1871_v8 }
 0x95f   :  { %1888 = vrot.lane.b32.xlu1 %v1871_v8, %s2628_s23  ;;  %1872 = vrot.lane.b32.xlu0 %v1871_v8, %s2631_s24 }
 0x9c9   :  { %v1862_v36 = vpop.permute.xlu1 %1861  ;;  %v1847_v11 = vpop.permute.xlu0 %1846 }
 0x9ca   :  { %v1868_v47 = vmul.f32 %v2185_v12, %v1862_v36  ;;  %v1853_v39 = vmul.f32 %v2183_v48, %v1847_v11  ;;  %v2191_v12 = vld [vmem:[%s3378_s13 + $0x6] ss:$0 sm:$0xff] }
 0x9cc   :  { %v1869_v43 = vadd.f32 %v1868_v47, %v1837_v44  ;;  %v1887_v37 = vadd.f32 %v1886_v2, %v1853_v39 }
 0x9cd   :  { %v1839_v22 = vpop.permute.xlu1 %1838  ;;  %v1825_v49 = vpop.permute.xlu0 %1824 }
 0x9ce   :  { %v1831_v18 = vmul.f32 %v2180_v9, %v1825_v49  ;;  %v1845_v28 = vmul.f32 %v2182_v17, %v1839_v22  ;;  %v2192_v22 = vld [vmem:[%s3378_s13 + $0x7] ss:$0 sm:$0xff] }
 0x9d0   :  { %v1860_v1 = vadd.f32 %v1859_v3, %v1831_v18 }
 0x9d1   :  { %v1889_v24 = vpop.permute.xlu1 %1888  ;;  %v1873_v25 = vpop.permute.xlu0 %1872 }
 0x9d2   :  { %v1895_v29 = vmul.f32 %v2188_v21, %v1889_v24  ;;  %v1879_v32 = vmul.f32 %v2186_v13, %v1873_v25 }
 0x9d4   :  { %v1896_v30 = vadd.f32 %v1895_v29, %v1860_v1  ;;  %v1880_v38 = vadd.f32 %v1879_v32, %v1845_v28 }
 0x9d6   :  { %v1897_v59 = vadd.f32 %v1896_v30, %v1869_v43  ;;  %v1898_v31 = vadd.f32 %v1887_v37, %v1880_v38 }
 0x9d8   :  { %v1899_v57 = vadd.f32 %v1898_v31, %v1897_v59 }
 0x9da   :  { %v1905_v40 = vadd.f32 %v2189_v60, %v1899_v57 }
 0x9dc   :  { %v1914_v61 = vmul.f32 %v1905_v40, %v1905_v40  ;;  %v1908_v5 = vrot.slane %v1905_v40, 4 }
 0x9de   :  { %v1915_v41 = vrot.slane %v1914_v61, 4  ;;  %v1909_v6 = vadd.f32 %v1908_v5, %v1905_v40 }
 0x9e0   :  { %v1916_v50 = vadd.f32 %v1915_v41, %v1914_v61  ;;  %v1910_v52 = vrot.slane %v1909_v6, 2 }
 0x9e2   :  { %v1917_v16 = vrot.slane %v1916_v50, 2  ;;  %v1911_v27 = vadd.f32 %v1910_v52, %v1909_v6 }
 0x9e4   :  { %v1918_v19 = vadd.f32 %v1917_v16, %v1916_v50  ;;  %v1912_v20 = vrot.slane %v1911_v27, 1 }
 0x9e6   :  { %v1919_v14 = vrot.slane %v1918_v19, 1  ;;  %v1913_v55 = vadd.f32 %v1912_v20, %v1911_v27 }
 0x9e8   :  { %v1920_v45 = vadd.f32 %v1919_v14, %v1918_v19 }
 0x9ea   :  { %1985 = vmatprep.mubr.f32.mxu1 %v1920_v45 }
 0x9eb   :  { %1986 = vmatmul.mubr.f32.vlgmr.msra.gmra.mxu1 %v1913_v55 }
 0xaab   :  { %v2351_v56 = vpop.f32.mrf.mxu1 }
 0xaad   :  { %v2352_v46 = vpop.f32.mrf.mxu1 }
 0xaae   :  { %v2353_v34 = vadd.f32 %v2352_v46, %v2351_v56 }
 0xab0   :  { %2190 = vmatmul.mubr.msk.f32.vlgmr.msra.gmra.mxu0 %vm989_vm6, %v2353_v34 }
 0xb70   :  { %v2060_v35 = vpop.f32.mrf.mxu0 }
 0xb71   :  { %v2065_v26 = vmul.f32 %v2060_v35, %v2060_v35 }
 0xb72   :  { %v2062_v63 = vpop.f32.mrf.mxu0 }
 0xb73   :  { %v2066_v51 = vsub.f32 %v2062_v63, %v2065_v26 }
 0xb75   :  { %v2067_v54 = vmax.f32 %v2066_v51, 0.0 }
 0xb77   :  { %v2068_v58 = vadd.f32 1e-05, %v2067_v54 }
 0xb79   :  { %2421 = vrsqrt.f32 %v2068_v58 }
 0xb86   :  { %v2422_v53 = vpop.eup %2421 }
 0xb87   :  { %v2070_v4 = vmul.f32 %v2422_v53, %v1906_v0 }
 0xb89   :  { %v2074_v10 = vrot.slane %v2070_v4, %v3102_v62  ;;  %v2076_v33 = vmul.f32 %v2070_v4, %v2060_v35 }
 0xb8b   :  { %v2077_v8 = vsub.f32 %v1907_v7, %v2076_v33  ;;  %v2075_v36 = vmul.f32 %v2074_v10, %v1905_v40 }
 0xb8d   :  { %v2081_v11 = vrot.slane %v2077_v8, %v3102_v62 }
 0xb8f   :  { %v2082_v9 = vadd.f32 %v2081_v11, %v2075_v36 }
 0xb91   :  { %v2083_v48 = vmax.f32 %v2082_v9, 0.0 }
 0xb93   :  { %v2089_v23 = vmul.f32 %v2191_v12, %v2083_v48 }
 0xb95   :  { %v2095_v49 = vadd.f32 %v2192_v22, %v2089_v23 }
 0xb97   :  { %2096 = vst [vmem:[%s3379_s14] sm:$0xff] %v2095_v49 }
 0xb98   :  { %2101 = vsyncpa [#allocation3], 1 }
 0xb99   :  { %2102 = vsyncpa [#allocation5], 1 }
 0xb9a   :  { %2103 = vsyncpa [#allocation8], 1 }
 0xb9b   :  { %2104 = vsyncpa [#allocation11], 1 }
 0xb9c   :  { %2105 = vsyncpa [#allocation14], 1 }

</bundles_post_ra>
